<compile_context>
chip_gen: v5e
topology: v5e:2x2
jax: 0.10.0
libtpu: 0.0.40
codegen_flags: <defaults>
</compile_context>

<pallas_src>
import functools

import jax
import jax.numpy as jnp
from jax import lax
from jax.experimental import pallas as pl
from jax.experimental.pallas import tpu as pltpu


def _round_up(n, m):
    return ((n + m - 1) // m) * m


def _group_norm(x, gamma, beta, group_masks, inv_cnt, eps):
    """GroupNorm of a per-sample (M, C) activation (consecutive-channel groups).

    group_masks are hoisted (1, C) boolean masks shared by both GN layers.
    One-pass E[x^2]-E[x]^2 variance, clamped >= 0 before rsqrt.
    """
    csum = jnp.sum(x, axis=0, keepdims=True)          # (1, C) exact f32 reduce
    csq = jnp.sum(x * x, axis=0, keepdims=True)       # (1, C)
    mean_row = jnp.zeros_like(csum)
    inv_row = jnp.zeros_like(csum)
    for msk in group_masks:
        gs = jnp.sum(jnp.where(msk, csum, 0.0), axis=1, keepdims=True)   # (1, 1)
        gq = jnp.sum(jnp.where(msk, csq, 0.0), axis=1, keepdims=True)    # (1, 1)
        mu = gs * inv_cnt
        var = jnp.maximum(gq * inv_cnt - mu * mu, 0.0)
        mean_row = jnp.where(msk, mu, mean_row)
        inv_row = jnp.where(msk, lax.rsqrt(var + eps), inv_row)
    return (x - mean_row) * (inv_row * gamma) + beta


def _res_se_down2_kernel(x_ref, ml_ref, mr_ref,
                         w1_ref, b1_ref, g1_ref, be1_ref,
                         sw1_ref, sw2_ref,
                         w2_ref, b2_ref, g2_ref, be2_ref,
                         out_ref, buf1_ref, buf2_ref, acc_ref,
                         *, gn, eps, W2, r0):
    M, Cin = x_ref.shape
    Cout = out_ref.shape[-1]
    Cg = Cout // gn
    inv_cnt = 1.0 / float(M * Cg)
    mb = buf1_ref.shape[0]

    # Zero ONLY the halo rows every step (interior rows are fully overwritten).
    buf1_ref[0:r0, :] = jnp.zeros((r0, Cin), jnp.float32)
    buf1_ref[r0 + M:, :] = jnp.zeros((mb - r0 - M, Cin), jnp.float32)
    buf2_ref[0:r0, :] = jnp.zeros((r0, Cout), jnp.float32)
    buf2_ref[r0 + M:, :] = jnp.zeros((mb - r0 - M, Cout), jnp.float32)

    # Hoisted masks: W-border validity (precomputed wrapper-side, {0,1} f32) and
    # GroupNorm channel-group masks (shared by both GN layers).
    mask_l = ml_ref[...]                 # (M, 1): 0 where x == 0      (dx = -1 taps)
    mask_r = mr_ref[...]                 # (M, 1): 0 where x == W2 - 1 (dx = +1 taps)
    cidx = lax.broadcasted_iota(jnp.int32, (1, Cout), 1)
    gmasks = [(cidx >= g * Cg) & (cidx < (g + 1) * Cg) for g in range(gn)]

    def conv3x3(buf_ref, w_ref):
        # 3x3 "same" conv as 9 shifted-view (M, C) @ (C, Cout) bf16 MXU matmuls
        # accumulated into the shared f32 VMEM accumulator.
        for t in range(9):
            kh, kw = divmod(t, 3)
            dx = kw - 1
            start = r0 + (kh - 1) * W2 + dx        # static sublane-slice offset
            lhs = buf_ref[start:start + M, :]
            if dx == -1:
                lhs = lhs * mask_l
            elif dx == 1:
                lhs = lhs * mask_r
            contrib = jnp.dot(lhs.astype(jnp.bfloat16), w_ref[t],
                              preferred_element_type=jnp.float32)
            if t == 0:
                acc_ref[...] = contrib
            else:
                acc_ref[...] += contrib
        return acc_ref[...]

    # ---- conv1 -> GroupNorm -> ReLU ----
    buf1_ref[r0:r0 + M, :] = x_ref[...]        # aligned interior store (r0 % 8 == 0)
    y1 = conv3x3(buf1_ref, w1_ref) + b1_ref[...]
    x1 = jnp.maximum(
        _group_norm(y1, g1_ref[...], be1_ref[...], gmasks, inv_cnt, eps), 0.0)

    # ---- SE gate: global avg pool -> FC -> ReLU -> FC -> sigmoid ----
    m_vec = jnp.sum(x1, axis=0, keepdims=True) * (1.0 / M)            # (1, Cout)
    h = jnp.maximum(jnp.dot(m_vec, sw1_ref[...],
                            preferred_element_type=jnp.float32), 0.0)
    z = jnp.dot(h, sw2_ref[...], preferred_element_type=jnp.float32)  # (1, Cout)
    xs = x1 * (1.0 / (1.0 + jnp.exp(-z)))      # channel scale applied once

    # ---- conv2 (on SE-scaled x1) -> GroupNorm ----
    buf2_ref[r0:r0 + M, :] = xs
    y2 = conv3x3(buf2_ref, w2_ref) + b2_ref[...]
    x2 = _group_norm(y2, g2_ref[...], be2_ref[...], gmasks, inv_cnt, eps)

    # ---- residual add + ReLU ----
    # TODO(synk): for Cout < 128 deployments, repack the output into a
    # lane-dense (M//4, 4*Cout) slab to avoid masked partial stores.
    out_ref[...] = jnp.maximum(x1 + x2, 0.0)


def res_se_down2(x_nchw, p, gn=4, eps=1e-5):
    B, Cin, H, W = x_nchw.shape
    Cout = p["w1"].shape[0]
    Ch = p["sw1"].shape[0]                   # SE hidden width (Cout // reduction)
    H2, W2 = H // 2, W // 2
    M = H2 * W2
    r0 = _round_up(W2 + 1, 8)                # aligned interior offset in flat buffers
    mb = _round_up(r0 + M + W2 + 1, 8)       # flat buffer rows (interior + halos)

    # --- XLA-side glue: NCHW -> NHWC fused with the 2x2 max-pool, flatten spatial ---
    x_nhwc = jnp.transpose(x_nchw, (0, 2, 3, 1))
    pooled = lax.reduce_window(x_nhwc, -jnp.inf, lax.max,
                               (1, 2, 2, 1), (1, 2, 2, 1), "VALID")
    pooled = pooled.reshape(B, M, Cin).astype(jnp.float32)

    # Tap-major conv weights for the MXU (bf16): (Cout, Cin, 3, 3) -> (9, Cin, Cout).
    w1 = jnp.transpose(p["w1"], (2, 3, 1, 0)).reshape(9, Cin, Cout).astype(jnp.bfloat16)
    w2 = jnp.transpose(p["w2"], (2, 3, 1, 0)).reshape(9, Cout, Cout).astype(jnp.bfloat16)

    # W-border validity masks for the dx = -1 / +1 taps ({0,1} f32, tiny, resident).
    col = jnp.arange(M, dtype=jnp.int32) % W2
    mask_l = (col != 0).astype(jnp.float32).reshape(M, 1)
    mask_r = (col != W2 - 1).astype(jnp.float32).reshape(M, 1)

    def _resident(shape):
        return pl.BlockSpec(shape, lambda b, _z=(0,) * len(shape): _z)

    # VMEM budget from the actual per-step footprint (scratch + double-buffered
    # I/O blocks + resident weights), with 2x headroom; fits v5e / v6e / v7x.
    scratch_bytes = 4 * (mb * Cin + mb * Cout + M * Cout)
    io_bytes = 2 * 4 * M * (Cin + Cout)
    resident_bytes = (2 * 9 * Cout * (Cin + Cout)
                      + 4 * (6 * Cout + 2 * Cout * Ch + 2 * M))
    vmem_limit = int(min(64 << 20,
                         max(16 << 20, 2 * (scratch_bytes + io_bytes + resident_bytes))))

    cost = pl.CostEstimate(
        flops=2 * B * M * 9 * Cout * (Cin + Cout) + 4 * B * Cout * Ch,
        transcendentals=B * (Cout + 2 * gn),
        bytes_accessed=(4 * B * M * (Cin + Cout) + 2 * 9 * Cout * (Cin + Cout)
                        + 4 * (6 * Cout + 2 * Cout * Ch + 2 * M)))

    out_flat = pl.pallas_call(
        functools.partial(_res_se_down2_kernel, gn=gn, eps=eps, W2=W2, r0=r0),
        out_shape=jax.ShapeDtypeStruct((B, M, Cout), jnp.float32),
        grid=(B,),                                   # one sample per grid step
        in_specs=[
            pl.BlockSpec((None, M, Cin), lambda b: (b, 0, 0)),   # pooled input
            _resident((M, 1)), _resident((M, 1)),                # W-border masks
            _resident((9, Cin, Cout)),                           # w1 (bf16)
            _resident((1, Cout)), _resident((1, Cout)), _resident((1, Cout)),
            _resident((Cout, Ch)), _resident((Ch, Cout)),        # SE weights
            _resident((9, Cout, Cout)),                          # w2 (bf16)
            _resident((1, Cout)), _resident((1, Cout)), _resident((1, Cout)),
        ],
        out_specs=pl.BlockSpec((None, M, Cout), lambda b: (b, 0, 0)),
        scratch_shapes=[
            pltpu.VMEM((mb, Cin), jnp.float32),    # flat H-halo-padded pooled input
            pltpu.VMEM((mb, Cout), jnp.float32),   # flat H-halo-padded SE-scaled x1
            pltpu.VMEM((M, Cout), jnp.float32),    # shared f32 conv accumulator
        ],
        compiler_params=pltpu.CompilerParams(
            dimension_semantics=("parallel",),     # samples shard across TCs (v7x)
            vmem_limit_bytes=vmem_limit),
        cost_estimate=cost,
    )(pooled, mask_l, mask_r, w1,
      p["b1"].reshape(1, -1).astype(jnp.float32),
      p["g1"].reshape(1, -1).astype(jnp.float32),
      p["be1"].reshape(1, -1).astype(jnp.float32),
      jnp.transpose(p["sw1"]).astype(jnp.float32),
      jnp.transpose(p["sw2"]).astype(jnp.float32),
      w2,
      p["b2"].reshape(1, -1).astype(jnp.float32),
      p["g2"].reshape(1, -1).astype(jnp.float32),
      p["be2"].reshape(1, -1).astype(jnp.float32))

    return jnp.transpose(out_flat.reshape(B, H2, W2, Cout), (0, 3, 1, 2))   # NCHW


# ---- pure-JAX reference (mirrors the PyTorch module) ----
def _ref_forward(x, p, gn=4, eps=1e-5):
    def conv3x3(a, w, b):
        y = lax.conv_general_dilated(a, w, (1, 1), ((1, 1), (1, 1)),
                                     dimension_numbers=("NCHW", "OIHW", "NCHW"),
                                     precision=lax.Precision.HIGHEST)
        return y + b[None, :, None, None]

    def group_norm(a, gamma, beta):
        B, C, H, W = a.shape
        ag = a.reshape(B, gn, (C // gn) * H * W)
        mean = ag.mean(-1, keepdims=True)
        var = ag.var(-1, keepdims=True)
        an = ((ag - mean) / jnp.sqrt(var + eps)).reshape(B, C, H, W)
        return an * gamma[None, :, None, None] + beta[None, :, None, None]

    xp = lax.reduce_window(x, -jnp.inf, lax.max, (1, 1, 2, 2), (1, 1, 2, 2), "VALID")
    x1 = jnp.maximum(group_norm(conv3x3(xp, p["w1"], p["b1"]), p["g1"], p["be1"]), 0.0)
    m = x1.mean(axis=(2, 3))
    h = jnp.maximum(m @ p["sw1"].T, 0.0)
    s = 1.0 / (1.0 + jnp.exp(-(h @ p["sw2"].T)))
    xs = x1 * s[:, :, None, None]
    x2 = group_norm(conv3x3(xs, p["w2"], p["b2"]), p["g2"], p["be2"])
    return jnp.maximum(x1 + x2, 0.0)


if __name__ == "__main__":
    B, Cin, H, W = 2, 4, 16, 16
    Cout, gn = 32, 4               # SE reduction=16 -> hidden = Cout // 16 = 2
    key = jax.random.PRNGKey(0)
    ks = jax.random.split(key, 9)
    x = jax.random.normal(ks[0], (B, Cin, H, W), jnp.float32)
    params = dict(
        w1=0.1 * jax.random.normal(ks[1], (Cout, Cin, 3, 3), jnp.float32),
        b1=0.1 * jax.random.normal(ks[2], (Cout,), jnp.float32),
        g1=jnp.ones((Cout,), jnp.float32),
        be1=jnp.zeros((Cout,), jnp.float32),
        sw1=0.1 * jax.random.normal(ks[3], (Cout // 16, Cout), jnp.float32),
        sw2=0.1 * jax.random.normal(ks[4], (Cout, Cout // 16), jnp.float32),
        w2=0.1 * jax.random.normal(ks[5], (Cout, Cout, 3, 3), jnp.float32),
        b2=0.1 * jax.random.normal(ks[6], (Cout,), jnp.float32),
        g2=1.0 + 0.1 * jax.random.normal(ks[7], (Cout,), jnp.float32),
        be2=0.1 * jax.random.normal(ks[8], (Cout,), jnp.float32),
    )

    fwd = jax.jit(lambda xx, pp: res_se_down2(xx, pp, gn=gn))
    out = jax.block_until_ready(fwd(x, params))
    ref = _ref_forward(x, params, gn=gn)
    assert out.shape == (B, Cout, H // 2, W // 2)
    err = float(jnp.max(jnp.abs(out - ref)))
    # bf16 MXU operands in the kernel vs. an f32 HIGHEST-precision reference.
    assert bool(jnp.allclose(out, ref, atol=3e-2, rtol=3e-2)), err
    print("KERNEL_OK")
</pallas_src>

<mosaic_0001>
module attributes {stable_mosaic.version = 11 : i64} {
  func.func @_res_se_down2_kernel(%arg0: i32, %arg1: memref<1x64x4xf32, #tpu.memory_space<vmem>>, %arg2: memref<64x1xf32, #tpu.memory_space<vmem>>, %arg3: memref<64x1xf32, #tpu.memory_space<vmem>>, %arg4: memref<9x4x32xbf16, #tpu.memory_space<vmem>>, %arg5: memref<1x32xf32, #tpu.memory_space<vmem>>, %arg6: memref<1x32xf32, #tpu.memory_space<vmem>>, %arg7: memref<1x32xf32, #tpu.memory_space<vmem>>, %arg8: memref<32x2xf32, #tpu.memory_space<vmem>>, %arg9: memref<2x32xf32, #tpu.memory_space<vmem>>, %arg10: memref<9x32x32xbf16, #tpu.memory_space<vmem>>, %arg11: memref<1x32xf32, #tpu.memory_space<vmem>>, %arg12: memref<1x32xf32, #tpu.memory_space<vmem>>, %arg13: memref<1x32xf32, #tpu.memory_space<vmem>>, %arg14: memref<1x64x32xf32, #tpu.memory_space<vmem>>, %arg15: memref<96x4xf32, #tpu.memory_space<vmem>>, %arg16: memref<96x32xf32, #tpu.memory_space<vmem>>, %arg17: memref<64x32xf32, #tpu.memory_space<vmem>>) attributes {dimension_semantics = [#tpu.dimension_semantics<parallel>], iteration_bounds = array<i64: 2>, scalar_prefetch = 0 : i64, scratch_operands = 3 : i64, tpu.core_type = #tpu.core_type<tc>, window_params = [{transform_indices = @transform_0, window_bounds = array<i64: 1, 64, 4>}, {pipeline_mode = #tpu.pipeline_mode<synchronous>, transform_indices = @transform_1, window_bounds = array<i64: 64, 1>}, {pipeline_mode = #tpu.pipeline_mode<synchronous>, transform_indices = @transform_2, window_bounds = array<i64: 64, 1>}, {pipeline_mode = #tpu.pipeline_mode<synchronous>, transform_indices = @transform_3, window_bounds = array<i64: 9, 4, 32>}, {pipeline_mode = #tpu.pipeline_mode<synchronous>, transform_indices = @transform_4, window_bounds = array<i64: 1, 32>}, {pipeline_mode = #tpu.pipeline_mode<synchronous>, transform_indices = @transform_5, window_bounds = array<i64: 1, 32>}, {pipeline_mode = #tpu.pipeline_mode<synchronous>, transform_indices = @transform_6, window_bounds = array<i64: 1, 32>}, {pipeline_mode = #tpu.pipeline_mode<synchronous>, transform_indices = @transform_7, window_bounds = array<i64: 32, 2>}, {pipeline_mode = #tpu.pipeline_mode<synchronous>, transform_indices = @transform_8, window_bounds = array<i64: 2, 32>}, {pipeline_mode = #tpu.pipeline_mode<synchronous>, transform_indices = @transform_9, window_bounds = array<i64: 9, 32, 32>}, {pipeline_mode = #tpu.pipeline_mode<synchronous>, transform_indices = @transform_10, window_bounds = array<i64: 1, 32>}, {pipeline_mode = #tpu.pipeline_mode<synchronous>, transform_indices = @transform_11, window_bounds = array<i64: 1, 32>}, {pipeline_mode = #tpu.pipeline_mode<synchronous>, transform_indices = @transform_12, window_bounds = array<i64: 1, 32>}, {transform_indices = @transform_13, window_bounds = array<i64: 1, 64, 32>}]} {
    %cst = arith.constant 0.000000e+00 : f32
    %0 = vector.broadcast %cst : f32 to vector<16x4xf32>
    %c0 = arith.constant 0 : index
    %c0_0 = arith.constant 0 : index
    %1 = vector.load %arg15[%c0, %c0_0] : memref<96x4xf32, #tpu.memory_space<vmem>>, vector<16x4xf32>
    tpu.vector_store %arg15[%c0, %c0_0], %0 {strides = array<i32>} : memref<96x4xf32, #tpu.memory_space<vmem>>, vector<16x4xf32>,
    %cst_1 = arith.constant 0.000000e+00 : f32
    %2 = vector.broadcast %cst_1 : f32 to vector<16x4xf32>
    %c80 = arith.constant 80 : index
    %c0_2 = arith.constant 0 : index
    %3 = vector.load %arg15[%c80, %c0_2] : memref<96x4xf32, #tpu.memory_space<vmem>>, vector<16x4xf32>
    tpu.vector_store %arg15[%c80, %c0_2], %2 {strides = array<i32>} : memref<96x4xf32, #tpu.memory_space<vmem>>, vector<16x4xf32>,
    %cst_3 = arith.constant 0.000000e+00 : f32
    %4 = vector.broadcast %cst_3 : f32 to vector<16x32xf32>
    %c0_4 = arith.constant 0 : index
    %c0_5 = arith.constant 0 : index
    %5 = vector.load %arg16[%c0_4, %c0_5] : memref<96x32xf32, #tpu.memory_space<vmem>>, vector<16x32xf32>
    tpu.vector_store %arg16[%c0_4, %c0_5], %4 {strides = array<i32>} : memref<96x32xf32, #tpu.memory_space<vmem>>, vector<16x32xf32>,
    %cst_6 = arith.constant 0.000000e+00 : f32
    %6 = vector.broadcast %cst_6 : f32 to vector<16x32xf32>
    %c80_7 = arith.constant 80 : index
    %c0_8 = arith.constant 0 : index
    %7 = vector.load %arg16[%c80_7, %c0_8] : memref<96x32xf32, #tpu.memory_space<vmem>>, vector<16x32xf32>
    tpu.vector_store %arg16[%c80_7, %c0_8], %6 {strides = array<i32>} : memref<96x32xf32, #tpu.memory_space<vmem>>, vector<16x32xf32>,
    %c0_9 = arith.constant 0 : index
    %c0_10 = arith.constant 0 : index
    %8 = vector.load %arg2[%c0_9, %c0_10] : memref<64x1xf32, #tpu.memory_space<vmem>>, vector<64x1xf32>
    %c0_11 = arith.constant 0 : index
    %c0_12 = arith.constant 0 : index
    %9 = vector.load %arg3[%c0_11, %c0_12] : memref<64x1xf32, #tpu.memory_space<vmem>>, vector<64x1xf32>
    %10 = tpu.iota {dimensions = array<i32: 1>} : vector<1x32xi32>
    %c0_i32 = arith.constant 0 : i32
    %11 = vector.broadcast %c0_i32 : i32 to vector<1x32xi32>
    %12 = arith.cmpi sge, %10, %11 : vector<1x32xi32>
    %c8_i32 = arith.constant 8 : i32
    %13 = vector.broadcast %c8_i32 : i32 to vector<1x32xi32>
    %14 = arith.cmpi slt, %10, %13 : vector<1x32xi32>
    %15 = arith.andi %12, %14 : vector<1x32xi1>
    %c8_i32_13 = arith.constant 8 : i32
    %16 = vector.broadcast %c8_i32_13 : i32 to vector<1x32xi32>
    %17 = arith.cmpi sge, %10, %16 : vector<1x32xi32>
    %c16_i32 = arith.constant 16 : i32
    %18 = vector.broadcast %c16_i32 : i32 to vector<1x32xi32>
    %19 = arith.cmpi slt, %10, %18 : vector<1x32xi32>
    %20 = arith.andi %17, %19 : vector<1x32xi1>
    %c16_i32_14 = arith.constant 16 : i32
    %21 = vector.broadcast %c16_i32_14 : i32 to vector<1x32xi32>
    %22 = arith.cmpi sge, %10, %21 : vector<1x32xi32>
    %c24_i32 = arith.constant 24 : i32
    %23 = vector.broadcast %c24_i32 : i32 to vector<1x32xi32>
    %24 = arith.cmpi slt, %10, %23 : vector<1x32xi32>
    %25 = arith.andi %22, %24 : vector<1x32xi1>
    %c24_i32_15 = arith.constant 24 : i32
    %26 = vector.broadcast %c24_i32_15 : i32 to vector<1x32xi32>
    %27 = arith.cmpi sge, %10, %26 : vector<1x32xi32>
    %c32_i32 = arith.constant 32 : i32
    %28 = vector.broadcast %c32_i32 : i32 to vector<1x32xi32>
    %29 = arith.cmpi slt, %10, %28 : vector<1x32xi32>
    %30 = arith.andi %27, %29 : vector<1x32xi1>
    %c0_16 = arith.constant 0 : index
    %c0_17 = arith.constant 0 : index
    %c0_18 = arith.constant 0 : index
    %31 = vector.load %arg1[%c0_16, %c0_17, %c0_18] : memref<1x64x4xf32, #tpu.memory_space<vmem>>, vector<1x64x4xf32>
    %32 = vector.shape_cast %31 : vector<1x64x4xf32> to vector<64x4xf32>
    %c16 = arith.constant 16 : index
    %c0_19 = arith.constant 0 : index
    %33 = vector.load %arg15[%c16, %c0_19] : memref<96x4xf32, #tpu.memory_space<vmem>>, vector<64x4xf32>
    tpu.vector_store %arg15[%c16, %c0_19], %32 {strides = array<i32>} : memref<96x4xf32, #tpu.memory_space<vmem>>, vector<64x4xf32>,
    %c7 = arith.constant 7 : index
    %c0_20 = arith.constant 0 : index
    %34 = vector.load %arg15[%c7, %c0_20] : memref<96x4xf32, #tpu.memory_space<vmem>>, vector<64x4xf32>
    %35 = vector.broadcast %8 : vector<64x1xf32> to vector<64x4xf32>
    %36 = arith.mulf %34, %35 : vector<64x4xf32>
    %37 = arith.truncf %36 : vector<64x4xf32> to vector<64x4xbf16>
    %c0_21 = arith.constant 0 : index
    %c0_22 = arith.constant 0 : index
    %c0_23 = arith.constant 0 : index
    %38 = vector.load %arg4[%c0_21, %c0_22, %c0_23] : memref<9x4x32xbf16, #tpu.memory_space<vmem>>, vector<1x4x32xbf16>
    %39 = vector.shape_cast %38 : vector<1x4x32xbf16> to vector<4x32xbf16>
    %cst_24 = arith.constant dense<0.000000e+00> : vector<64x32xf32>
    %40 = tpu.matmul %37, %39, %cst_24 {dimension_numbers = #tpu.dot_dimension_numbers<[1], [0], [0], [1], [0, 0, 1, 1], [], []>} : vector<64x4xbf16>, vector<4x32xbf16>, vector<64x32xf32> -> vector<64x32xf32>
    %c0_25 = arith.constant 0 : index
    %c0_26 = arith.constant 0 : index
    %41 = vector.load %arg17[%c0_25, %c0_26] : memref<64x32xf32, #tpu.memory_space<vmem>>, vector<64x32xf32>
    tpu.vector_store %arg17[%c0_25, %c0_26], %40 {strides = array<i32>} : memref<64x32xf32, #tpu.memory_space<vmem>>, vector<64x32xf32>,
    %c8 = arith.constant 8 : index
    %c0_27 = arith.constant 0 : index
    %42 = vector.load %arg15[%c8, %c0_27] : memref<96x4xf32, #tpu.memory_space<vmem>>, vector<64x4xf32>
    %43 = arith.truncf %42 : vector<64x4xf32> to vector<64x4xbf16>
    %c1 = arith.constant 1 : index
    %c0_28 = arith.constant 0 : index
    %c0_29 = arith.constant 0 : index
    %44 = vector.load %arg4[%c1, %c0_28, %c0_29] : memref<9x4x32xbf16, #tpu.memory_space<vmem>>, vector<1x4x32xbf16>
    %45 = vector.shape_cast %44 : vector<1x4x32xbf16> to vector<4x32xbf16>
    %cst_30 = arith.constant dense<0.000000e+00> : vector<64x32xf32>
    %46 = tpu.matmul %43, %45, %cst_30 {dimension_numbers = #tpu.dot_dimension_numbers<[1], [0], [0], [1], [0, 0, 1, 1], [], []>} : vector<64x4xbf16>, vector<4x32xbf16>, vector<64x32xf32> -> vector<64x32xf32>
    %c0_31 = arith.constant 0 : index
    %c0_32 = arith.constant 0 : index
    %47 = vector.load %arg17[%c0_31, %c0_32] : memref<64x32xf32, #tpu.memory_space<vmem>>, vector<64x32xf32>
    %48 = arith.addf %47, %46 : vector<64x32xf32>
    %c0_33 = arith.constant 0 : index
    %c0_34 = arith.constant 0 : index
    %49 = vector.load %arg17[%c0_33, %c0_34] : memref<64x32xf32, #tpu.memory_space<vmem>>, vector<64x32xf32>
    tpu.vector_store %arg17[%c0_33, %c0_34], %48 {strides = array<i32>} : memref<64x32xf32, #tpu.memory_space<vmem>>, vector<64x32xf32>,
    %c9 = arith.constant 9 : index
    %c0_35 = arith.constant 0 : index
    %50 = vector.load %arg15[%c9, %c0_35] : memref<96x4xf32, #tpu.memory_space<vmem>>, vector<64x4xf32>
    %51 = vector.broadcast %9 : vector<64x1xf32> to vector<64x4xf32>
    %52 = arith.mulf %50, %51 : vector<64x4xf32>
    %53 = arith.truncf %52 : vector<64x4xf32> to vector<64x4xbf16>
    %c2 = arith.constant 2 : index
    %c0_36 = arith.constant 0 : index
    %c0_37 = arith.constant 0 : index
    %54 = vector.load %arg4[%c2, %c0_36, %c0_37] : memref<9x4x32xbf16, #tpu.memory_space<vmem>>, vector<1x4x32xbf16>
    %55 = vector.shape_cast %54 : vector<1x4x32xbf16> to vector<4x32xbf16>
    %cst_38 = arith.constant dense<0.000000e+00> : vector<64x32xf32>
    %56 = tpu.matmul %53, %55, %cst_38 {dimension_numbers = #tpu.dot_dimension_numbers<[1], [0], [0], [1], [0, 0, 1, 1], [], []>} : vector<64x4xbf16>, vector<4x32xbf16>, vector<64x32xf32> -> vector<64x32xf32>
    %c0_39 = arith.constant 0 : index
    %c0_40 = arith.constant 0 : index
    %57 = vector.load %arg17[%c0_39, %c0_40] : memref<64x32xf32, #tpu.memory_space<vmem>>, vector<64x32xf32>
    %58 = arith.addf %57, %56 : vector<64x32xf32>
    %c0_41 = arith.constant 0 : index
    %c0_42 = arith.constant 0 : index
    %59 = vector.load %arg17[%c0_41, %c0_42] : memref<64x32xf32, #tpu.memory_space<vmem>>, vector<64x32xf32>
    tpu.vector_store %arg17[%c0_41, %c0_42], %58 {strides = array<i32>} : memref<64x32xf32, #tpu.memory_space<vmem>>, vector<64x32xf32>,
    %c15 = arith.constant 15 : index
    %c0_43 = arith.constant 0 : index
    %60 = vector.load %arg15[%c15, %c0_43] : memref<96x4xf32, #tpu.memory_space<vmem>>, vector<64x4xf32>
    %61 = vector.broadcast %8 : vector<64x1xf32> to vector<64x4xf32>
    %62 = arith.mulf %60, %61 : vector<64x4xf32>
    %63 = arith.truncf %62 : vector<64x4xf32> to vector<64x4xbf16>
    %c3 = arith.constant 3 : index
    %c0_44 = arith.constant 0 : index
    %c0_45 = arith.constant 0 : index
    %64 = vector.load %arg4[%c3, %c0_44, %c0_45] : memref<9x4x32xbf16, #tpu.memory_space<vmem>>, vector<1x4x32xbf16>
    %65 = vector.shape_cast %64 : vector<1x4x32xbf16> to vector<4x32xbf16>
    %cst_46 = arith.constant dense<0.000000e+00> : vector<64x32xf32>
    %66 = tpu.matmul %63, %65, %cst_46 {dimension_numbers = #tpu.dot_dimension_numbers<[1], [0], [0], [1], [0, 0, 1, 1], [], []>} : vector<64x4xbf16>, vector<4x32xbf16>, vector<64x32xf32> -> vector<64x32xf32>
    %c0_47 = arith.constant 0 : index
    %c0_48 = arith.constant 0 : index
    %67 = vector.load %arg17[%c0_47, %c0_48] : memref<64x32xf32, #tpu.memory_space<vmem>>, vector<64x32xf32>
    %68 = arith.addf %67, %66 : vector<64x32xf32>
    %c0_49 = arith.constant 0 : index
    %c0_50 = arith.constant 0 : index
    %69 = vector.load %arg17[%c0_49, %c0_50] : memref<64x32xf32, #tpu.memory_space<vmem>>, vector<64x32xf32>
    tpu.vector_store %arg17[%c0_49, %c0_50], %68 {strides = array<i32>} : memref<64x32xf32, #tpu.memory_space<vmem>>, vector<64x32xf32>,
    %c16_51 = arith.constant 16 : index
    %c0_52 = arith.constant 0 : index
    %70 = vector.load %arg15[%c16_51, %c0_52] : memref<96x4xf32, #tpu.memory_space<vmem>>, vector<64x4xf32>
    %71 = arith.truncf %70 : vector<64x4xf32> to vector<64x4xbf16>
    %c4 = arith.constant 4 : index
    %c0_53 = arith.constant 0 : index
    %c0_54 = arith.constant 0 : index
    %72 = vector.load %arg4[%c4, %c0_53, %c0_54] : memref<9x4x32xbf16, #tpu.memory_space<vmem>>, vector<1x4x32xbf16>
    %73 = vector.shape_cast %72 : vector<1x4x32xbf16> to vector<4x32xbf16>
    %cst_55 = arith.constant dense<0.000000e+00> : vector<64x32xf32>
    %74 = tpu.matmul %71, %73, %cst_55 {dimension_numbers = #tpu.dot_dimension_numbers<[1], [0], [0], [1], [0, 0, 1, 1], [], []>} : vector<64x4xbf16>, vector<4x32xbf16>, vector<64x32xf32> -> vector<64x32xf32>
    %c0_56 = arith.constant 0 : index
    %c0_57 = arith.constant 0 : index
    %75 = vector.load %arg17[%c0_56, %c0_57] : memref<64x32xf32, #tpu.memory_space<vmem>>, vector<64x32xf32>
    %76 = arith.addf %75, %74 : vector<64x32xf32>
    %c0_58 = arith.constant 0 : index
    %c0_59 = arith.constant 0 : index
    %77 = vector.load %arg17[%c0_58, %c0_59] : memref<64x32xf32, #tpu.memory_space<vmem>>, vector<64x32xf32>
    tpu.vector_store %arg17[%c0_58, %c0_59], %76 {strides = array<i32>} : memref<64x32xf32, #tpu.memory_space<vmem>>, vector<64x32xf32>,
    %c17 = arith.constant 17 : index
    %c0_60 = arith.constant 0 : index
    %78 = vector.load %arg15[%c17, %c0_60] : memref<96x4xf32, #tpu.memory_space<vmem>>, vector<64x4xf32>
    %79 = vector.broadcast %9 : vector<64x1xf32> to vector<64x4xf32>
    %80 = arith.mulf %78, %79 : vector<64x4xf32>
    %81 = arith.truncf %80 : vector<64x4xf32> to vector<64x4xbf16>
    %c5 = arith.constant 5 : index
    %c0_61 = arith.constant 0 : index
    %c0_62 = arith.constant 0 : index
    %82 = vector.load %arg4[%c5, %c0_61, %c0_62] : memref<9x4x32xbf16, #tpu.memory_space<vmem>>, vector<1x4x32xbf16>
    %83 = vector.shape_cast %82 : vector<1x4x32xbf16> to vector<4x32xbf16>
    %cst_63 = arith.constant dense<0.000000e+00> : vector<64x32xf32>
    %84 = tpu.matmul %81, %83, %cst_63 {dimension_numbers = #tpu.dot_dimension_numbers<[1], [0], [0], [1], [0, 0, 1, 1], [], []>} : vector<64x4xbf16>, vector<4x32xbf16>, vector<64x32xf32> -> vector<64x32xf32>
    %c0_64 = arith.constant 0 : index
    %c0_65 = arith.constant 0 : index
    %85 = vector.load %arg17[%c0_64, %c0_65] : memref<64x32xf32, #tpu.memory_space<vmem>>, vector<64x32xf32>
    %86 = arith.addf %85, %84 : vector<64x32xf32>
    %c0_66 = arith.constant 0 : index
    %c0_67 = arith.constant 0 : index
    %87 = vector.load %arg17[%c0_66, %c0_67] : memref<64x32xf32, #tpu.memory_space<vmem>>, vector<64x32xf32>
    tpu.vector_store %arg17[%c0_66, %c0_67], %86 {strides = array<i32>} : memref<64x32xf32, #tpu.memory_space<vmem>>, vector<64x32xf32>,
    %c23 = arith.constant 23 : index
    %c0_68 = arith.constant 0 : index
    %88 = vector.load %arg15[%c23, %c0_68] : memref<96x4xf32, #tpu.memory_space<vmem>>, vector<64x4xf32>
    %89 = vector.broadcast %8 : vector<64x1xf32> to vector<64x4xf32>
    %90 = arith.mulf %88, %89 : vector<64x4xf32>
    %91 = arith.truncf %90 : vector<64x4xf32> to vector<64x4xbf16>
    %c6 = arith.constant 6 : index
    %c0_69 = arith.constant 0 : index
    %c0_70 = arith.constant 0 : index
    %92 = vector.load %arg4[%c6, %c0_69, %c0_70] : memref<9x4x32xbf16, #tpu.memory_space<vmem>>, vector<1x4x32xbf16>
    %93 = vector.shape_cast %92 : vector<1x4x32xbf16> to vector<4x32xbf16>
    %cst_71 = arith.constant dense<0.000000e+00> : vector<64x32xf32>
    %94 = tpu.matmul %91, %93, %cst_71 {dimension_numbers = #tpu.dot_dimension_numbers<[1], [0], [0], [1], [0, 0, 1, 1], [], []>} : vector<64x4xbf16>, vector<4x32xbf16>, vector<64x32xf32> -> vector<64x32xf32>
    %c0_72 = arith.constant 0 : index
    %c0_73 = arith.constant 0 : index
    %95 = vector.load %arg17[%c0_72, %c0_73] : memref<64x32xf32, #tpu.memory_space<vmem>>, vector<64x32xf32>
    %96 = arith.addf %95, %94 : vector<64x32xf32>
    %c0_74 = arith.constant 0 : index
    %c0_75 = arith.constant 0 : index
    %97 = vector.load %arg17[%c0_74, %c0_75] : memref<64x32xf32, #tpu.memory_space<vmem>>, vector<64x32xf32>
    tpu.vector_store %arg17[%c0_74, %c0_75], %96 {strides = array<i32>} : memref<64x32xf32, #tpu.memory_space<vmem>>, vector<64x32xf32>,
    %c24 = arith.constant 24 : index
    %c0_76 = arith.constant 0 : index
    %98 = vector.load %arg15[%c24, %c0_76] : memref<96x4xf32, #tpu.memory_space<vmem>>, vector<64x4xf32>
    %99 = arith.truncf %98 : vector<64x4xf32> to vector<64x4xbf16>
    %c7_77 = arith.constant 7 : index
    %c0_78 = arith.constant 0 : index
    %c0_79 = arith.constant 0 : index
    %100 = vector.load %arg4[%c7_77, %c0_78, %c0_79] : memref<9x4x32xbf16, #tpu.memory_space<vmem>>, vector<1x4x32xbf16>
    %101 = vector.shape_cast %100 : vector<1x4x32xbf16> to vector<4x32xbf16>
    %cst_80 = arith.constant dense<0.000000e+00> : vector<64x32xf32>
    %102 = tpu.matmul %99, %101, %cst_80 {dimension_numbers = #tpu.dot_dimension_numbers<[1], [0], [0], [1], [0, 0, 1, 1], [], []>} : vector<64x4xbf16>, vector<4x32xbf16>, vector<64x32xf32> -> vector<64x32xf32>
    %c0_81 = arith.constant 0 : index
    %c0_82 = arith.constant 0 : index
    %103 = vector.load %arg17[%c0_81, %c0_82] : memref<64x32xf32, #tpu.memory_space<vmem>>, vector<64x32xf32>
    %104 = arith.addf %103, %102 : vector<64x32xf32>
    %c0_83 = arith.constant 0 : index
    %c0_84 = arith.constant 0 : index
    %105 = vector.load %arg17[%c0_83, %c0_84] : memref<64x32xf32, #tpu.memory_space<vmem>>, vector<64x32xf32>
    tpu.vector_store %arg17[%c0_83, %c0_84], %104 {strides = array<i32>} : memref<64x32xf32, #tpu.memory_space<vmem>>, vector<64x32xf32>,
    %c25 = arith.constant 25 : index
    %c0_85 = arith.constant 0 : index
    %106 = vector.load %arg15[%c25, %c0_85] : memref<96x4xf32, #tpu.memory_space<vmem>>, vector<64x4xf32>
    %107 = vector.broadcast %9 : vector<64x1xf32> to vector<64x4xf32>
    %108 = arith.mulf %106, %107 : vector<64x4xf32>
    %109 = arith.truncf %108 : vector<64x4xf32> to vector<64x4xbf16>
    %c8_86 = arith.constant 8 : index
    %c0_87 = arith.constant 0 : index
    %c0_88 = arith.constant 0 : index
    %110 = vector.load %arg4[%c8_86, %c0_87, %c0_88] : memref<9x4x32xbf16, #tpu.memory_space<vmem>>, vector<1x4x32xbf16>
    %111 = vector.shape_cast %110 : vector<1x4x32xbf16> to vector<4x32xbf16>
    %cst_89 = arith.constant dense<0.000000e+00> : vector<64x32xf32>
    %112 = tpu.matmul %109, %111, %cst_89 {dimension_numbers = #tpu.dot_dimension_numbers<[1], [0], [0], [1], [0, 0, 1, 1], [], []>} : vector<64x4xbf16>, vector<4x32xbf16>, vector<64x32xf32> -> vector<64x32xf32>
    %c0_90 = arith.constant 0 : index
    %c0_91 = arith.constant 0 : index
    %113 = vector.load %arg17[%c0_90, %c0_91] : memref<64x32xf32, #tpu.memory_space<vmem>>, vector<64x32xf32>
    %114 = arith.addf %113, %112 : vector<64x32xf32>
    %c0_92 = arith.constant 0 : index
    %c0_93 = arith.constant 0 : index
    %115 = vector.load %arg17[%c0_92, %c0_93] : memref<64x32xf32, #tpu.memory_space<vmem>>, vector<64x32xf32>
    tpu.vector_store %arg17[%c0_92, %c0_93], %114 {strides = array<i32>} : memref<64x32xf32, #tpu.memory_space<vmem>>, vector<64x32xf32>,
    %c0_94 = arith.constant 0 : index
    %c0_95 = arith.constant 0 : index
    %116 = vector.load %arg17[%c0_94, %c0_95] : memref<64x32xf32, #tpu.memory_space<vmem>>, vector<64x32xf32>
    %c0_96 = arith.constant 0 : index
    %c0_97 = arith.constant 0 : index
    %117 = vector.load %arg5[%c0_96, %c0_97] : memref<1x32xf32, #tpu.memory_space<vmem>>, vector<1x32xf32>
    %118 = vector.broadcast %117 : vector<1x32xf32> to vector<64x32xf32>
    %119 = arith.addf %116, %118 : vector<64x32xf32>
    %c0_98 = arith.constant 0 : index
    %c0_99 = arith.constant 0 : index
    %120 = vector.load %arg6[%c0_98, %c0_99] : memref<1x32xf32, #tpu.memory_space<vmem>>, vector<1x32xf32>
    %c0_100 = arith.constant 0 : index
    %c0_101 = arith.constant 0 : index
    %121 = vector.load %arg7[%c0_100, %c0_101] : memref<1x32xf32, #tpu.memory_space<vmem>>, vector<1x32xf32>
    %cst_102 = arith.constant dense<0.000000e+00> : vector<32xf32>
    %122 = vector.multi_reduction <add>, %119, %cst_102 [0] : vector<64x32xf32> to vector<32xf32>
    %123 = vector.shape_cast %122 : vector<32xf32> to vector<1x32xf32>
    %124 = arith.mulf %119, %119 : vector<64x32xf32>
    %cst_103 = arith.constant dense<0.000000e+00> : vector<32xf32>
    %125 = vector.multi_reduction <add>, %124, %cst_103 [0] : vector<64x32xf32> to vector<32xf32>
    %126 = vector.shape_cast %125 : vector<32xf32> to vector<1x32xf32>
    %cst_104 = arith.constant 0.000000e+00 : f32
    %127 = vector.broadcast %cst_104 : f32 to vector<1x32xf32>
    %cst_105 = arith.constant 0.000000e+00 : f32
    %128 = vector.broadcast %cst_105 : f32 to vector<1x32xf32>
    %cst_106 = arith.constant 0.000000e+00 : f32
    %129 = vector.broadcast %cst_106 : f32 to vector<1x32xf32>
    %130 = arith.select %15, %123, %129 : vector<1x32xi1>, vector<1x32xf32>
    %cst_107 = arith.constant dense<0.000000e+00> : vector<1xf32>
    %131 = vector.multi_reduction <add>, %130, %cst_107 [1] : vector<1x32xf32> to vector<1xf32>
    %132 = vector.shape_cast %131 : vector<1xf32> to vector<1x1xf32>
    %cst_108 = arith.constant 0.000000e+00 : f32
    %133 = vector.broadcast %cst_108 : f32 to vector<1x32xf32>
    %134 = arith.select %15, %126, %133 : vector<1x32xi1>, vector<1x32xf32>
    %cst_109 = arith.constant dense<0.000000e+00> : vector<1xf32>
    %135 = vector.multi_reduction <add>, %134, %cst_109 [1] : vector<1x32xf32> to vector<1xf32>
    %136 = vector.shape_cast %135 : vector<1xf32> to vector<1x1xf32>
    %cst_110 = arith.constant 0.001953125 : f32
    %137 = vector.broadcast %cst_110 : f32 to vector<1x1xf32>
    %138 = arith.mulf %132, %137 : vector<1x1xf32>
    %cst_111 = arith.constant 0.001953125 : f32
    %139 = vector.broadcast %cst_111 : f32 to vector<1x1xf32>
    %140 = arith.mulf %136, %139 : vector<1x1xf32>
    %141 = arith.mulf %138, %138 : vector<1x1xf32>
    %142 = arith.subf %140, %141 : vector<1x1xf32>
    %cst_112 = arith.constant 0.000000e+00 : f32
    %143 = vector.broadcast %cst_112 : f32 to vector<1x1xf32>
    %144 = arith.maximumf %142, %143 : vector<1x1xf32>
    %145 = vector.shape_cast %138 : vector<1x1xf32> to vector<1x1xf32>
    %146 = vector.broadcast %145 : vector<1x1xf32> to vector<1x32xf32>
    %147 = arith.select %15, %146, %127 : vector<1x32xi1>, vector<1x32xf32>
    %cst_113 = arith.constant 9.99999974E-6 : f32
    %148 = vector.broadcast %cst_113 : f32 to vector<1x1xf32>
    %149 = arith.addf %144, %148 : vector<1x1xf32>
    %150 = math.rsqrt %149 : vector<1x1xf32>
    %151 = vector.shape_cast %150 : vector<1x1xf32> to vector<1x1xf32>
    %152 = vector.broadcast %151 : vector<1x1xf32> to vector<1x32xf32>
    %153 = arith.select %15, %152, %128 : vector<1x32xi1>, vector<1x32xf32>
    %cst_114 = arith.constant 0.000000e+00 : f32
    %154 = vector.broadcast %cst_114 : f32 to vector<1x32xf32>
    %155 = arith.select %20, %123, %154 : vector<1x32xi1>, vector<1x32xf32>
    %cst_115 = arith.constant dense<0.000000e+00> : vector<1xf32>
    %156 = vector.multi_reduction <add>, %155, %cst_115 [1] : vector<1x32xf32> to vector<1xf32>
    %157 = vector.shape_cast %156 : vector<1xf32> to vector<1x1xf32>
    %cst_116 = arith.constant 0.000000e+00 : f32
    %158 = vector.broadcast %cst_116 : f32 to vector<1x32xf32>
    %159 = arith.select %20, %126, %158 : vector<1x32xi1>, vector<1x32xf32>
    %cst_117 = arith.constant dense<0.000000e+00> : vector<1xf32>
    %160 = vector.multi_reduction <add>, %159, %cst_117 [1] : vector<1x32xf32> to vector<1xf32>
    %161 = vector.shape_cast %160 : vector<1xf32> to vector<1x1xf32>
    %cst_118 = arith.constant 0.001953125 : f32
    %162 = vector.broadcast %cst_118 : f32 to vector<1x1xf32>
    %163 = arith.mulf %157, %162 : vector<1x1xf32>
    %cst_119 = arith.constant 0.001953125 : f32
    %164 = vector.broadcast %cst_119 : f32 to vector<1x1xf32>
    %165 = arith.mulf %161, %164 : vector<1x1xf32>
    %166 = arith.mulf %163, %163 : vector<1x1xf32>
    %167 = arith.subf %165, %166 : vector<1x1xf32>
    %cst_120 = arith.constant 0.000000e+00 : f32
    %168 = vector.broadcast %cst_120 : f32 to vector<1x1xf32>
    %169 = arith.maximumf %167, %168 : vector<1x1xf32>
    %170 = vector.shape_cast %163 : vector<1x1xf32> to vector<1x1xf32>
    %171 = vector.broadcast %170 : vector<1x1xf32> to vector<1x32xf32>
    %172 = arith.select %20, %171, %147 : vector<1x32xi1>, vector<1x32xf32>
    %cst_121 = arith.constant 9.99999974E-6 : f32
    %173 = vector.broadcast %cst_121 : f32 to vector<1x1xf32>
    %174 = arith.addf %169, %173 : vector<1x1xf32>
    %175 = math.rsqrt %174 : vector<1x1xf32>
    %176 = vector.shape_cast %175 : vector<1x1xf32> to vector<1x1xf32>
    %177 = vector.broadcast %176 : vector<1x1xf32> to vector<1x32xf32>
    %178 = arith.select %20, %177, %153 : vector<1x32xi1>, vector<1x32xf32>
    %cst_122 = arith.constant 0.000000e+00 : f32
    %179 = vector.broadcast %cst_122 : f32 to vector<1x32xf32>
    %180 = arith.select %25, %123, %179 : vector<1x32xi1>, vector<1x32xf32>
    %cst_123 = arith.constant dense<0.000000e+00> : vector<1xf32>
    %181 = vector.multi_reduction <add>, %180, %cst_123 [1] : vector<1x32xf32> to vector<1xf32>
    %182 = vector.shape_cast %181 : vector<1xf32> to vector<1x1xf32>
    %cst_124 = arith.constant 0.000000e+00 : f32
    %183 = vector.broadcast %cst_124 : f32 to vector<1x32xf32>
    %184 = arith.select %25, %126, %183 : vector<1x32xi1>, vector<1x32xf32>
    %cst_125 = arith.constant dense<0.000000e+00> : vector<1xf32>
    %185 = vector.multi_reduction <add>, %184, %cst_125 [1] : vector<1x32xf32> to vector<1xf32>
    %186 = vector.shape_cast %185 : vector<1xf32> to vector<1x1xf32>
    %cst_126 = arith.constant 0.001953125 : f32
    %187 = vector.broadcast %cst_126 : f32 to vector<1x1xf32>
    %188 = arith.mulf %182, %187 : vector<1x1xf32>
    %cst_127 = arith.constant 0.001953125 : f32
    %189 = vector.broadcast %cst_127 : f32 to vector<1x1xf32>
    %190 = arith.mulf %186, %189 : vector<1x1xf32>
    %191 = arith.mulf %188, %188 : vector<1x1xf32>
    %192 = arith.subf %190, %191 : vector<1x1xf32>
    %cst_128 = arith.constant 0.000000e+00 : f32
    %193 = vector.broadcast %cst_128 : f32 to vector<1x1xf32>
    %194 = arith.maximumf %192, %193 : vector<1x1xf32>
    %195 = vector.shape_cast %188 : vector<1x1xf32> to vector<1x1xf32>
    %196 = vector.broadcast %195 : vector<1x1xf32> to vector<1x32xf32>
    %197 = arith.select %25, %196, %172 : vector<1x32xi1>, vector<1x32xf32>
    %cst_129 = arith.constant 9.99999974E-6 : f32
    %198 = vector.broadcast %cst_129 : f32 to vector<1x1xf32>
    %199 = arith.addf %194, %198 : vector<1x1xf32>
    %200 = math.rsqrt %199 : vector<1x1xf32>
    %201 = vector.shape_cast %200 : vector<1x1xf32> to vector<1x1xf32>
    %202 = vector.broadcast %201 : vector<1x1xf32> to vector<1x32xf32>
    %203 = arith.select %25, %202, %178 : vector<1x32xi1>, vector<1x32xf32>
    %cst_130 = arith.constant 0.000000e+00 : f32
    %204 = vector.broadcast %cst_130 : f32 to vector<1x32xf32>
    %205 = arith.select %30, %123, %204 : vector<1x32xi1>, vector<1x32xf32>
    %cst_131 = arith.constant dense<0.000000e+00> : vector<1xf32>
    %206 = vector.multi_reduction <add>, %205, %cst_131 [1] : vector<1x32xf32> to vector<1xf32>
    %207 = vector.shape_cast %206 : vector<1xf32> to vector<1x1xf32>
    %cst_132 = arith.constant 0.000000e+00 : f32
    %208 = vector.broadcast %cst_132 : f32 to vector<1x32xf32>
    %209 = arith.select %30, %126, %208 : vector<1x32xi1>, vector<1x32xf32>
    %cst_133 = arith.constant dense<0.000000e+00> : vector<1xf32>
    %210 = vector.multi_reduction <add>, %209, %cst_133 [1] : vector<1x32xf32> to vector<1xf32>
    %211 = vector.shape_cast %210 : vector<1xf32> to vector<1x1xf32>
    %cst_134 = arith.constant 0.001953125 : f32
    %212 = vector.broadcast %cst_134 : f32 to vector<1x1xf32>
    %213 = arith.mulf %207, %212 : vector<1x1xf32>
    %cst_135 = arith.constant 0.001953125 : f32
    %214 = vector.broadcast %cst_135 : f32 to vector<1x1xf32>
    %215 = arith.mulf %211, %214 : vector<1x1xf32>
    %216 = arith.mulf %213, %213 : vector<1x1xf32>
    %217 = arith.subf %215, %216 : vector<1x1xf32>
    %cst_136 = arith.constant 0.000000e+00 : f32
    %218 = vector.broadcast %cst_136 : f32 to vector<1x1xf32>
    %219 = arith.maximumf %217, %218 : vector<1x1xf32>
    %220 = vector.shape_cast %213 : vector<1x1xf32> to vector<1x1xf32>
    %221 = vector.broadcast %220 : vector<1x1xf32> to vector<1x32xf32>
    %222 = arith.select %30, %221, %197 : vector<1x32xi1>, vector<1x32xf32>
    %cst_137 = arith.constant 9.99999974E-6 : f32
    %223 = vector.broadcast %cst_137 : f32 to vector<1x1xf32>
    %224 = arith.addf %219, %223 : vector<1x1xf32>
    %225 = math.rsqrt %224 : vector<1x1xf32>
    %226 = vector.shape_cast %225 : vector<1x1xf32> to vector<1x1xf32>
    %227 = vector.broadcast %226 : vector<1x1xf32> to vector<1x32xf32>
    %228 = arith.select %30, %227, %203 : vector<1x32xi1>, vector<1x32xf32>
    %229 = vector.broadcast %222 : vector<1x32xf32> to vector<64x32xf32>
    %230 = arith.subf %119, %229 : vector<64x32xf32>
    %231 = arith.mulf %228, %120 : vector<1x32xf32>
    %232 = vector.broadcast %231 : vector<1x32xf32> to vector<64x32xf32>
    %233 = arith.mulf %230, %232 : vector<64x32xf32>
    %234 = vector.broadcast %121 : vector<1x32xf32> to vector<64x32xf32>
    %235 = arith.addf %233, %234 : vector<64x32xf32>
    %cst_138 = arith.constant 0.000000e+00 : f32
    %236 = vector.broadcast %cst_138 : f32 to vector<64x32xf32>
    %237 = arith.maximumf %235, %236 : vector<64x32xf32>
    %cst_139 = arith.constant dense<0.000000e+00> : vector<32xf32>
    %238 = vector.multi_reduction <add>, %237, %cst_139 [0] : vector<64x32xf32> to vector<32xf32>
    %239 = vector.shape_cast %238 : vector<32xf32> to vector<1x32xf32>
    %cst_140 = arith.constant 1.562500e-02 : f32
    %240 = vector.broadcast %cst_140 : f32 to vector<1x32xf32>
    %241 = arith.mulf %239, %240 : vector<1x32xf32>
    %c0_141 = arith.constant 0 : index
    %c0_142 = arith.constant 0 : index
    %242 = vector.load %arg8[%c0_141, %c0_142] : memref<32x2xf32, #tpu.memory_space<vmem>>, vector<32x2xf32>
    %cst_143 = arith.constant dense<0.000000e+00> : vector<1x2xf32>
    %243 = tpu.matmul %241, %242, %cst_143 {dimension_numbers = #tpu.dot_dimension_numbers<[1], [0], [0], [1], [0, 0, 1, 1], [], []>} : vector<1x32xf32>, vector<32x2xf32>, vector<1x2xf32> -> vector<1x2xf32>
    %cst_144 = arith.constant 0.000000e+00 : f32
    %244 = vector.broadcast %cst_144 : f32 to vector<1x2xf32>
    %245 = arith.maximumf %243, %244 : vector<1x2xf32>
    %c0_145 = arith.constant 0 : index
    %c0_146 = arith.constant 0 : index
    %246 = vector.load %arg9[%c0_145, %c0_146] : memref<2x32xf32, #tpu.memory_space<vmem>>, vector<2x32xf32>
    %cst_147 = arith.constant dense<0.000000e+00> : vector<1x32xf32>
    %247 = tpu.matmul %245, %246, %cst_147 {dimension_numbers = #tpu.dot_dimension_numbers<[1], [0], [0], [1], [0, 0, 1, 1], [], []>} : vector<1x2xf32>, vector<2x32xf32>, vector<1x32xf32> -> vector<1x32xf32>
    %cst_148 = arith.constant 0.000000e+00 : f32
    %248 = vector.broadcast %cst_148 : f32 to vector<1x32xf32>
    %249 = arith.subf %248, %247 : vector<1x32xf32>
    %250 = math.exp %249 : vector<1x32xf32>
    %cst_149 = arith.constant 1.000000e+00 : f32
    %251 = vector.broadcast %cst_149 : f32 to vector<1x32xf32>
    %252 = arith.addf %251, %250 : vector<1x32xf32>
    %cst_150 = arith.constant 1.000000e+00 : f32
    %253 = vector.broadcast %cst_150 : f32 to vector<1x32xf32>
    %254 = arith.divf %253, %252 : vector<1x32xf32>
    %255 = vector.broadcast %254 : vector<1x32xf32> to vector<64x32xf32>
    %256 = arith.mulf %237, %255 : vector<64x32xf32>
    %c16_151 = arith.constant 16 : index
    %c0_152 = arith.constant 0 : index
    %257 = vector.load %arg16[%c16_151, %c0_152] : memref<96x32xf32, #tpu.memory_space<vmem>>, vector<64x32xf32>
    tpu.vector_store %arg16[%c16_151, %c0_152], %256 {strides = array<i32>} : memref<96x32xf32, #tpu.memory_space<vmem>>, vector<64x32xf32>,
    %c7_153 = arith.constant 7 : index
    %c0_154 = arith.constant 0 : index
    %258 = vector.load %arg16[%c7_153, %c0_154] : memref<96x32xf32, #tpu.memory_space<vmem>>, vector<64x32xf32>
    %259 = vector.broadcast %8 : vector<64x1xf32> to vector<64x32xf32>
    %260 = arith.mulf %258, %259 : vector<64x32xf32>
    %261 = arith.truncf %260 : vector<64x32xf32> to vector<64x32xbf16>
    %c0_155 = arith.constant 0 : index
    %c0_156 = arith.constant 0 : index
    %c0_157 = arith.constant 0 : index
    %262 = vector.load %arg10[%c0_155, %c0_156, %c0_157] : memref<9x32x32xbf16, #tpu.memory_space<vmem>>, vector<1x32x32xbf16>
    %263 = vector.shape_cast %262 : vector<1x32x32xbf16> to vector<32x32xbf16>
    %cst_158 = arith.constant dense<0.000000e+00> : vector<64x32xf32>
    %264 = tpu.matmul %261, %263, %cst_158 {dimension_numbers = #tpu.dot_dimension_numbers<[1], [0], [0], [1], [0, 0, 1, 1], [], []>} : vector<64x32xbf16>, vector<32x32xbf16>, vector<64x32xf32> -> vector<64x32xf32>
    %c0_159 = arith.constant 0 : index
    %c0_160 = arith.constant 0 : index
    %265 = vector.load %arg17[%c0_159, %c0_160] : memref<64x32xf32, #tpu.memory_space<vmem>>, vector<64x32xf32>
    tpu.vector_store %arg17[%c0_159, %c0_160], %264 {strides = array<i32>} : memref<64x32xf32, #tpu.memory_space<vmem>>, vector<64x32xf32>,
    %c8_161 = arith.constant 8 : index
    %c0_162 = arith.constant 0 : index
    %266 = vector.load %arg16[%c8_161, %c0_162] : memref<96x32xf32, #tpu.memory_space<vmem>>, vector<64x32xf32>
    %267 = arith.truncf %266 : vector<64x32xf32> to vector<64x32xbf16>
    %c1_163 = arith.constant 1 : index
    %c0_164 = arith.constant 0 : index
    %c0_165 = arith.constant 0 : index
    %268 = vector.load %arg10[%c1_163, %c0_164, %c0_165] : memref<9x32x32xbf16, #tpu.memory_space<vmem>>, vector<1x32x32xbf16>
    %269 = vector.shape_cast %268 : vector<1x32x32xbf16> to vector<32x32xbf16>
    %cst_166 = arith.constant dense<0.000000e+00> : vector<64x32xf32>
    %270 = tpu.matmul %267, %269, %cst_166 {dimension_numbers = #tpu.dot_dimension_numbers<[1], [0], [0], [1], [0, 0, 1, 1], [], []>} : vector<64x32xbf16>, vector<32x32xbf16>, vector<64x32xf32> -> vector<64x32xf32>
    %c0_167 = arith.constant 0 : index
    %c0_168 = arith.constant 0 : index
    %271 = vector.load %arg17[%c0_167, %c0_168] : memref<64x32xf32, #tpu.memory_space<vmem>>, vector<64x32xf32>
    %272 = arith.addf %271, %270 : vector<64x32xf32>
    %c0_169 = arith.constant 0 : index
    %c0_170 = arith.constant 0 : index
    %273 = vector.load %arg17[%c0_169, %c0_170] : memref<64x32xf32, #tpu.memory_space<vmem>>, vector<64x32xf32>
    tpu.vector_store %arg17[%c0_169, %c0_170], %272 {strides = array<i32>} : memref<64x32xf32, #tpu.memory_space<vmem>>, vector<64x32xf32>,
    %c9_171 = arith.constant 9 : index
    %c0_172 = arith.constant 0 : index
    %274 = vector.load %arg16[%c9_171, %c0_172] : memref<96x32xf32, #tpu.memory_space<vmem>>, vector<64x32xf32>
    %275 = vector.broadcast %9 : vector<64x1xf32> to vector<64x32xf32>
    %276 = arith.mulf %274, %275 : vector<64x32xf32>
    %277 = arith.truncf %276 : vector<64x32xf32> to vector<64x32xbf16>
    %c2_173 = arith.constant 2 : index
    %c0_174 = arith.constant 0 : index
    %c0_175 = arith.constant 0 : index
    %278 = vector.load %arg10[%c2_173, %c0_174, %c0_175] : memref<9x32x32xbf16, #tpu.memory_space<vmem>>, vector<1x32x32xbf16>
    %279 = vector.shape_cast %278 : vector<1x32x32xbf16> to vector<32x32xbf16>
    %cst_176 = arith.constant dense<0.000000e+00> : vector<64x32xf32>
    %280 = tpu.matmul %277, %279, %cst_176 {dimension_numbers = #tpu.dot_dimension_numbers<[1], [0], [0], [1], [0, 0, 1, 1], [], []>} : vector<64x32xbf16>, vector<32x32xbf16>, vector<64x32xf32> -> vector<64x32xf32>
    %c0_177 = arith.constant 0 : index
    %c0_178 = arith.constant 0 : index
    %281 = vector.load %arg17[%c0_177, %c0_178] : memref<64x32xf32, #tpu.memory_space<vmem>>, vector<64x32xf32>
    %282 = arith.addf %281, %280 : vector<64x32xf32>
    %c0_179 = arith.constant 0 : index
    %c0_180 = arith.constant 0 : index
    %283 = vector.load %arg17[%c0_179, %c0_180] : memref<64x32xf32, #tpu.memory_space<vmem>>, vector<64x32xf32>
    tpu.vector_store %arg17[%c0_179, %c0_180], %282 {strides = array<i32>} : memref<64x32xf32, #tpu.memory_space<vmem>>, vector<64x32xf32>,
    %c15_181 = arith.constant 15 : index
    %c0_182 = arith.constant 0 : index
    %284 = vector.load %arg16[%c15_181, %c0_182] : memref<96x32xf32, #tpu.memory_space<vmem>>, vector<64x32xf32>
    %285 = vector.broadcast %8 : vector<64x1xf32> to vector<64x32xf32>
    %286 = arith.mulf %284, %285 : vector<64x32xf32>
    %287 = arith.truncf %286 : vector<64x32xf32> to vector<64x32xbf16>
    %c3_183 = arith.constant 3 : index
    %c0_184 = arith.constant 0 : index
    %c0_185 = arith.constant 0 : index
    %288 = vector.load %arg10[%c3_183, %c0_184, %c0_185] : memref<9x32x32xbf16, #tpu.memory_space<vmem>>, vector<1x32x32xbf16>
    %289 = vector.shape_cast %288 : vector<1x32x32xbf16> to vector<32x32xbf16>
    %cst_186 = arith.constant dense<0.000000e+00> : vector<64x32xf32>
    %290 = tpu.matmul %287, %289, %cst_186 {dimension_numbers = #tpu.dot_dimension_numbers<[1], [0], [0], [1], [0, 0, 1, 1], [], []>} : vector<64x32xbf16>, vector<32x32xbf16>, vector<64x32xf32> -> vector<64x32xf32>
    %c0_187 = arith.constant 0 : index
    %c0_188 = arith.constant 0 : index
    %291 = vector.load %arg17[%c0_187, %c0_188] : memref<64x32xf32, #tpu.memory_space<vmem>>, vector<64x32xf32>
    %292 = arith.addf %291, %290 : vector<64x32xf32>
    %c0_189 = arith.constant 0 : index
    %c0_190 = arith.constant 0 : index
    %293 = vector.load %arg17[%c0_189, %c0_190] : memref<64x32xf32, #tpu.memory_space<vmem>>, vector<64x32xf32>
    tpu.vector_store %arg17[%c0_189, %c0_190], %292 {strides = array<i32>} : memref<64x32xf32, #tpu.memory_space<vmem>>, vector<64x32xf32>,
    %c16_191 = arith.constant 16 : index
    %c0_192 = arith.constant 0 : index
    %294 = vector.load %arg16[%c16_191, %c0_192] : memref<96x32xf32, #tpu.memory_space<vmem>>, vector<64x32xf32>
    %295 = arith.truncf %294 : vector<64x32xf32> to vector<64x32xbf16>
    %c4_193 = arith.constant 4 : index
    %c0_194 = arith.constant 0 : index
    %c0_195 = arith.constant 0 : index
    %296 = vector.load %arg10[%c4_193, %c0_194, %c0_195] : memref<9x32x32xbf16, #tpu.memory_space<vmem>>, vector<1x32x32xbf16>
    %297 = vector.shape_cast %296 : vector<1x32x32xbf16> to vector<32x32xbf16>
    %cst_196 = arith.constant dense<0.000000e+00> : vector<64x32xf32>
    %298 = tpu.matmul %295, %297, %cst_196 {dimension_numbers = #tpu.dot_dimension_numbers<[1], [0], [0], [1], [0, 0, 1, 1], [], []>} : vector<64x32xbf16>, vector<32x32xbf16>, vector<64x32xf32> -> vector<64x32xf32>
    %c0_197 = arith.constant 0 : index
    %c0_198 = arith.constant 0 : index
    %299 = vector.load %arg17[%c0_197, %c0_198] : memref<64x32xf32, #tpu.memory_space<vmem>>, vector<64x32xf32>
    %300 = arith.addf %299, %298 : vector<64x32xf32>
    %c0_199 = arith.constant 0 : index
    %c0_200 = arith.constant 0 : index
    %301 = vector.load %arg17[%c0_199, %c0_200] : memref<64x32xf32, #tpu.memory_space<vmem>>, vector<64x32xf32>
    tpu.vector_store %arg17[%c0_199, %c0_200], %300 {strides = array<i32>} : memref<64x32xf32, #tpu.memory_space<vmem>>, vector<64x32xf32>,
    %c17_201 = arith.constant 17 : index
    %c0_202 = arith.constant 0 : index
    %302 = vector.load %arg16[%c17_201, %c0_202] : memref<96x32xf32, #tpu.memory_space<vmem>>, vector<64x32xf32>
    %303 = vector.broadcast %9 : vector<64x1xf32> to vector<64x32xf32>
    %304 = arith.mulf %302, %303 : vector<64x32xf32>
    %305 = arith.truncf %304 : vector<64x32xf32> to vector<64x32xbf16>
    %c5_203 = arith.constant 5 : index
    %c0_204 = arith.constant 0 : index
    %c0_205 = arith.constant 0 : index
    %306 = vector.load %arg10[%c5_203, %c0_204, %c0_205] : memref<9x32x32xbf16, #tpu.memory_space<vmem>>, vector<1x32x32xbf16>
    %307 = vector.shape_cast %306 : vector<1x32x32xbf16> to vector<32x32xbf16>
    %cst_206 = arith.constant dense<0.000000e+00> : vector<64x32xf32>
    %308 = tpu.matmul %305, %307, %cst_206 {dimension_numbers = #tpu.dot_dimension_numbers<[1], [0], [0], [1], [0, 0, 1, 1], [], []>} : vector<64x32xbf16>, vector<32x32xbf16>, vector<64x32xf32> -> vector<64x32xf32>
    %c0_207 = arith.constant 0 : index
    %c0_208 = arith.constant 0 : index
    %309 = vector.load %arg17[%c0_207, %c0_208] : memref<64x32xf32, #tpu.memory_space<vmem>>, vector<64x32xf32>
    %310 = arith.addf %309, %308 : vector<64x32xf32>
    %c0_209 = arith.constant 0 : index
    %c0_210 = arith.constant 0 : index
    %311 = vector.load %arg17[%c0_209, %c0_210] : memref<64x32xf32, #tpu.memory_space<vmem>>, vector<64x32xf32>
    tpu.vector_store %arg17[%c0_209, %c0_210], %310 {strides = array<i32>} : memref<64x32xf32, #tpu.memory_space<vmem>>, vector<64x32xf32>,
    %c23_211 = arith.constant 23 : index
    %c0_212 = arith.constant 0 : index
    %312 = vector.load %arg16[%c23_211, %c0_212] : memref<96x32xf32, #tpu.memory_space<vmem>>, vector<64x32xf32>
    %313 = vector.broadcast %8 : vector<64x1xf32> to vector<64x32xf32>
    %314 = arith.mulf %312, %313 : vector<64x32xf32>
    %315 = arith.truncf %314 : vector<64x32xf32> to vector<64x32xbf16>
    %c6_213 = arith.constant 6 : index
    %c0_214 = arith.constant 0 : index
    %c0_215 = arith.constant 0 : index
    %316 = vector.load %arg10[%c6_213, %c0_214, %c0_215] : memref<9x32x32xbf16, #tpu.memory_space<vmem>>, vector<1x32x32xbf16>
    %317 = vector.shape_cast %316 : vector<1x32x32xbf16> to vector<32x32xbf16>
    %cst_216 = arith.constant dense<0.000000e+00> : vector<64x32xf32>
    %318 = tpu.matmul %315, %317, %cst_216 {dimension_numbers = #tpu.dot_dimension_numbers<[1], [0], [0], [1], [0, 0, 1, 1], [], []>} : vector<64x32xbf16>, vector<32x32xbf16>, vector<64x32xf32> -> vector<64x32xf32>
    %c0_217 = arith.constant 0 : index
    %c0_218 = arith.constant 0 : index
    %319 = vector.load %arg17[%c0_217, %c0_218] : memref<64x32xf32, #tpu.memory_space<vmem>>, vector<64x32xf32>
    %320 = arith.addf %319, %318 : vector<64x32xf32>
    %c0_219 = arith.constant 0 : index
    %c0_220 = arith.constant 0 : index
    %321 = vector.load %arg17[%c0_219, %c0_220] : memref<64x32xf32, #tpu.memory_space<vmem>>, vector<64x32xf32>
    tpu.vector_store %arg17[%c0_219, %c0_220], %320 {strides = array<i32>} : memref<64x32xf32, #tpu.memory_space<vmem>>, vector<64x32xf32>,
    %c24_221 = arith.constant 24 : index
    %c0_222 = arith.constant 0 : index
    %322 = vector.load %arg16[%c24_221, %c0_222] : memref<96x32xf32, #tpu.memory_space<vmem>>, vector<64x32xf32>
    %323 = arith.truncf %322 : vector<64x32xf32> to vector<64x32xbf16>
    %c7_223 = arith.constant 7 : index
    %c0_224 = arith.constant 0 : index
    %c0_225 = arith.constant 0 : index
    %324 = vector.load %arg10[%c7_223, %c0_224, %c0_225] : memref<9x32x32xbf16, #tpu.memory_space<vmem>>, vector<1x32x32xbf16>
    %325 = vector.shape_cast %324 : vector<1x32x32xbf16> to vector<32x32xbf16>
    %cst_226 = arith.constant dense<0.000000e+00> : vector<64x32xf32>
    %326 = tpu.matmul %323, %325, %cst_226 {dimension_numbers = #tpu.dot_dimension_numbers<[1], [0], [0], [1], [0, 0, 1, 1], [], []>} : vector<64x32xbf16>, vector<32x32xbf16>, vector<64x32xf32> -> vector<64x32xf32>
    %c0_227 = arith.constant 0 : index
    %c0_228 = arith.constant 0 : index
    %327 = vector.load %arg17[%c0_227, %c0_228] : memref<64x32xf32, #tpu.memory_space<vmem>>, vector<64x32xf32>
    %328 = arith.addf %327, %326 : vector<64x32xf32>
    %c0_229 = arith.constant 0 : index
    %c0_230 = arith.constant 0 : index
    %329 = vector.load %arg17[%c0_229, %c0_230] : memref<64x32xf32, #tpu.memory_space<vmem>>, vector<64x32xf32>
    tpu.vector_store %arg17[%c0_229, %c0_230], %328 {strides = array<i32>} : memref<64x32xf32, #tpu.memory_space<vmem>>, vector<64x32xf32>,
    %c25_231 = arith.constant 25 : index
    %c0_232 = arith.constant 0 : index
    %330 = vector.load %arg16[%c25_231, %c0_232] : memref<96x32xf32, #tpu.memory_space<vmem>>, vector<64x32xf32>
    %331 = vector.broadcast %9 : vector<64x1xf32> to vector<64x32xf32>
    %332 = arith.mulf %330, %331 : vector<64x32xf32>
    %333 = arith.truncf %332 : vector<64x32xf32> to vector<64x32xbf16>
    %c8_233 = arith.constant 8 : index
    %c0_234 = arith.constant 0 : index
    %c0_235 = arith.constant 0 : index
    %334 = vector.load %arg10[%c8_233, %c0_234, %c0_235] : memref<9x32x32xbf16, #tpu.memory_space<vmem>>, vector<1x32x32xbf16>
    %335 = vector.shape_cast %334 : vector<1x32x32xbf16> to vector<32x32xbf16>
    %cst_236 = arith.constant dense<0.000000e+00> : vector<64x32xf32>
    %336 = tpu.matmul %333, %335, %cst_236 {dimension_numbers = #tpu.dot_dimension_numbers<[1], [0], [0], [1], [0, 0, 1, 1], [], []>} : vector<64x32xbf16>, vector<32x32xbf16>, vector<64x32xf32> -> vector<64x32xf32>
    %c0_237 = arith.constant 0 : index
    %c0_238 = arith.constant 0 : index
    %337 = vector.load %arg17[%c0_237, %c0_238] : memref<64x32xf32, #tpu.memory_space<vmem>>, vector<64x32xf32>
    %338 = arith.addf %337, %336 : vector<64x32xf32>
    %c0_239 = arith.constant 0 : index
    %c0_240 = arith.constant 0 : index
    %339 = vector.load %arg17[%c0_239, %c0_240] : memref<64x32xf32, #tpu.memory_space<vmem>>, vector<64x32xf32>
    tpu.vector_store %arg17[%c0_239, %c0_240], %338 {strides = array<i32>} : memref<64x32xf32, #tpu.memory_space<vmem>>, vector<64x32xf32>,
    %c0_241 = arith.constant 0 : index
    %c0_242 = arith.constant 0 : index
    %340 = vector.load %arg17[%c0_241, %c0_242] : memref<64x32xf32, #tpu.memory_space<vmem>>, vector<64x32xf32>
    %c0_243 = arith.constant 0 : index
    %c0_244 = arith.constant 0 : index
    %341 = vector.load %arg11[%c0_243, %c0_244] : memref<1x32xf32, #tpu.memory_space<vmem>>, vector<1x32xf32>
    %342 = vector.broadcast %341 : vector<1x32xf32> to vector<64x32xf32>
    %343 = arith.addf %340, %342 : vector<64x32xf32>
    %c0_245 = arith.constant 0 : index
    %c0_246 = arith.constant 0 : index
    %344 = vector.load %arg12[%c0_245, %c0_246] : memref<1x32xf32, #tpu.memory_space<vmem>>, vector<1x32xf32>
    %c0_247 = arith.constant 0 : index
    %c0_248 = arith.constant 0 : index
    %345 = vector.load %arg13[%c0_247, %c0_248] : memref<1x32xf32, #tpu.memory_space<vmem>>, vector<1x32xf32>
    %cst_249 = arith.constant dense<0.000000e+00> : vector<32xf32>
    %346 = vector.multi_reduction <add>, %343, %cst_249 [0] : vector<64x32xf32> to vector<32xf32>
    %347 = vector.shape_cast %346 : vector<32xf32> to vector<1x32xf32>
    %348 = arith.mulf %343, %343 : vector<64x32xf32>
    %cst_250 = arith.constant dense<0.000000e+00> : vector<32xf32>
    %349 = vector.multi_reduction <add>, %348, %cst_250 [0] : vector<64x32xf32> to vector<32xf32>
    %350 = vector.shape_cast %349 : vector<32xf32> to vector<1x32xf32>
    %cst_251 = arith.constant 0.000000e+00 : f32
    %351 = vector.broadcast %cst_251 : f32 to vector<1x32xf32>
    %cst_252 = arith.constant 0.000000e+00 : f32
    %352 = vector.broadcast %cst_252 : f32 to vector<1x32xf32>
    %cst_253 = arith.constant 0.000000e+00 : f32
    %353 = vector.broadcast %cst_253 : f32 to vector<1x32xf32>
    %354 = arith.select %15, %347, %353 : vector<1x32xi1>, vector<1x32xf32>
    %cst_254 = arith.constant dense<0.000000e+00> : vector<1xf32>
    %355 = vector.multi_reduction <add>, %354, %cst_254 [1] : vector<1x32xf32> to vector<1xf32>
    %356 = vector.shape_cast %355 : vector<1xf32> to vector<1x1xf32>
    %cst_255 = arith.constant 0.000000e+00 : f32
    %357 = vector.broadcast %cst_255 : f32 to vector<1x32xf32>
    %358 = arith.select %15, %350, %357 : vector<1x32xi1>, vector<1x32xf32>
    %cst_256 = arith.constant dense<0.000000e+00> : vector<1xf32>
    %359 = vector.multi_reduction <add>, %358, %cst_256 [1] : vector<1x32xf32> to vector<1xf32>
    %360 = vector.shape_cast %359 : vector<1xf32> to vector<1x1xf32>
    %cst_257 = arith.constant 0.001953125 : f32
    %361 = vector.broadcast %cst_257 : f32 to vector<1x1xf32>
    %362 = arith.mulf %356, %361 : vector<1x1xf32>
    %cst_258 = arith.constant 0.001953125 : f32
    %363 = vector.broadcast %cst_258 : f32 to vector<1x1xf32>
    %364 = arith.mulf %360, %363 : vector<1x1xf32>
    %365 = arith.mulf %362, %362 : vector<1x1xf32>
    %366 = arith.subf %364, %365 : vector<1x1xf32>
    %cst_259 = arith.constant 0.000000e+00 : f32
    %367 = vector.broadcast %cst_259 : f32 to vector<1x1xf32>
    %368 = arith.maximumf %366, %367 : vector<1x1xf32>
    %369 = vector.shape_cast %362 : vector<1x1xf32> to vector<1x1xf32>
    %370 = vector.broadcast %369 : vector<1x1xf32> to vector<1x32xf32>
    %371 = arith.select %15, %370, %351 : vector<1x32xi1>, vector<1x32xf32>
    %cst_260 = arith.constant 9.99999974E-6 : f32
    %372 = vector.broadcast %cst_260 : f32 to vector<1x1xf32>
    %373 = arith.addf %368, %372 : vector<1x1xf32>
    %374 = math.rsqrt %373 : vector<1x1xf32>
    %375 = vector.shape_cast %374 : vector<1x1xf32> to vector<1x1xf32>
    %376 = vector.broadcast %375 : vector<1x1xf32> to vector<1x32xf32>
    %377 = arith.select %15, %376, %352 : vector<1x32xi1>, vector<1x32xf32>
    %cst_261 = arith.constant 0.000000e+00 : f32
    %378 = vector.broadcast %cst_261 : f32 to vector<1x32xf32>
    %379 = arith.select %20, %347, %378 : vector<1x32xi1>, vector<1x32xf32>
    %cst_262 = arith.constant dense<0.000000e+00> : vector<1xf32>
    %380 = vector.multi_reduction <add>, %379, %cst_262 [1] : vector<1x32xf32> to vector<1xf32>
    %381 = vector.shape_cast %380 : vector<1xf32> to vector<1x1xf32>
    %cst_263 = arith.constant 0.000000e+00 : f32
    %382 = vector.broadcast %cst_263 : f32 to vector<1x32xf32>
    %383 = arith.select %20, %350, %382 : vector<1x32xi1>, vector<1x32xf32>
    %cst_264 = arith.constant dense<0.000000e+00> : vector<1xf32>
    %384 = vector.multi_reduction <add>, %383, %cst_264 [1] : vector<1x32xf32> to vector<1xf32>
    %385 = vector.shape_cast %384 : vector<1xf32> to vector<1x1xf32>
    %cst_265 = arith.constant 0.001953125 : f32
    %386 = vector.broadcast %cst_265 : f32 to vector<1x1xf32>
    %387 = arith.mulf %381, %386 : vector<1x1xf32>
    %cst_266 = arith.constant 0.001953125 : f32
    %388 = vector.broadcast %cst_266 : f32 to vector<1x1xf32>
    %389 = arith.mulf %385, %388 : vector<1x1xf32>
    %390 = arith.mulf %387, %387 : vector<1x1xf32>
    %391 = arith.subf %389, %390 : vector<1x1xf32>
    %cst_267 = arith.constant 0.000000e+00 : f32
    %392 = vector.broadcast %cst_267 : f32 to vector<1x1xf32>
    %393 = arith.maximumf %391, %392 : vector<1x1xf32>
    %394 = vector.shape_cast %387 : vector<1x1xf32> to vector<1x1xf32>
    %395 = vector.broadcast %394 : vector<1x1xf32> to vector<1x32xf32>
    %396 = arith.select %20, %395, %371 : vector<1x32xi1>, vector<1x32xf32>
    %cst_268 = arith.constant 9.99999974E-6 : f32
    %397 = vector.broadcast %cst_268 : f32 to vector<1x1xf32>
    %398 = arith.addf %393, %397 : vector<1x1xf32>
    %399 = math.rsqrt %398 : vector<1x1xf32>
    %400 = vector.shape_cast %399 : vector<1x1xf32> to vector<1x1xf32>
    %401 = vector.broadcast %400 : vector<1x1xf32> to vector<1x32xf32>
    %402 = arith.select %20, %401, %377 : vector<1x32xi1>, vector<1x32xf32>
    %cst_269 = arith.constant 0.000000e+00 : f32
    %403 = vector.broadcast %cst_269 : f32 to vector<1x32xf32>
    %404 = arith.select %25, %347, %403 : vector<1x32xi1>, vector<1x32xf32>
    %cst_270 = arith.constant dense<0.000000e+00> : vector<1xf32>
    %405 = vector.multi_reduction <add>, %404, %cst_270 [1] : vector<1x32xf32> to vector<1xf32>
    %406 = vector.shape_cast %405 : vector<1xf32> to vector<1x1xf32>
    %cst_271 = arith.constant 0.000000e+00 : f32
    %407 = vector.broadcast %cst_271 : f32 to vector<1x32xf32>
    %408 = arith.select %25, %350, %407 : vector<1x32xi1>, vector<1x32xf32>
    %cst_272 = arith.constant dense<0.000000e+00> : vector<1xf32>
    %409 = vector.multi_reduction <add>, %408, %cst_272 [1] : vector<1x32xf32> to vector<1xf32>
    %410 = vector.shape_cast %409 : vector<1xf32> to vector<1x1xf32>
    %cst_273 = arith.constant 0.001953125 : f32
    %411 = vector.broadcast %cst_273 : f32 to vector<1x1xf32>
    %412 = arith.mulf %406, %411 : vector<1x1xf32>
    %cst_274 = arith.constant 0.001953125 : f32
    %413 = vector.broadcast %cst_274 : f32 to vector<1x1xf32>
    %414 = arith.mulf %410, %413 : vector<1x1xf32>
    %415 = arith.mulf %412, %412 : vector<1x1xf32>
    %416 = arith.subf %414, %415 : vector<1x1xf32>
    %cst_275 = arith.constant 0.000000e+00 : f32
    %417 = vector.broadcast %cst_275 : f32 to vector<1x1xf32>
    %418 = arith.maximumf %416, %417 : vector<1x1xf32>
    %419 = vector.shape_cast %412 : vector<1x1xf32> to vector<1x1xf32>
    %420 = vector.broadcast %419 : vector<1x1xf32> to vector<1x32xf32>
    %421 = arith.select %25, %420, %396 : vector<1x32xi1>, vector<1x32xf32>
    %cst_276 = arith.constant 9.99999974E-6 : f32
    %422 = vector.broadcast %cst_276 : f32 to vector<1x1xf32>
    %423 = arith.addf %418, %422 : vector<1x1xf32>
    %424 = math.rsqrt %423 : vector<1x1xf32>
    %425 = vector.shape_cast %424 : vector<1x1xf32> to vector<1x1xf32>
    %426 = vector.broadcast %425 : vector<1x1xf32> to vector<1x32xf32>
    %427 = arith.select %25, %426, %402 : vector<1x32xi1>, vector<1x32xf32>
    %cst_277 = arith.constant 0.000000e+00 : f32
    %428 = vector.broadcast %cst_277 : f32 to vector<1x32xf32>
    %429 = arith.select %30, %347, %428 : vector<1x32xi1>, vector<1x32xf32>
    %cst_278 = arith.constant dense<0.000000e+00> : vector<1xf32>
    %430 = vector.multi_reduction <add>, %429, %cst_278 [1] : vector<1x32xf32> to vector<1xf32>
    %431 = vector.shape_cast %430 : vector<1xf32> to vector<1x1xf32>
    %cst_279 = arith.constant 0.000000e+00 : f32
    %432 = vector.broadcast %cst_279 : f32 to vector<1x32xf32>
    %433 = arith.select %30, %350, %432 : vector<1x32xi1>, vector<1x32xf32>
    %cst_280 = arith.constant dense<0.000000e+00> : vector<1xf32>
    %434 = vector.multi_reduction <add>, %433, %cst_280 [1] : vector<1x32xf32> to vector<1xf32>
    %435 = vector.shape_cast %434 : vector<1xf32> to vector<1x1xf32>
    %cst_281 = arith.constant 0.001953125 : f32
    %436 = vector.broadcast %cst_281 : f32 to vector<1x1xf32>
    %437 = arith.mulf %431, %436 : vector<1x1xf32>
    %cst_282 = arith.constant 0.001953125 : f32
    %438 = vector.broadcast %cst_282 : f32 to vector<1x1xf32>
    %439 = arith.mulf %435, %438 : vector<1x1xf32>
    %440 = arith.mulf %437, %437 : vector<1x1xf32>
    %441 = arith.subf %439, %440 : vector<1x1xf32>
    %cst_283 = arith.constant 0.000000e+00 : f32
    %442 = vector.broadcast %cst_283 : f32 to vector<1x1xf32>
    %443 = arith.maximumf %441, %442 : vector<1x1xf32>
    %444 = vector.shape_cast %437 : vector<1x1xf32> to vector<1x1xf32>
    %445 = vector.broadcast %444 : vector<1x1xf32> to vector<1x32xf32>
    %446 = arith.select %30, %445, %421 : vector<1x32xi1>, vector<1x32xf32>
    %cst_284 = arith.constant 9.99999974E-6 : f32
    %447 = vector.broadcast %cst_284 : f32 to vector<1x1xf32>
    %448 = arith.addf %443, %447 : vector<1x1xf32>
    %449 = math.rsqrt %448 : vector<1x1xf32>
    %450 = vector.shape_cast %449 : vector<1x1xf32> to vector<1x1xf32>
    %451 = vector.broadcast %450 : vector<1x1xf32> to vector<1x32xf32>
    %452 = arith.select %30, %451, %427 : vector<1x32xi1>, vector<1x32xf32>
    %453 = vector.broadcast %446 : vector<1x32xf32> to vector<64x32xf32>
    %454 = arith.subf %343, %453 : vector<64x32xf32>
    %455 = arith.mulf %452, %344 : vector<1x32xf32>
    %456 = vector.broadcast %455 : vector<1x32xf32> to vector<64x32xf32>
    %457 = arith.mulf %454, %456 : vector<64x32xf32>
    %458 = vector.broadcast %345 : vector<1x32xf32> to vector<64x32xf32>
    %459 = arith.addf %457, %458 : vector<64x32xf32>
    %460 = arith.addf %237, %459 : vector<64x32xf32>
    %cst_285 = arith.constant 0.000000e+00 : f32
    %461 = vector.broadcast %cst_285 : f32 to vector<64x32xf32>
    %462 = arith.maximumf %460, %461 : vector<64x32xf32>
    %c0_286 = arith.constant 0 : index
    %c0_287 = arith.constant 0 : index
    %c0_288 = arith.constant 0 : index
    %463 = vector.load %arg14[%c0_286, %c0_287, %c0_288] : memref<1x64x32xf32, #tpu.memory_space<vmem>>, vector<1x64x32xf32>
    %464 = vector.shape_cast %463 : vector<1x64x32xf32> to vector<64x32xf32>
    %465 = vector.shape_cast %462 : vector<64x32xf32> to vector<1x64x32xf32>
    tpu.vector_store %arg14[%c0_286, %c0_287, %c0_288], %465 {strides = array<i32>} : memref<1x64x32xf32, #tpu.memory_space<vmem>>, vector<1x64x32xf32>,
    return
  }
  func.func @transform_0(%arg0: i32) -> (i32, i32, i32) {
    %c0_i32 = arith.constant 0 : i32
    %c0_i32_0 = arith.constant 0 : i32
    %c0_i32_1 = arith.constant 0 : i32
    return %arg0, %c0_i32, %c0_i32_0 : i32, i32, i32
  }
  func.func @transform_1(%arg0: i32) -> (i32, i32) {
    %c0_i32 = arith.constant 0 : i32
    %c0_i32_0 = arith.constant 0 : i32
    %c0_i32_1 = arith.constant 0 : i32
    return %c0_i32, %c0_i32_0 : i32, i32
  }
  func.func @transform_2(%arg0: i32) -> (i32, i32) {
    %c0_i32 = arith.constant 0 : i32
    %c0_i32_0 = arith.constant 0 : i32
    %c0_i32_1 = arith.constant 0 : i32
    return %c0_i32, %c0_i32_0 : i32, i32
  }
  func.func @transform_3(%arg0: i32) -> (i32, i32, i32) {
    %c0_i32 = arith.constant 0 : i32
    %c0_i32_0 = arith.constant 0 : i32
    %c0_i32_1 = arith.constant 0 : i32
    %c0_i32_2 = arith.constant 0 : i32
    return %c0_i32, %c0_i32_0, %c0_i32_1 : i32, i32, i32
  }
  func.func @transform_4(%arg0: i32) -> (i32, i32) {
    %c0_i32 = arith.constant 0 : i32
    %c0_i32_0 = arith.constant 0 : i32
    %c0_i32_1 = arith.constant 0 : i32
    return %c0_i32, %c0_i32_0 : i32, i32
  }
  func.func @transform_5(%arg0: i32) -> (i32, i32) {
    %c0_i32 = arith.constant 0 : i32
    %c0_i32_0 = arith.constant 0 : i32
    %c0_i32_1 = arith.constant 0 : i32
    return %c0_i32, %c0_i32_0 : i32, i32
  }
  func.func @transform_6(%arg0: i32) -> (i32, i32) {
    %c0_i32 = arith.constant 0 : i32
    %c0_i32_0 = arith.constant 0 : i32
    %c0_i32_1 = arith.constant 0 : i32
    return %c0_i32, %c0_i32_0 : i32, i32
  }
  func.func @transform_7(%arg0: i32) -> (i32, i32) {
    %c0_i32 = arith.constant 0 : i32
    %c0_i32_0 = arith.constant 0 : i32
    %c0_i32_1 = arith.constant 0 : i32
    return %c0_i32, %c0_i32_0 : i32, i32
  }
  func.func @transform_8(%arg0: i32) -> (i32, i32) {
    %c0_i32 = arith.constant 0 : i32
    %c0_i32_0 = arith.constant 0 : i32
    %c0_i32_1 = arith.constant 0 : i32
    return %c0_i32, %c0_i32_0 : i32, i32
  }
  func.func @transform_9(%arg0: i32) -> (i32, i32, i32) {
    %c0_i32 = arith.constant 0 : i32
    %c0_i32_0 = arith.constant 0 : i32
    %c0_i32_1 = arith.constant 0 : i32
    %c0_i32_2 = arith.constant 0 : i32
    return %c0_i32, %c0_i32_0, %c0_i32_1 : i32, i32, i32
  }
  func.func @transform_10(%arg0: i32) -> (i32, i32) {
    %c0_i32 = arith.constant 0 : i32
    %c0_i32_0 = arith.constant 0 : i32
    %c0_i32_1 = arith.constant 0 : i32
    return %c0_i32, %c0_i32_0 : i32, i32
  }
  func.func @transform_11(%arg0: i32) -> (i32, i32) {
    %c0_i32 = arith.constant 0 : i32
    %c0_i32_0 = arith.constant 0 : i32
    %c0_i32_1 = arith.constant 0 : i32
    return %c0_i32, %c0_i32_0 : i32, i32
  }
  func.func @transform_12(%arg0: i32) -> (i32, i32) {
    %c0_i32 = arith.constant 0 : i32
    %c0_i32_0 = arith.constant 0 : i32
    %c0_i32_1 = arith.constant 0 : i32
    return %c0_i32, %c0_i32_0 : i32, i32
  }
  func.func @transform_13(%arg0: i32) -> (i32, i32, i32) {
    %c0_i32 = arith.constant 0 : i32
    %c0_i32_0 = arith.constant 0 : i32
    %c0_i32_1 = arith.constant 0 : i32
    return %arg0, %c0_i32, %c0_i32_0 : i32, i32, i32
  }
}

</mosaic_0001>

<bundles_post_ra>
// kernel: _lambda_.1
= control target key start
LH: loop header
LB: loop body
LE: loop exit
PB: predicated region body
PF: predicated region fallthrough
CT: control target
= control target key end

     0   :  { %s4467_s0 = inlined_call_operand.vmem [shape: f32[2,64,4], index: 0, kind: input, shape index: {}]   ;;  %s4468_s1 = inlined_call_operand.vmem [shape: f32[64,1], index: 1, kind: input, shape index: {}]   ;;  %s4469_s2 = inlined_call_operand.vmem [shape: f32[64,1], index: 2, kind: input, shape index: {}]   ;;  %s4470_s3 = inlined_call_operand.vmem [shape: bf16[9,4,32], index: 3, kind: input, shape index: {}]   ;;  %s4471_s4 = inlined_call_operand.vmem [shape: f32[1,32], index: 4, kind: input, shape index: {}]   ;;  %s4472_s5 = inlined_call_operand.vmem [shape: f32[1,32], index: 5, kind: input, shape index: {}]   ;;  %s4473_s6 = inlined_call_operand.vmem [shape: f32[1,32], index: 6, kind: input, shape index: {}]   ;;  %s4474_s7 = inlined_call_operand.vmem [shape: f32[32,2], index: 7, kind: input, shape index: {}]   ;;  %s4475_s8 = inlined_call_operand.vmem [shape: f32[2,32], index: 8, kind: input, shape index: {}]   ;;  %s4476_s9 = inlined_call_operand.vmem [shape: bf16[9,32,32], index: 9, kind: input, shape index: {}]   ;;  %s4477_s10 = inlined_call_operand.vmem [shape: f32[1,32], index: 10, kind: input, shape index: {}]   ;;  %s4478_s11 = inlined_call_operand.vmem [shape: f32[1,32], index: 11, kind: input, shape index: {}]   ;;  %s4479_s12 = inlined_call_operand.vmem [shape: f32[1,32], index: 12, kind: input, shape index: {}]   ;;  %s4480_s13 = inlined_call_operand.hbm [shape: f32[2,64,32], index: 13, kind: output, shape index: {}]  }
   0x1   :  { %4488 = sst [smem:[#allocation16_spill]] %s4467_s0 }
   0x2   :  { %18 = vsyncpa [#allocation6], 0 }
   0x3   :  { %20 = vsyncpa [#allocation6 + $0x1], 0  ;;  %s3286_s25 = smov 0   ;;  %s3288_s26 = smov 0  }
   0x4   :  { %s3290_s27 = smov 0   ;;  %s3292_s28 = smov 0  }
   0x5 LB: > { %4489 = sst [smem:[#allocation8_spill]] %s3206_s27  ;;  %s3307_s29 = sadd.s32 4294967295, %s3210_s28   ;;  %s3210_s28 = sphi %s3292_s28, %s4521_s28   ;;  %s3206_s27 = sphi %s3290_s27, %s4518_s27   ;;  %s3202_s26 = sphi %s3288_s26, %s4520_s26   ;;  %s3198_s25 = sphi %s3286_s25, %s4519_s25  }
   0x6   : > { %s2857_s30 = sadd.s32 4294967294, %s3210_s28   ;;  %s3311_s14 = sadd.s32 1, %s3210_s28  }
   0x7   : > { %s311_s15 = sadd.s32 1, %s3206_s27  ;;  %s308_s16 = ssub.s32 %s3210_s28, %s3311_s14 }
   0x8   : > { %p321_p0 = scmp.ne.s32.totalorder %s3206_s27, %s3202_s26  ;;  %p309_p1 = scmp.eq.s32.totalorder %s308_s16, 0 }
   0x9   : > { %p322_p2 = scmp.eq.s32.totalorder %s3307_s29, 1  ;;  %p327_p3 = scmp.ne.s32.totalorder %s3202_s26, %s3198_s25 }
   0xa   : > { %p328_p4 = scmp.eq.s32.totalorder %s2857_s30, 1  ;;  %p2860_p7 = scmp.ge.s32.totalorder %s3210_s28, 1 }
   0xb   : > { %s3322_s17 = scalar_select %p309_p1, %s3206_s27, %s311_s15  }
   0xc   : > { %p3324_p5 = por %p322_p2, %p321_p0  ;;  %p3328_p6 = por %p328_p4, %p327_p3 }
   0xd   : > { %4490 = sst [smem:[#allocation9_spill]] %s3322_s17  ;;  %p390_p8 = scmp.lt.s32.totalorder %s3210_s28, 3 }
   0xf   : > { %p391_p9 = pnand %p2860_p7, %p390_p8 }
  0x11   : > { %394 = sbr.rel (%p391_p9) target bundleno = 1511 (0x5e7), region = 72 }
  0x16   : > { %v458_v0 = vld [vmem:[%s4469_s2] sm:$0xff]  ;;  %v456_v1 = vld [vmem:[%s4468_s1 + $0x30] sm:$0xff]  ;;  %v3212_v3 = vmov 0   ;;  %v459_v4 = vld [vmem:[%s4469_s2 + $0x8] sm:$0xff]  ;;  %p434_p10 = scmp.lt.s32.totalorder %s3307_s29, 1  ;;  %s4493_s0 = sld [smem:[#allocation16_spill]] }
  0x17   : > { %v450_v2 = vld [vmem:[%s4468_s1] sm:$0xff]  ;;  %3123 = vset.pattern.permute.xlu2 %v3212_v3  ;;  %3122 = vset.pattern.permute.xlu1 %v3212_v3  ;;  %v457_v5 = vld [vmem:[%s4468_s1 + $0x38] sm:$0xff]  ;;  %v451_v6 = vld [vmem:[%s4468_s1 + $0x8] sm:$0xff]  ;;  %vm440_vm0 = vcmask 31744   ;;  %vm569_vm1 = vcmask 1041408   ;;  %v3213_v22 = vmov 0.0  }
  0x18   : > { %3121 = vset.pattern.permute.xlu0 %v3212_v3  ;;  %702 = vperm.xlu2 %3123, %v458_v0   ;;  %v460_v7 = vld [vmem:[%s4469_s2 + $0x10] sm:$0xff]  ;;  %v453_v8 = vld [vmem:[%s4468_s1 + $0x18] sm:$0xff]  ;;  %v455_v10 = vld [vmem:[%s4468_s1 + $0x28] sm:$0xff]  ;;  %s435_s24 = scalar_select %p434_p10, %s3307_s29, 1  ;;  %441 = vst.msk [vmem:[#allocation2] sm:$0xff] %vm440_vm0, %v3213_v22  ;;  %vm445_vm2 = vcmask 261120  }
  0x19   : > { %536 = vperm.xlu1 %3122, %v456_v1   ;;  %506 = vperm.xlu0 %3121, %v450_v2   ;;  %v452_v9 = vld [vmem:[%s4468_s1 + $0x10] sm:$0xff]  ;;  %v454_v11 = vld [vmem:[%s4468_s1 + $0x20] sm:$0xff]  ;;  %v461_v12 = vld [vmem:[%s4469_s2 + $0x18] sm:$0xff]  ;;  %442 = vst.msk [vmem:[#allocation2 + $0x8] sm:$0xff] %vm440_vm0, %v3213_v22  ;;  %s3075_s30 = sshll.u32 %s3307_s29, 6  ;;  %s3168_s16 = scalar_lea.hbm %s4480_s13, 128 }
  0x1a   : > { %v464_v13 = vld [vmem:[%s4469_s2 + $0x30] sm:$0xff]  ;;  %v463_v14 = vld [vmem:[%s4469_s2 + $0x28] sm:$0xff]  ;;  %v462_v15 = vld [vmem:[%s4469_s2 + $0x20] sm:$0xff]  ;;  %s3056_s27 = sshll.u32 %s435_s24, 6  ;;  %446 = vst.msk [vmem:[#allocation3] sm:$0xff] %vm445_vm2, %v3213_v22  ;;  %s2791_s29 = scalar_lea.hbm %s4480_s13, %s3075_s30 }
  0x1b   : > { %v465_v16 = vld [vmem:[%s4469_s2 + $0x38] sm:$0xff]  ;;  %v2873_v21 = vld [vmem:[%s4470_s3 + $0x4] sm:$0x3]  ;;  %447 = vst.msk [vmem:[#allocation3 + $0x8] sm:$0xff] %vm445_vm2, %v3213_v22  ;;  %v556_v29 = vld [vmem:[%s4470_s3] sm:$0x3] }
  0x1c   : > { %s438_s15 = scalar_lea.vmem %s4493_s0, %s3056_s27  ;;  %v767_v23 = vsel %vm569_vm1, %v2873_v21, 0  ;;  %443 = vst.msk [vmem:[#allocation2 + $0x50] sm:$0xff] %vm440_vm0, %v3213_v22  ;;  %v571_v30 = vsel %vm569_vm1, %v556_v29, 0  ;;  %v2883_v35 = vld [vmem:[%s4470_s3 + $0x8] sm:$0x3]  ;;  %s431_s27 = sand.u32 1, %s3202_s26  }
  0x1d   : > { %v480_v17 = vld [vmem:[%s438_s15] sm:$0xff]  ;;  %v481_v18 = vld [vmem:[%s438_s15 + $0x8] sm:$0xff]  ;;  %v482_v19 = vld [vmem:[%s438_s15 + $0x10] sm:$0xff]  ;;  %776 = vmatpush.bf16.msra.mxu2 %v767_v23  ;;  %444 = vst.msk [vmem:[#allocation2 + $0x58] sm:$0xff] %vm440_vm0, %v3213_v22  ;;  %580 = vmatpush.bf16.msra.mxu0 %v571_v30  ;;  %v939_v39 = vsel %vm569_vm1, %v2883_v35, 0  ;;  %s2861_s17 = sshll.u32 %s431_s27, 6 }
  0x1e   : > { %488 = vst.msk [vmem:[#allocation2 + $0x10] sm:$0xff] %vm440_vm0, %v480_v17  ;;  %v483_v20 = vld [vmem:[%s438_s15 + $0x18] sm:$0xff]  ;;  %v484_v24 = vld [vmem:[%s438_s15 + $0x20] sm:$0xff]  ;;  %v485_v25 = vld [vmem:[%s438_s15 + $0x28] sm:$0xff]  ;;  %3076 = vmatpush.bf16.msra.mxu1 %v571_v30  ;;  %s433_s20 = scalar_lea.vmem [#allocation5], %s2861_s17  ;;  %s2794_s22 = sshll.u32 %s2791_s29, 4  ;;  %s2795_s22 = int_to_ptr.hbm [resolvable:$true] %s2794_s22 }
  0x1f   : > { %489 = vst.msk [vmem:[#allocation2 + $0x18] sm:$0xff] %vm440_vm0, %v481_v18  ;;  %v486_v26 = vld [vmem:[%s438_s15 + $0x30] sm:$0xff]  ;;  %v487_v27 = vld [vmem:[%s438_s15 + $0x38] sm:$0xff]  ;;  %v2868_v36 = vld [vmem:[%s4470_s3 + $0x2] sm:$0x3]  ;;  %s2792_s21 = sshll.u32 %s433_s20, 4  ;;  %s2793_s21 = int_to_ptr.vmem [resolvable:$true] %s2792_s21 }
  0x20   : > { %707 = vperm.xlu2 %3123, %v459_v4   ;;  %490 = vst.msk [vmem:[#allocation2 + $0x20] sm:$0xff] %vm440_vm0, %v482_v19  ;;  %v637_v40 = vsel %vm569_vm1, %v2868_v36, 0  ;;  %v2878_v44 = vld [vmem:[%s4470_s3 + $0x6] sm:$0x3]  ;;  %v2888_v60 = vld [vmem:[%s4470_s3 + $0xa] sm:$0x3] }
  0x21   : > { %541 = vperm.xlu1 %3122, %v457_v5   ;;  %511 = vperm.xlu0 %3121, %v451_v6   ;;  %491 = vst.msk [vmem:[#allocation2 + $0x28] sm:$0xff] %vm440_vm0, %v483_v20  ;;  %v857_v45 = vsel %vm569_vm1, %v2878_v44, 0  ;;  %v496_v51 = vld [vmem:[#allocation2 + $0x7] sm:$0xff]  ;;  %v1029_v3 = vsel %vm569_vm1, %v2888_v60, 0  ;;  %v2903_v44 = vld [vmem:[%s4470_s3 + $0x10] sm:$0x3] }
  0x22   : > { %448 = vst.msk [vmem:[#allocation3 + $0x50] sm:$0xff] %vm445_vm2, %v3213_v22  ;;  %948 = vmatpush.bf16.msrb.mxu0 %v939_v39  ;;  %646 = vmatpush.bf16.msrb.mxu1 %v637_v40  ;;  %s2780_s23 = scalar_lea.sflag [#allocation6], %s431_s27  ;;  %s3162_s24 = sshra.s32 %s2795_s22, 4  ;;  %s3163_s24 = int_to_ptr.hbm [resolvable:$true] %s3162_s24 }
  0x23   : > { %449 = vst.msk [vmem:[#allocation3 + $0x58] sm:$0xff] %vm445_vm2, %v3213_v22  ;;  %3077 = vmatpush.bf16.msra.mxu3 %v857_v45  ;;  %866 = vmatpush.bf16.msrb.mxu2 %v857_v45  ;;  %s3164_s17 = scalar_lea.hbm %s3163_s24, 64  ;;  %p3169_p0 = scmp.lt.s32.totalorder %s3163_s24, %s4480_s13 }
  0x24   : > { %492 = vst.msk [vmem:[#allocation2 + $0x30] sm:$0xff] %vm440_vm0, %v484_v24  ;;  %p3165_p11 = scmp.ne.s32.totalorder %s3163_s24, %s3164_s17  ;;  %p3170_p1 = scmp.lt.s32.totalorder %s3168_s16, %s3164_s17 }
  0x25   : > { %493 = vst.msk [vmem:[#allocation2 + $0x38] sm:$0xff] %vm440_vm0, %v485_v25  ;;  %v692_v32 = vld [vmem:[#allocation2 + $0x9] sm:$0xff] }
  0x26   : > { %494 = vst.msk [vmem:[#allocation2 + $0x40] sm:$0xff] %vm440_vm0, %v486_v26  ;;  %v3415_v33 = vld [vmem:[#allocation2 + $0x11] sm:$0xff]  ;;  %p3166_p12 = pnand %p3165_p11, %p3324_p5  ;;  %p3171_p2 = por %p3170_p1, %p3169_p0 }
  0x27   : > { %495 = vst.msk [vmem:[#allocation2 + $0x48] sm:$0xff] %vm440_vm0, %v487_v27  ;;  %v3413_v31 = vld [vmem:[#allocation2 + $0x19] sm:$0xff]  ;;  %v3463_v57 = vld [vmem:[#allocation2 + $0xf] sm:$0xff] }
  0x28   : > { %712 = vperm.xlu2 %3123, %v460_v7   ;;  %v3417_v34 = vld [vmem:[#allocation2 + $0x21] sm:$0xff]  ;;  %v3451_v50 = vld [vmem:[#allocation2 + $0x17] sm:$0xff]  ;;  %p3167_p13 = pneg %p3166_p12 }
  0x29   : > { %521 = vperm.xlu1 %3122, %v453_v8   ;;  %516 = vperm.xlu0 %3121, %v452_v9   ;;  %v1085_v52 = vld [vmem:[#allocation2 + $0x1f] sm:$0xff]  ;;  %v825_v5 = vld [vmem:[#allocation2 + $0x27] sm:$0xff]  ;;  %v3502_v17 = vld [vmem:[#allocation2 + $0x10] sm:$0xff] }
  0x2a   : > { %p3172_p3 = pnand %p3171_p2, %p3167_p13 }
  0x2b   : > { %v3507_v20 = vld [vmem:[#allocation2 + $0x29] sm:$0xff] }
  0x2c   : > { %v3453_v53 = vld [vmem:[#allocation2 + $0x37] sm:$0xff] }
  0x2d   : > { %v3466_v59 = vld [vmem:[#allocation2 + $0x3f] sm:$0xff]  ;;  %v3509_v21 = vld [vmem:[#allocation2 + $0x31] sm:$0xff] }
  0x30   : > { %531 = vperm.xlu2 %3123, %v455_v10  }
  0x31   : > { %526 = vperm.xlu1 %3122, %v454_v11   ;;  %717 = vperm.xlu0 %3121, %v461_v12   ;;  %v826_v11 = vld [vmem:[#allocation2 + $0x2f] sm:$0xff] }
  0x38   : > { %732 = vperm.xlu2 %3123, %v464_v13  }
  0x39   : > { %727 = vperm.xlu1 %3122, %v463_v14   ;;  %722 = vperm.xlu0 %3121, %v462_v15  }
  0x41   : > { %737 = vperm.xlu0 %3121, %v465_v16   ;;  %v610_v16 = vld [vmem:[#allocation2 + $0x8] sm:$0xff] }
  0x42   : > { %v618_v25 = vpack.c.bf16 %v3502_v17, %v610_v16 }
  0x72   : > { %v3407_v28 = vpop.permute.xlu2 %702 }
  0x73   : > { %v3427_v37 = vmul.f32 %v3413_v31, %v3407_v28  ;;  %v740_v38 = vmul.f32 %v3407_v28, %v692_v32 }
  0x7a   : > { %v3432_v41 = vpop.permute.xlu2 %707 }
  0x7b   : > { %v3436_v42 = vmul.f32 %v3417_v34, %v3432_v41  ;;  %v741_v43 = vmul.f32 %v3415_v33, %v3432_v41 }
  0x7d   : > { %v748_v46 = vpack.c.bf16 %v741_v43, %v740_v38  ;;  %v1272_v47 = vpack.c.bf16 %v3436_v42, %v3427_v37  ;;  %v2898_v43 = vld [vmem:[%s4470_s3 + $0xe] sm:$0x3] }
  0x7f   : > { %2874 = vmatmul.msk.bf16.vlgmr.msra.gmra.mxu2 %vm440_vm0, %v748_v46  ;;  %v1201_v46 = vsel %vm569_vm1, %v2898_v43, 0 }
  0x80   : > { %1210 = vmatpush.bf16.msrb.mxu3 %v1201_v46  ;;  %v615_v46 = vld [vmem:[#allocation2 + $0x30] sm:$0xff] }
  0x82   : > { %v3485_v6 = vpop.permute.xlu2 %712 }
  0x83   : > { %v742_v26 = vmul.f32 %v3413_v31, %v3485_v6  ;;  %v3532_v32 = vmul.f32 %v3485_v6, %v3507_v20 }
  0x8a   : > { %v3515_v24 = vpop.permute.xlu2 %531 }
  0x8b   : > { %v3447_v48 = vpop.permute.xlu1 %536  ;;  %v3449_v49 = vpop.permute.xlu0 %506  ;;  %v3528_v30 = vmul.f32 %v3515_v24, %v3466_v59  ;;  %v835_v60 = vmul.f32 %v3515_v24, %v3453_v53 }
  0x8c   : > { %v3457_v54 = vmul.f32 %v3451_v50, %v3449_v49  ;;  %v544_v58 = vmul.f32 %v3449_v49, %v496_v51  ;;  %v550_v63 = vmul.f32 %v3447_v48, %v3453_v53  ;;  %v1291_v51 = vsel %vm569_vm1, %v2903_v44, 0 }
  0x93   : > { %v3459_v55 = vpop.permute.xlu1 %541  ;;  %v3461_v56 = vpop.permute.xlu0 %511 }
  0x94   : > { %v3472_v61 = vmul.f32 %v1085_v52, %v3461_v56  ;;  %v545_v62 = vmul.f32 %v3461_v56, %v3463_v57  ;;  %v551_v0 = vmul.f32 %v3459_v55, %v3466_v59 }
  0x96   : > { %v552_v1 = vpack.c.bf16 %v545_v62, %v544_v58  ;;  %v555_v2 = vpack.c.bf16 %v551_v0, %v550_v63  ;;  %v1100_v4 = vpack.c.bf16 %v3472_v61, %v3457_v54  ;;  %v3560_v62 = vld [vmem:[#allocation2 + $0x39] sm:$0xff]  ;;  %v3562_v63 = vld [vmem:[#allocation2 + $0x41] sm:$0xff]  ;;  %v1181_v54 = vld [vmem:[#allocation2 + $0x50] sm:$0xff] }
  0x98   : > { %2864 = vmatmul.msk.bf16.vlgmr.msra.gmra.mxu0 %vm440_vm0, %v552_v1  ;;  %2867 = vmatmul.msk.bf16.vlgmr.msra.gmra.mxu1 %vm440_vm0, %v555_v2 }
  0x99   : > { %1038 = vmatpush.bf16.msra.mxu1 %v1029_v3  ;;  %1300 = vmatpush.bf16.msra.mxu0 %v1291_v51  ;;  %v3597_v51 = vpop.permute.xlu2 %732 }
  0x9b   : > { %v3487_v7 = vpop.permute.xlu1 %521  ;;  %v3489_v8 = vpop.permute.xlu0 %516 }
  0x9c   : > { %v832_v9 = vmul.f32 %v1085_v52, %v3489_v8  ;;  %v833_v10 = vmul.f32 %v825_v5, %v3487_v7  ;;  %v3494_v12 = vmul.f32 %v825_v5, %v3489_v8  ;;  %v3497_v13 = vmul.f32 %v826_v11, %v3487_v7 }
  0x9d   : > { %v546_v18 = vmul.f32 %v3451_v50, %v3489_v8  ;;  %v547_v19 = vmul.f32 %v1085_v52, %v3487_v7 }
  0x9e   : > { %v839_v14 = vpack.c.bf16 %v833_v10, %v832_v9  ;;  %v1101_v15 = vpack.c.bf16 %v3497_v13, %v3494_v12  ;;  %v612_v9 = vld [vmem:[#allocation2 + $0x18] sm:$0xff]  ;;  %v1091_v12 = vld [vmem:[#allocation2 + $0x4f] sm:$0xff] }
  0x9f   : > { %v553_v36 = vpack.c.bf16 %v547_v19, %v546_v18  ;;  %v549_v18 = vmul.f32 %v826_v11, %v3515_v24  ;;  %v1001_v13 = vld [vmem:[#allocation2 + $0x49] sm:$0xff] }
  0xa0   : > { %2880 = vmatmul.msk.bf16.vlgmr.msra.gmra.mxu3 %vm440_vm0, %v839_v14 }
  0xa3   : > { %v3511_v22 = vpop.permute.xlu1 %526  ;;  %v3513_v23 = vpop.permute.xlu0 %717 }
  0xa4   : > { %v743_v27 = vmul.f32 %v3417_v34, %v3513_v23  ;;  %v3524_v29 = vmul.f32 %v3511_v22, %v3453_v53  ;;  %v3536_v35 = vmul.f32 %v3513_v23, %v3509_v21  ;;  %v834_v45 = vmul.f32 %v826_v11, %v3511_v22  ;;  %v613_v53 = vld [vmem:[#allocation2 + $0x20] sm:$0xff] }
  0xa5   : > { %v548_v10 = vmul.f32 %v825_v5, %v3511_v22  ;;  %v619_v19 = vpack.c.bf16 %v613_v53, %v612_v9  ;;  %v2893_v5 = vld [vmem:[%s4470_s3 + $0xc] sm:$0x3] }
  0xa6   : > { %v749_v38 = vpack.c.bf16 %v743_v27, %v742_v26  ;;  %v1102_v39 = vpack.c.bf16 %v3528_v30, %v3524_v29  ;;  %v1273_v40 = vpack.c.bf16 %v3536_v35, %v3532_v32  ;;  %v840_v2 = vpack.c.bf16 %v835_v60, %v834_v45  ;;  %v3584_v27 = vld [vmem:[#allocation2 + $0x47] sm:$0xff] }
  0xa7   : > { %v1119_v11 = vsel %vm569_vm1, %v2893_v5, 0  ;;  %v614_v45 = vld [vmem:[#allocation2 + $0x28] sm:$0xff]  ;;  %v1098_v37 = vmul.f32 %v3584_v27, %v3447_v48 }
  0xa8   : > { %2865 = vmatmul.msk.bf16.gmra.mxu0 %vm440_vm0, %v553_v36  ;;  %2869 = vmatmul.msk.bf16.vlgmr.msrb.gmra.mxu1 %vm440_vm0, %v618_v25  ;;  %v554_v25 = vpack.c.bf16 %v549_v18, %v548_v10  ;;  %v837_v36 = vmul.f32 %v3584_v27, %v3459_v55  ;;  %v920_v10 = vpack.c.bf16 %v612_v9, %v3502_v17  ;;  %v617_v18 = vld [vmem:[#allocation2 + $0x40] sm:$0xff] }
  0xa9   : > { %2875 = vmatmul.msk.bf16.gmra.mxu2 %vm440_vm0, %v749_v38  ;;  %v836_v38 = vmul.f32 %v3447_v48, %v3466_v59  ;;  %v616_v59 = vld [vmem:[#allocation2 + $0x38] sm:$0xff]  ;;  %v921_v5 = vpack.c.bf16 %v614_v45, %v613_v53  ;;  %v830_v17 = vmul.f32 %v3449_v49, %v3463_v57  ;;  %v919_v57 = vld [vmem:[#allocation2 + $0x48] sm:$0xff] }
  0xaa   : > { %1128 = vmatpush.bf16.msra.mxu2 %v1119_v11  ;;  %v923_v11 = vpack.c.bf16 %v919_v57, %v617_v18  ;;  %v1185_v61 = vpack.c.bf16 %v1181_v54, %v919_v57 }
  0xab   : > { %v3554_v52 = vpop.permute.xlu1 %727  ;;  %v3556_v58 = vpop.permute.xlu0 %722  ;;  %v841_v43 = vpack.c.bf16 %v837_v36, %v836_v38  ;;  %v922_v36 = vpack.c.bf16 %v616_v59, %v615_v46 }
  0xac   : > { %v3566_v0 = vmul.f32 %v3556_v58, %v3560_v62  ;;  %v3570_v1 = vmul.f32 %v3554_v52, %v3562_v63  ;;  %v744_v14 = vmul.f32 %v3556_v58, %v3507_v20  ;;  %v745_v16 = vmul.f32 %v3554_v52, %v3509_v21 }
  0xae   : > { %v1274_v3 = vpack.c.bf16 %v3570_v1, %v3566_v0  ;;  %v750_v26 = vpack.c.bf16 %v745_v16, %v744_v14  ;;  %v746_v14 = vmul.f32 %v3597_v51, %v3560_v62  ;;  %v1270_v1 = vmul.f32 %v1001_v13, %v3597_v51 }
  0xb0   : > { %2881 = vmatmul.msk.bf16.gmra.mxu3 %vm440_vm0, %v840_v2  ;;  %v620_v2 = vpack.c.bf16 %v615_v46, %v614_v45 }
  0xb3   : > { %v3594_v44 = vpop.permute.xlu0 %737 }
  0xb4   : > { %v747_v60 = vmul.f32 %v3594_v44, %v3562_v63 }
  0xb6   : > { %v751_v16 = vpack.c.bf16 %v747_v60, %v746_v14 }
  0xb8   : > { %2866 = vmatmul.msk.bf16.gmra.mxu0 %vm440_vm0, %v554_v25  ;;  %2870 = vmatmul.msk.bf16.gmra.mxu1 %vm440_vm0, %v619_v19  ;;  %v831_v25 = vmul.f32 %v3451_v50, %v3461_v56  ;;  %v1003_v50 = vmul.f32 %v3413_v31, %v3432_v41  ;;  %v1004_v31 = vmul.f32 %v3417_v34, %v3485_v6 }
  0xb9   : > { %2876 = vmatmul.msk.bf16.gmra.mxu2 %vm440_vm0, %v750_v26  ;;  %v621_v26 = vpack.c.bf16 %v617_v18, %v616_v59  ;;  %v1007_v34 = vmul.f32 %v3554_v52, %v3560_v62  ;;  %v1008_v62 = vmul.f32 %v3597_v51, %v3562_v63 }
  0xba   : > { %v838_v9 = vpack.c.bf16 %v831_v25, %v830_v17 }
  0xc0   : > { %2882 = vmatmul.msk.bf16.gmra.mxu3 %vm440_vm0, %v841_v43 }
  0xc8   : > { %2871 = vmatmul.msk.bf16.gmra.mxu1 %vm440_vm0, %v620_v2  ;;  %2884 = vmatmul.msk.bf16.vlgmr.msrb.gmra.mxu0 %vm440_vm0, %v920_v10 }
  0xc9   : > { %2877 = vmatmul.msk.bf16.gmra.mxu2 %vm440_vm0, %v751_v16  ;;  %v1263_v16 = vld [vmem:[#allocation2 + $0x51] sm:$0xff] }
  0xd0   : > { %2899 = vmatmul.msk.bf16.vlgmr.msrb.gmra.mxu3 %vm440_vm0, %v619_v19  ;;  %v1002_v19 = vmul.f32 %v3415_v33, %v3407_v28  ;;  %v1005_v33 = vmul.f32 %v3513_v23, %v3507_v20 }
  0xd2   : > { %v1010_v53 = vpack.c.bf16 %v1003_v50, %v1002_v19  ;;  %v1011_v38 = vpack.c.bf16 %v1005_v33, %v1004_v31 }
  0xd8   : > { %2872 = vmatmul.msk.bf16.gmra.mxu1 %vm440_vm0, %v621_v26  ;;  %2885 = vmatmul.msk.bf16.gmra.mxu0 %vm440_vm0, %v921_v5 }
  0xd9   : > { %2879 = vmatmul.msk.bf16.vlgmr.msrb.gmra.mxu2 %vm440_vm0, %v838_v9 }
  0xe0   : > { %2900 = vmatmul.msk.bf16.gmra.mxu3 %vm440_vm0, %v620_v2 }
  0xe8   : > { %2886 = vmatmul.msk.bf16.gmra.mxu0 %vm440_vm0, %v922_v36  ;;  %2889 = vmatmul.msk.bf16.vlgmr.msra.gmra.mxu1 %vm440_vm0, %v1010_v53 }
  0xe9   : > { %2894 = vmatmul.msk.bf16.vlgmr.msra.gmra.mxu2 %vm440_vm0, %v1100_v4  ;;  %v1006_v4 = vmul.f32 %v3556_v58, %v3509_v21  ;;  %v1099_v21 = vmul.f32 %v1091_v12, %v3459_v55 }
  0xeb   : > { %v1012_v20 = vpack.c.bf16 %v1007_v34, %v1006_v4 }
  0xf0   : > { %2901 = vmatmul.msk.bf16.gmra.mxu3 %vm440_vm0, %v621_v26  ;;  %v1271_v26 = vmul.f32 %v1263_v16, %v3594_v44 }
  0xf2   : > { %v1275_v19 = vpack.c.bf16 %v1271_v26, %v1270_v1 }
  0xf8   : > { %2887 = vmatmul.msk.bf16.gmra.mxu0 %vm440_vm0, %v923_v11  ;;  %2890 = vmatmul.msk.bf16.gmra.mxu1 %vm440_vm0, %v1011_v38 }
  0xf9   : > { %2895 = vmatmul.msk.bf16.gmra.mxu2 %vm440_vm0, %v1101_v15  ;;  %v1009_v15 = vmul.f32 %v1001_v13, %v3594_v44 }
  0xfb   : > { %v1013_v42 = vpack.c.bf16 %v1009_v15, %v1008_v62 }
 0x100   : > { %2902 = vmatmul.msk.bf16.gmra.mxu3 %vm440_vm0, %v1185_v61 }
 0x102   : > { %v778_v29 = vpop.f32.mrf.mxu2 }
 0x108   : > { %2891 = vmatmul.msk.bf16.gmra.mxu1 %vm440_vm0, %v1012_v20  ;;  %2904 = vmatmul.msk.bf16.vlgmr.msra.gmra.mxu0 %vm440_vm0, %v1272_v47  ;;  %v1103_v47 = vpack.c.bf16 %v1099_v21, %v1098_v37 }
 0x109   : > { %2896 = vmatmul.msk.bf16.gmra.mxu2 %vm440_vm0, %v1102_v39 }
 0x10a   : > { %v780_v63 = vpop.f32.mrf.mxu2 }
 0x115   : > { %v582_v43 = vpop.f32.mrf.mxu0  ;;  %v597_v45 = vpop.f32.mrf.mxu1 }
 0x116   : > { %602 = vst.msk [vmem:[#allocation4] sm:$0xff] %vm445_vm2, %v582_v43 }
 0x117   : > { %608 = vst.msk [vmem:[#allocation4 + $0x30] sm:$0xff] %vm445_vm2, %v597_v45 }
 0x118   : > { %2892 = vmatmul.msk.bf16.gmra.mxu1 %vm440_vm0, %v1013_v42  ;;  %2905 = vmatmul.msk.bf16.gmra.mxu0 %vm440_vm0, %v1273_v40 }
 0x119   : > { %2897 = vmatmul.msk.bf16.gmra.mxu2 %vm440_vm0, %v1103_v47 }
 0x11d   : > { %v584_v30 = vpop.f32.mrf.mxu0  ;;  %v599_v39 = vpop.f32.mrf.mxu1  ;;  %v668_v60 = vld [vmem:[#allocation4] sm:$0xff] }
 0x11e   : > { %603 = vst.msk [vmem:[#allocation4 + $0x8] sm:$0xff] %vm445_vm2, %v584_v30 }
 0x11f   : > { %609 = vst.msk [vmem:[#allocation4 + $0x38] sm:$0xff] %vm445_vm2, %v599_v39 }
 0x123   : > { %v873_v18 = vpop.f32.mrf.mxu3 }
 0x125   : > { %v587_v27 = vpop.f32.mrf.mxu0  ;;  %v648_v46 = vpop.f32.mrf.mxu1  ;;  %v669_v10 = vld [vmem:[#allocation4 + $0x8] sm:$0xff] }
 0x126   : > { %604 = vst.msk [vmem:[#allocation4 + $0x10] sm:$0xff] %vm445_vm2, %v587_v27  ;;  %v676_v2 = vadd.f32 %v668_v60, %v648_v46 }
 0x128   : > { %684 = vst.msk [vmem:[#allocation4] sm:$0xff] %vm445_vm2, %v676_v2  ;;  %2906 = vmatmul.msk.bf16.gmra.mxu0 %vm440_vm0, %v1274_v3 }
 0x12b   : > { %v875_v53 = vpop.f32.mrf.mxu3 }
 0x12c   : > { %v783_v32 = vpop.f32.mrf.mxu2 }
 0x12d   : > { %v589_v35 = vpop.f32.mrf.mxu0  ;;  %v650_v40 = vpop.f32.mrf.mxu1  ;;  %v670_v17 = vld [vmem:[#allocation4 + $0x10] sm:$0xff] }
 0x12e   : > { %605 = vst.msk [vmem:[#allocation4 + $0x18] sm:$0xff] %vm445_vm2, %v589_v35  ;;  %v677_v14 = vadd.f32 %v669_v10, %v650_v40  ;;  %v674_v35 = vld [vmem:[#allocation4 + $0x30] sm:$0xff] }
 0x12f   : > { %v798_v59 = vld [vmem:[#allocation4] sm:$0xff] }
 0x130   : > { %685 = vst.msk [vmem:[#allocation4 + $0x8] sm:$0xff] %vm445_vm2, %v677_v14  ;;  %v806_v25 = vadd.f32 %v798_v59, %v778_v29 }
 0x132   : > { %814 = vst.msk [vmem:[#allocation4] sm:$0xff] %vm445_vm2, %v806_v25 }
 0x133   : > { %v878_v4 = vpop.f32.mrf.mxu3 }
 0x134   : > { %v785_v0 = vpop.f32.mrf.mxu2 }
 0x135   : > { %v592_v3 = vpop.f32.mrf.mxu0  ;;  %v653_v5 = vpop.f32.mrf.mxu1  ;;  %v671_v31 = vld [vmem:[#allocation4 + $0x18] sm:$0xff] }
 0x136   : > { %606 = vst.msk [vmem:[#allocation4 + $0x20] sm:$0xff] %vm445_vm2, %v592_v3  ;;  %v678_v9 = vadd.f32 %v670_v17, %v653_v5 }
 0x137   : > { %v799_v50 = vld [vmem:[#allocation4 + $0x8] sm:$0xff] }
 0x138   : > { %686 = vst.msk [vmem:[#allocation4 + $0x10] sm:$0xff] %vm445_vm2, %v678_v9  ;;  %2907 = vmatmul.msk.bf16.gmra.mxu0 %vm440_vm0, %v1275_v19  ;;  %v807_v36 = vadd.f32 %v799_v50, %v780_v63  ;;  %v675_v9 = vld [vmem:[#allocation4 + $0x38] sm:$0xff] }
 0x139   : > { %v888_v3 = vld [vmem:[#allocation4] sm:$0xff] }
 0x13a   : > { %815 = vst.msk [vmem:[#allocation4 + $0x8] sm:$0xff] %vm445_vm2, %v807_v36 }
 0x13b   : > { %v880_v30 = vpop.f32.mrf.mxu3 }
 0x13c   : > { %v788_v57 = vpop.f32.mrf.mxu2 }
 0x13d   : > { %v594_v33 = vpop.f32.mrf.mxu0  ;;  %v655_v11 = vpop.f32.mrf.mxu1  ;;  %v672_v12 = vld [vmem:[#allocation4 + $0x20] sm:$0xff] }
 0x13e   : > { %607 = vst.msk [vmem:[#allocation4 + $0x28] sm:$0xff] %vm445_vm2, %v594_v33  ;;  %v679_v38 = vadd.f32 %v671_v31, %v655_v11 }
 0x13f   : > { %v800_v54 = vld [vmem:[#allocation4 + $0x10] sm:$0xff] }
 0x140   : > { %v808_v61 = vadd.f32 %v800_v54, %v783_v32  ;;  %687 = vst.msk [vmem:[#allocation4 + $0x18] sm:$0xff] %vm445_vm2, %v679_v38 }
 0x142   : > { %816 = vst.msk [vmem:[#allocation4 + $0x10] sm:$0xff] %vm445_vm2, %v808_v61  ;;  %v889_v61 = vld [vmem:[#allocation4 + $0x8] sm:$0xff] }
 0x144   : > { %v790_v34 = vpop.f32.mrf.mxu2 }
 0x145   : > { %v658_v20 = vpop.f32.mrf.mxu1  ;;  %v3685_v13 = vpop.f32.mrf.mxu0  ;;  %v673_v47 = vld [vmem:[#allocation4 + $0x28] sm:$0xff] }
 0x146   : > { %v680_v15 = vadd.f32 %v672_v12, %v658_v20 }
 0x147   : > { %v801_v21 = vld [vmem:[#allocation4 + $0x18] sm:$0xff] }
 0x148   : > { %v809_v62 = vadd.f32 %v801_v21, %v785_v0  ;;  %688 = vst.msk [vmem:[#allocation4 + $0x20] sm:$0xff] %vm445_vm2, %v680_v15 }
 0x149   : > { %v890_v43 = vld [vmem:[#allocation4 + $0x10] sm:$0xff] }
 0x14a   : > { %817 = vst.msk [vmem:[#allocation4 + $0x18] sm:$0xff] %vm445_vm2, %v809_v62  ;;  %v898_v45 = vadd.f32 %v890_v43, %v873_v18  ;;  %v883_v18 = vpop.f32.mrf.mxu3 }
 0x14c   : > { %v793_v37 = vpop.f32.mrf.mxu2  ;;  %906 = vst.msk [vmem:[#allocation4 + $0x10] sm:$0xff] %vm445_vm2, %v898_v45 }
 0x14d   : > { %v660_v42 = vpop.f32.mrf.mxu1  ;;  %v3690_v29 = vpop.f32.mrf.mxu0 }
 0x14e   : > { %v681_v39 = vadd.f32 %v673_v47, %v660_v42 }
 0x14f   : > { %v802_v63 = vld [vmem:[#allocation4 + $0x20] sm:$0xff] }
 0x150   : > { %v810_v27 = vadd.f32 %v802_v63, %v788_v57  ;;  %689 = vst.msk [vmem:[#allocation4 + $0x28] sm:$0xff] %vm445_vm2, %v681_v39 }
 0x151   : > { %v891_v46 = vld [vmem:[#allocation4 + $0x18] sm:$0xff] }
 0x152   : > { %818 = vst.msk [vmem:[#allocation4 + $0x20] sm:$0xff] %vm445_vm2, %v810_v27  ;;  %v899_v60 = vadd.f32 %v891_v46, %v875_v53  ;;  %v885_v31 = vpop.f32.mrf.mxu3 }
 0x153   : > { %v972_v10 = vld [vmem:[#allocation4 + $0x10] sm:$0xff] }
 0x154   : > { %v795_v2 = vpop.f32.mrf.mxu2  ;;  %907 = vst.msk [vmem:[#allocation4 + $0x18] sm:$0xff] %vm445_vm2, %v899_v60 }
 0x155   : > { %v663_v32 = vpop.f32.mrf.mxu1  ;;  %v955_v40 = vpop.f32.mrf.mxu0 }
 0x156   : > { %v682_v14 = vadd.f32 %v674_v35, %v663_v32  ;;  %v980_v16 = vadd.f32 %v972_v10, %v955_v40 }
 0x157   : > { %v803_v59 = vld [vmem:[#allocation4 + $0x28] sm:$0xff] }
 0x158   : > { %v811_v25 = vadd.f32 %v803_v59, %v790_v34  ;;  %690 = vst.msk [vmem:[#allocation4 + $0x30] sm:$0xff] %vm445_vm2, %v682_v14 }
 0x159   : > { %988 = vst.msk [vmem:[#allocation4 + $0x10] sm:$0xff] %vm445_vm2, %v980_v16  ;;  %v892_v26 = vld [vmem:[#allocation4 + $0x20] sm:$0xff] }
 0x15a   : > { %819 = vst.msk [vmem:[#allocation4 + $0x28] sm:$0xff] %vm445_vm2, %v811_v25  ;;  %v900_v0 = vadd.f32 %v892_v26, %v878_v4  ;;  %v1212_v42 = vpop.f32.mrf.mxu3 }
 0x15b   : > { %v973_v50 = vld [vmem:[#allocation4 + $0x18] sm:$0xff] }
 0x15c   : > { %v868_v1 = vpop.f32.mrf.mxu2  ;;  %908 = vst.msk [vmem:[#allocation4 + $0x20] sm:$0xff] %vm445_vm2, %v900_v0 }
 0x15d   : > { %v896_v5 = vadd.f32 %v888_v3, %v868_v1  ;;  %v665_v17 = vpop.f32.mrf.mxu1  ;;  %v957_v19 = vpop.f32.mrf.mxu0 }
 0x15e   : > { %v683_v36 = vadd.f32 %v675_v9, %v665_v17  ;;  %v981_v53 = vadd.f32 %v973_v50, %v957_v19 }
 0x15f   : > { %v804_v57 = vld [vmem:[#allocation4 + $0x30] sm:$0xff]  ;;  %904 = vst.msk [vmem:[#allocation4] sm:$0xff] %vm445_vm2, %v896_v5 }
 0x160   : > { %v812_v33 = vadd.f32 %v804_v57, %v793_v37  ;;  %691 = vst.msk [vmem:[#allocation4 + $0x38] sm:$0xff] %vm445_vm2, %v683_v36  ;;  %v1062_v25 = vld [vmem:[#allocation4 + $0x10] sm:$0xff] }
 0x161   : > { %989 = vst.msk [vmem:[#allocation4 + $0x18] sm:$0xff] %vm445_vm2, %v981_v53  ;;  %v893_v11 = vld [vmem:[#allocation4 + $0x28] sm:$0xff] }
 0x162   : > { %820 = vst.msk [vmem:[#allocation4 + $0x30] sm:$0xff] %vm445_vm2, %v812_v33  ;;  %v901_v38 = vadd.f32 %v893_v11, %v880_v30  ;;  %v1214_v14 = vpop.f32.mrf.mxu3 }
 0x163   : > { %v974_v20 = vld [vmem:[#allocation4 + $0x20] sm:$0xff] }
 0x164   : > { %v870_v54 = vpop.f32.mrf.mxu2  ;;  %909 = vst.msk [vmem:[#allocation4 + $0x28] sm:$0xff] %vm445_vm2, %v901_v38 }
 0x165   : > { %v897_v4 = vadd.f32 %v889_v61, %v870_v54  ;;  %v960_v34 = vpop.f32.mrf.mxu0  ;;  %v1040_v12 = vpop.f32.mrf.mxu1 }
 0x166   : > { %v982_v15 = vadd.f32 %v974_v20, %v960_v34  ;;  %v970_v21 = vld [vmem:[#allocation4] sm:$0xff] }
 0x167   : > { %v805_v62 = vld [vmem:[#allocation4 + $0x38] sm:$0xff]  ;;  %905 = vst.msk [vmem:[#allocation4 + $0x8] sm:$0xff] %vm445_vm2, %v897_v4  ;;  %v978_v43 = vadd.f32 %v970_v21, %v3685_v13 }
 0x168   : > { %v813_v45 = vadd.f32 %v805_v62, %v795_v2  ;;  %990 = vst.msk [vmem:[#allocation4 + $0x20] sm:$0xff] %vm445_vm2, %v982_v15  ;;  %v1063_v36 = vld [vmem:[#allocation4 + $0x18] sm:$0xff] }
 0x169   : > { %986 = vst.msk [vmem:[#allocation4] sm:$0xff] %vm445_vm2, %v978_v43  ;;  %v894_v37 = vld [vmem:[#allocation4 + $0x30] sm:$0xff] }
 0x16a   : > { %821 = vst.msk [vmem:[#allocation4 + $0x38] sm:$0xff] %vm445_vm2, %v813_v45  ;;  %v902_v47 = vadd.f32 %v894_v37, %v883_v18  ;;  %v1217_v33 = vpop.f32.mrf.mxu3 }
 0x16b   : > { %v975_v63 = vld [vmem:[#allocation4 + $0x28] sm:$0xff] }
 0x16c   : > { %v1130_v30 = vpop.f32.mrf.mxu2  ;;  %910 = vst.msk [vmem:[#allocation4 + $0x30] sm:$0xff] %vm445_vm2, %v902_v47 }
 0x16d   : > { %v962_v39 = vpop.f32.mrf.mxu0  ;;  %v1042_v27 = vpop.f32.mrf.mxu1 }
 0x16e   : > { %v983_v46 = vadd.f32 %v975_v63, %v962_v39  ;;  %v971_v60 = vld [vmem:[#allocation4 + $0x8] sm:$0xff] }
 0x16f   : > { %v979_v13 = vadd.f32 %v971_v60, %v3690_v29 }
 0x170   : > { %v1060_v2 = vld [vmem:[#allocation4] sm:$0xff]  ;;  %991 = vst.msk [vmem:[#allocation4 + $0x28] sm:$0xff] %vm445_vm2, %v983_v46 }
 0x171   : > { %v1068_v32 = vadd.f32 %v1060_v2, %v1040_v12  ;;  %987 = vst.msk [vmem:[#allocation4 + $0x8] sm:$0xff] %vm445_vm2, %v979_v13  ;;  %v895_v35 = vld [vmem:[#allocation4 + $0x38] sm:$0xff]  ;;  %v1064_v12 = vld [vmem:[#allocation4 + $0x20] sm:$0xff] }
 0x172   : > { %v903_v40 = vadd.f32 %v895_v35, %v885_v31  ;;  %v1219_v43 = vpop.f32.mrf.mxu3 }
 0x173   : > { %1076 = vst.msk [vmem:[#allocation4] sm:$0xff] %vm445_vm2, %v1068_v32  ;;  %v976_v59 = vld [vmem:[#allocation4 + $0x30] sm:$0xff] }
 0x174   : > { %v1132_v10 = vpop.f32.mrf.mxu2  ;;  %911 = vst.msk [vmem:[#allocation4 + $0x38] sm:$0xff] %vm445_vm2, %v903_v40 }
 0x175   : > { %v965_v16 = vpop.f32.mrf.mxu0  ;;  %v1045_v18 = vpop.f32.mrf.mxu1 }
 0x176   : > { %v984_v26 = vadd.f32 %v976_v59, %v965_v16  ;;  %v1070_v29 = vadd.f32 %v1062_v25, %v1045_v18 }
 0x178   : > { %v1061_v0 = vld [vmem:[#allocation4 + $0x8] sm:$0xff]  ;;  %992 = vst.msk [vmem:[#allocation4 + $0x30] sm:$0xff] %vm445_vm2, %v984_v26 }
 0x179   : > { %v1069_v1 = vadd.f32 %v1061_v0, %v1042_v27  ;;  %1078 = vst.msk [vmem:[#allocation4 + $0x10] sm:$0xff] %vm445_vm2, %v1070_v29  ;;  %v1065_v27 = vld [vmem:[#allocation4 + $0x28] sm:$0xff] }
 0x17a   : > { %v1150_v3 = vld [vmem:[#allocation4] sm:$0xff] }
 0x17b   : > { %v1158_v5 = vadd.f32 %v1150_v3, %v1130_v30  ;;  %1077 = vst.msk [vmem:[#allocation4 + $0x8] sm:$0xff] %vm445_vm2, %v1069_v1  ;;  %v977_v19 = vld [vmem:[#allocation4 + $0x38] sm:$0xff] }
 0x17c   : > { %v1135_v17 = vpop.f32.mrf.mxu2 }
 0x17d   : > { %1166 = vst.msk [vmem:[#allocation4] sm:$0xff] %vm445_vm2, %v1158_v5  ;;  %v967_v9 = vpop.f32.mrf.mxu0  ;;  %v1047_v50 = vpop.f32.mrf.mxu1 }
 0x17e   : > { %v985_v53 = vadd.f32 %v977_v19, %v967_v9  ;;  %v1071_v57 = vadd.f32 %v1063_v36, %v1047_v50 }
 0x17f   : > { %v1066_v18 = vld [vmem:[#allocation4 + $0x30] sm:$0xff] }
 0x180   : > { %v1152_v11 = vld [vmem:[#allocation4 + $0x10] sm:$0xff]  ;;  %993 = vst.msk [vmem:[#allocation4 + $0x38] sm:$0xff] %vm445_vm2, %v985_v53 }
 0x181   : > { %v1160_v31 = vadd.f32 %v1152_v11, %v1135_v17  ;;  %1079 = vst.msk [vmem:[#allocation4 + $0x18] sm:$0xff] %vm445_vm2, %v1071_v57 }
 0x182   : > { %v1151_v38 = vld [vmem:[#allocation4 + $0x8] sm:$0xff] }
 0x183   : > { %v1159_v54 = vadd.f32 %v1151_v38, %v1132_v10  ;;  %1168 = vst.msk [vmem:[#allocation4 + $0x10] sm:$0xff] %vm445_vm2, %v1160_v31  ;;  %v1222_v10 = vpop.f32.mrf.mxu3 }
 0x184   : > { %v1232_v61 = vld [vmem:[#allocation4] sm:$0xff]  ;;  %v1137_v4 = vpop.f32.mrf.mxu2 }
 0x185   : > { %1167 = vst.msk [vmem:[#allocation4 + $0x8] sm:$0xff] %vm445_vm2, %v1159_v54  ;;  %v1240_v34 = vadd.f32 %v1232_v61, %v1212_v42  ;;  %v1050_v20 = vpop.f32.mrf.mxu1  ;;  %v1302_v15 = vpop.f32.mrf.mxu0 }
 0x186   : > { %v1072_v21 = vadd.f32 %v1064_v12, %v1050_v20 }
 0x187   : > { %1248 = vst.msk [vmem:[#allocation4] sm:$0xff] %vm445_vm2, %v1240_v34  ;;  %v1067_v57 = vld [vmem:[#allocation4 + $0x38] sm:$0xff] }
 0x188   : > { %v1153_v62 = vld [vmem:[#allocation4 + $0x18] sm:$0xff]  ;;  %1080 = vst.msk [vmem:[#allocation4 + $0x20] sm:$0xff] %vm445_vm2, %v1072_v21 }
 0x189   : > { %v1161_v45 = vadd.f32 %v1153_v62, %v1137_v4 }
 0x18a   : > { %v1234_v37 = vld [vmem:[#allocation4 + $0x10] sm:$0xff] }
 0x18b   : > { %1169 = vst.msk [vmem:[#allocation4 + $0x18] sm:$0xff] %vm445_vm2, %v1161_v45  ;;  %v1242_v47 = vadd.f32 %v1234_v37, %v1217_v33  ;;  %v1224_v36 = vpop.f32.mrf.mxu3 }
 0x18c   : > { %v1233_v30 = vld [vmem:[#allocation4 + $0x8] sm:$0xff]  ;;  %v1140_v39 = vpop.f32.mrf.mxu2 }
 0x18d   : > { %v1241_v63 = vadd.f32 %v1233_v30, %v1214_v14  ;;  %1250 = vst.msk [vmem:[#allocation4 + $0x10] sm:$0xff] %vm445_vm2, %v1242_v47  ;;  %v1052_v42 = vpop.f32.mrf.mxu1  ;;  %v1304_v46 = vpop.f32.mrf.mxu0 }
 0x18e   : > { %v1322_v60 = vld [vmem:[#allocation4] sm:$0xff]  ;;  %v1073_v13 = vadd.f32 %v1065_v27, %v1052_v42 }
 0x18f   : > { %1249 = vst.msk [vmem:[#allocation4 + $0x8] sm:$0xff] %vm445_vm2, %v1241_v63  ;;  %v1330_v2 = vadd.f32 %v1322_v60, %v1302_v15  ;;  %v1154_v32 = vld [vmem:[#allocation4 + $0x20] sm:$0xff] }
 0x190   : > { %v1162_v35 = vadd.f32 %v1154_v32, %v1140_v39  ;;  %1081 = vst.msk [vmem:[#allocation4 + $0x28] sm:$0xff] %vm445_vm2, %v1073_v13  ;;  %v3124_v60 = vld [vmem:[%s4471_s4] ss:$0 sm:$0xff] }
 0x191   : > { %1338 = vst.msk [vmem:[#allocation4] sm:$0xff] %vm445_vm2, %v1330_v2 }
 0x192   : > { %1170 = vst.msk [vmem:[#allocation4 + $0x20] sm:$0xff] %vm445_vm2, %v1162_v35  ;;  %v1235_v40 = vld [vmem:[#allocation4 + $0x18] sm:$0xff] }
 0x193   : > { %v1243_v14 = vadd.f32 %v1235_v40, %v1219_v43  ;;  %v1227_v43 = vpop.f32.mrf.mxu3 }
 0x194   : > { %v1142_v16 = vpop.f32.mrf.mxu2  ;;  %v1324_v0 = vld [vmem:[#allocation4 + $0x10] sm:$0xff] }
 0x195   : > { %1251 = vst.msk [vmem:[#allocation4 + $0x18] sm:$0xff] %vm445_vm2, %v1243_v14  ;;  %v1055_v59 = vpop.f32.mrf.mxu1  ;;  %v1307_v25 = vpop.f32.mrf.mxu0 }
 0x196   : > { %v1323_v26 = vld [vmem:[#allocation4 + $0x8] sm:$0xff]  ;;  %v1074_v29 = vadd.f32 %v1066_v18, %v1055_v59  ;;  %v1332_v5 = vadd.f32 %v1324_v0, %v1307_v25 }
 0x197   : > { %v1331_v1 = vadd.f32 %v1323_v26, %v1304_v46  ;;  %v1155_v3 = vld [vmem:[#allocation4 + $0x28] sm:$0xff] }
 0x198   : > { %v1163_v17 = vadd.f32 %v1155_v3, %v1142_v16  ;;  %1082 = vst.msk [vmem:[#allocation4 + $0x30] sm:$0xff] %vm445_vm2, %v1074_v29  ;;  %v1346_v2 = vld [vmem:[#allocation4] sm:$0xff] }
 0x199   : > { %1339 = vst.msk [vmem:[#allocation4 + $0x8] sm:$0xff] %vm445_vm2, %v1331_v1  ;;  %v1236_v9 = vld [vmem:[#allocation4 + $0x20] sm:$0xff] }
 0x19a   : > { %1171 = vst.msk [vmem:[#allocation4 + $0x28] sm:$0xff] %vm445_vm2, %v1163_v17  ;;  %v1244_v19 = vadd.f32 %v1236_v9, %v1222_v10  ;;  %v3751_v10 = vadd.f32 %v3124_v60, %v1346_v2 }
 0x19b   : > { %1340 = vst.msk [vmem:[#allocation4 + $0x10] sm:$0xff] %vm445_vm2, %v1332_v5  ;;  %v1229_v42 = vpop.f32.mrf.mxu3 }
 0x19c   : > { %1252 = vst.msk [vmem:[#allocation4 + $0x20] sm:$0xff] %vm445_vm2, %v1244_v19  ;;  %v1145_v50 = vpop.f32.mrf.mxu2  ;;  %v1325_v11 = vld [vmem:[#allocation4 + $0x18] sm:$0xff]  ;;  %v1389_v26 = vmul.f32 %v3751_v10, %v3751_v10  ;;  %v1368_v17 = vsel %vm445_vm2, %v3751_v10, 0.0 }
 0x19d   : > { %v1057_v53 = vpop.f32.mrf.mxu1  ;;  %v1309_v33 = vpop.f32.mrf.mxu0 }
 0x19e   : > { %v1075_v31 = vadd.f32 %v1067_v57, %v1057_v53  ;;  %v1333_v38 = vadd.f32 %v1325_v11, %v1309_v33  ;;  %v1397_v53 = vsel %vm445_vm2, %v1389_v26, 0.0  ;;  %v466_v26 = vlaneseq }
 0x19f   : > { %v1156_v54 = vld [vmem:[#allocation4 + $0x30] sm:$0xff] }
 0x1a0   : > { %v1164_v61 = vadd.f32 %v1156_v54, %v1145_v50  ;;  %1083 = vst.msk [vmem:[#allocation4 + $0x38] sm:$0xff] %vm445_vm2, %v1075_v31  ;;  %v1347_v46 = vld [vmem:[#allocation4 + $0x8] sm:$0xff] }
 0x1a1   : > { %v1237_v4 = vld [vmem:[#allocation4 + $0x28] sm:$0xff]  ;;  %1341 = vst.msk [vmem:[#allocation4 + $0x18] sm:$0xff] %vm445_vm2, %v1333_v38  ;;  %v3749_v32 = vadd.f32 %v3124_v60, %v1347_v46 }
 0x1a2   : > { %1172 = vst.msk [vmem:[#allocation4 + $0x30] sm:$0xff] %vm445_vm2, %v1164_v61  ;;  %v1245_v34 = vadd.f32 %v1237_v4, %v1224_v36  ;;  %v1348_v16 = vld [vmem:[#allocation4 + $0x10] sm:$0xff] }
 0x1a3   : > { %v1326_v12 = vld [vmem:[#allocation4 + $0x20] sm:$0xff]  ;;  %v1390_v18 = vmul.f32 %v3749_v32, %v3749_v32  ;;  %v3758_v29 = vadd.f32 %v3124_v60, %v1348_v16  ;;  %v1369_v1 = vsel %vm445_vm2, %v3749_v32, 0.0 }
 0x1a4   : > { %1253 = vst.msk [vmem:[#allocation4 + $0x28] sm:$0xff] %vm445_vm2, %v1245_v34  ;;  %v1147_v21 = vpop.f32.mrf.mxu2  ;;  %v1370_v36 = vadd.f32 %v1369_v1, %v1368_v17 }
 0x1a5   : > { %v1312_v20 = vpop.f32.mrf.mxu0  ;;  %v1398_v9 = vsel %vm445_vm2, %v1390_v18, 0.0  ;;  %v1391_v11 = vmul.f32 %v3758_v29, %v3758_v29  ;;  %v1371_v4 = vsel %vm445_vm2, %v3758_v29, 0.0 }
 0x1a6   : > { %v1334_v15 = vadd.f32 %v1326_v12, %v1312_v20  ;;  %v1399_v54 = vadd.f32 %v1398_v9, %v1397_v53  ;;  %v1372_v12 = vadd.f32 %v1371_v4, %v1370_v36 }
 0x1a7   : > { %v1157_v62 = vld [vmem:[#allocation4 + $0x38] sm:$0xff] }
 0x1a8   : > { %v1165_v45 = vadd.f32 %v1157_v62, %v1147_v21  ;;  %1342 = vst.msk [vmem:[#allocation4 + $0x20] sm:$0xff] %vm445_vm2, %v1334_v15  ;;  %v1349_v59 = vld [vmem:[#allocation4 + $0x18] sm:$0xff]  ;;  %v1400_v62 = vsel %vm445_vm2, %v1391_v11, 0.0 }
 0x1a9   : > { %v1238_v37 = vld [vmem:[#allocation4 + $0x30] sm:$0xff]  ;;  %v3760_v0 = vadd.f32 %v3124_v60, %v1349_v59 }
 0x1aa   : > { %1173 = vst.msk [vmem:[#allocation4 + $0x38] sm:$0xff] %vm445_vm2, %v1165_v45  ;;  %v1246_v47 = vadd.f32 %v1238_v37, %v1227_v43  ;;  %v1401_v37 = vadd.f32 %v1400_v62, %v1399_v54 }
 0x1ab   : > { %v1327_v39 = vld [vmem:[#allocation4 + $0x28] sm:$0xff]  ;;  %v1392_v31 = vmul.f32 %v3760_v0, %v3760_v0  ;;  %v1373_v34 = vsel %vm445_vm2, %v3760_v0, 0.0 }
 0x1ac   : > { %1254 = vst.msk [vmem:[#allocation4 + $0x30] sm:$0xff] %vm445_vm2, %v1246_v47  ;;  %v1374_v45 = vadd.f32 %v1373_v34, %v1372_v12 }
 0x1ad   : > { %v1314_v30 = vpop.f32.mrf.mxu0  ;;  %v1402_v43 = vsel %vm445_vm2, %v1392_v31, 0.0 }
 0x1ae   : > { %v1335_v63 = vadd.f32 %v1327_v39, %v1314_v30 }
 0x1af   : > { %v1350_v25 = vld [vmem:[#allocation4 + $0x20] sm:$0xff] }
 0x1b0   : > { %1343 = vst.msk [vmem:[#allocation4 + $0x28] sm:$0xff] %vm445_vm2, %v1335_v63  ;;  %v3764_v5 = vadd.f32 %v3124_v60, %v1350_v25 }
 0x1b1   : > { %v1239_v27 = vld [vmem:[#allocation4 + $0x38] sm:$0xff] }
 0x1b2   : > { %v1247_v13 = vadd.f32 %v1239_v27, %v1229_v42  ;;  %v1393_v20 = vmul.f32 %v3764_v5, %v3764_v5  ;;  %v1375_v15 = vsel %vm445_vm2, %v3764_v5, 0.0  ;;  %v1403_v42 = vadd.f32 %v1402_v43, %v1401_v37 }
 0x1b3   : > { %v1328_v40 = vld [vmem:[#allocation4 + $0x30] sm:$0xff]  ;;  %v1376_v63 = vadd.f32 %v1375_v15, %v1374_v45 }
 0x1b4   : > { %1255 = vst.msk [vmem:[#allocation4 + $0x38] sm:$0xff] %vm445_vm2, %v1247_v13  ;;  %v1404_v39 = vsel %vm445_vm2, %v1393_v20, 0.0 }
 0x1b5   : > { %v1317_v35 = vpop.f32.mrf.mxu0 }
 0x1b6   : > { %v1336_v14 = vadd.f32 %v1328_v40, %v1317_v35  ;;  %v1405_v35 = vadd.f32 %v1404_v39, %v1403_v42 }
 0x1b7   : > { %v1351_v3 = vld [vmem:[#allocation4 + $0x28] sm:$0xff] }
 0x1b8   : > { %1344 = vst.msk [vmem:[#allocation4 + $0x30] sm:$0xff] %vm445_vm2, %v1336_v14  ;;  %v3770_v33 = vadd.f32 %v3124_v60, %v1351_v3 }
 0x1ba   : > { %v1394_v21 = vmul.f32 %v3770_v33, %v3770_v33  ;;  %v1377_v47 = vsel %vm445_vm2, %v3770_v33, 0.0 }
 0x1bb   : > { %v1329_v50 = vld [vmem:[#allocation4 + $0x38] sm:$0xff]  ;;  %v1378_v2 = vadd.f32 %v1377_v47, %v1376_v63 }
 0x1bc   : > { %v1406_v46 = vsel %vm445_vm2, %v1394_v21, 0.0 }
 0x1bd   : > { %v1319_v19 = vpop.f32.mrf.mxu0  ;;  %v1407_v59 = vadd.f32 %v1406_v46, %v1405_v35 }
 0x1be   : > { %v1337_v57 = vadd.f32 %v1329_v50, %v1319_v19  ;;  %v3807_v50 = vand.u32 127, %v466_v26 }
 0x1bf   : > { %v1352_v38 = vld [vmem:[#allocation4 + $0x30] sm:$0xff] }
 0x1c0   : > { %1345 = vst.msk [vmem:[#allocation4 + $0x38] sm:$0xff] %vm445_vm2, %v1337_v57  ;;  %v3777_v61 = vadd.f32 %v3124_v60, %v1352_v38  ;;  %vm471_vm3 = vcmp.ge.s32.totalorder %v3807_v50, 8  ;;  %vm472_vm4 = vcmp.lt.s32.totalorder %v3807_v50, 16  ;;  %vm469_vm6 = vcmp.lt.s32.totalorder %v3807_v50, 8 }
 0x1c1   : > { %vm3811_vm5 = vmand %vm471_vm3, %vm472_vm4  ;;  %vm474_vm7 = vcmp.ge.s32.totalorder %v3807_v50, 16  ;;  %vm475_vm8 = vcmp.lt.s32.totalorder %v3807_v50, 24  ;;  %vm477_vm10 = vcmp.ge.s32.totalorder %v3807_v50, 24  ;;  %vm478_vm11 = vcmp.lt.s32.totalorder %v3807_v50, 32 }
 0x1c2   : > { %v1395_v30 = vmul.f32 %v3777_v61, %v3777_v61  ;;  %v1379_v27 = vsel %vm445_vm2, %v3777_v61, 0.0  ;;  %vm3827_vm9 = vmand %vm474_vm7, %vm475_vm8 }
 0x1c3   : > { %v1380_v16 = vadd.f32 %v1379_v27, %v1378_v2  ;;  %vm3842_vm12 = vmand %vm477_vm10, %vm478_vm11 }
 0x1c4   : > { %v1408_v14 = vsel %vm445_vm2, %v1395_v30, 0.0 }
 0x1c5   : > { %v1409_v3 = vadd.f32 %v1408_v14, %v1407_v59 }
 0x1c7   : > { %v1353_v13 = vld [vmem:[#allocation4 + $0x38] sm:$0xff] }
 0x1c8   : > { %v3799_v40 = vadd.f32 %v3124_v60, %v1353_v13 }
 0x1ca   : > { %v1381_v18 = vsel %vm445_vm2, %v3799_v40, 0.0  ;;  %v1396_v25 = vmul.f32 %v3799_v40, %v3799_v40 }
 0x1cb   : > { %v1382_v1 = vadd.f32 %v1381_v18, %v1380_v16 }
 0x1cc   : > { %v1410_v17 = vsel %vm445_vm2, %v1396_v25, 0.0 }
 0x1cd   : > { %v1383_v9 = vrot.slane %v1382_v1, 4  ;;  %v1411_v19 = vadd.f32 %v1410_v17, %v1409_v3 }
 0x1cf   : > { %v1384_v60 = vadd.f32 %v1383_v9, %v1382_v1  ;;  %v1412_v36 = vrot.slane %v1411_v19, 4 }
 0x1d1   : > { %v1385_v53 = vrot.slane %v1384_v60, 2  ;;  %v1413_v57 = vadd.f32 %v1412_v36, %v1411_v19 }
 0x1d3   : > { %v1386_v11 = vadd.f32 %v1385_v53, %v1384_v60  ;;  %v1414_v31 = vrot.slane %v1413_v57, 2 }
 0x1d5   : > { %v1387_v38 = vrot.slane %v1386_v11, 1  ;;  %v1415_v54 = vadd.f32 %v1414_v31, %v1413_v57 }
 0x1d7   : > { %v1388_v34 = vadd.f32 %v1387_v38, %v1386_v11  ;;  %v1416_v20 = vrot.slane %v1415_v54, 1 }
 0x1d9   : > { %v1444_v12 = vsel %vm3811_vm5, %v1388_v34, 0.0  ;;  %v1418_v15 = vsel %vm469_vm6, %v1388_v34, 0.0  ;;  %v1417_v21 = vadd.f32 %v1416_v20, %v1415_v54  ;;  %v1470_v30 = vsel %vm3827_vm9, %v1388_v34, 0.0 }
 0x1da   : > { %v1445_v62 = vsel %vm445_vm2, %v1444_v12, 0.0  ;;  %v1419_v43 = vsel %vm445_vm2, %v1418_v15, 0.0  ;;  %v1471_v42 = vsel %vm445_vm2, %v1470_v30, 0.0  ;;  %v1496_v2 = vsel %vm3842_vm12, %v1388_v34, 0.0 }
 0x1db   : > { %1446 = vadd.xlane.f32.xlu2 %v1445_v62  ;;  %1420 = vadd.xlane.f32.xlu1 %v1419_v43  ;;  %v1422_v45 = vsel %vm469_vm6, %v1417_v21, 0.0  ;;  %v1448_v39 = vsel %vm3811_vm5, %v1417_v21, 0.0  ;;  %v1474_v63 = vsel %vm3827_vm9, %v1417_v21, 0.0  ;;  %v1500_v35 = vsel %vm3842_vm12, %v1417_v21, 0.0 }
 0x1dc   : > { %v1423_v37 = vsel %vm445_vm2, %v1422_v45, 0.0  ;;  %v1449_v27 = vsel %vm445_vm2, %v1448_v39, 0.0  ;;  %v1475_v46 = vsel %vm445_vm2, %v1474_v63, 0.0  ;;  %v1497_v14 = vsel %vm445_vm2, %v1496_v2, 0.0  ;;  %v1584_v39 = vld [vmem:[%s4474_s7 + $0x18] sm:$0xff]  ;;  %v1583_v63 = vld [vmem:[%s4474_s7 + $0x10] sm:$0xff] }
 0x1dd   : > { %1424 = vadd.xlane.f32.xlu0 %v1423_v37  ;;  %v1501_v16 = vsel %vm445_vm2, %v1500_v35, 0.0  ;;  %1600 = vmatpush.msrb.mxu1 %v1584_v39  ;;  %v1582_v2 = vld [vmem:[%s4474_s7 + $0x8] sm:$0xff] }
 0x1df   : > { %1601 = vmatpush.msrb.mxu1 %v1583_v63 }
 0x1e1   : > { %1602 = vmatpush.msrb.mxu1 %v1582_v2 }
 0x1e3   : > { %1472 = vadd.xlane.f32.xlu2 %v1471_v42  ;;  %1450 = vadd.xlane.f32.xlu1 %v1449_v27 }
 0x1e5   : > { %1476 = vadd.xlane.f32.xlu0 %v1475_v46 }
 0x1eb   : > { %1498 = vadd.xlane.f32.xlu2 %v1497_v14  ;;  %1502 = vadd.xlane.f32.xlu1 %v1501_v16  ;;  %v1581_v14 = vld [vmem:[%s4474_s7] sm:$0xff] }
 0x1ec   : > { %1603 = vmatpush.msrb.mxu1 %v1581_v14 }
 0x24e   : > { %v1447_v59 = vpop.xlane.xlu2 %1446  ;;  %v1421_v18 = vpop.xlane.xlu1 %1420 }
 0x24f   : > { %v3852_v25 = vmul.f32 0.001953125, %v1421_v18  ;;  %v3856_v9 = vmul.f32 0.001953125, %v1447_v59 }
 0x250   : > { %v1425_v26 = vpop.xlane.xlu0 %1424 }
 0x251   : > { %v1428_v1 = vmul.f32 %v3852_v25, %v3852_v25  ;;  %v1427_v3 = vmul.f32 0.001953125, %v1425_v26  ;;  %v1454_v31 = vmul.f32 %v3856_v9, %v3856_v9  ;;  %v1431_v2 = vsel %vm469_vm6, %v3852_v25, 0.0 }
 0x253   : > { %v1429_v17 = vsub.f32 %v1427_v3, %v1428_v1 }
 0x255   : > { %v1430_v19 = vmax.f32 %v1429_v17, 0.0 }
 0x256   : > { %v1473_v60 = vpop.xlane.xlu2 %1472  ;;  %v1451_v36 = vpop.xlane.xlu1 %1450 }
 0x257   : > { %v1432_v53 = vadd.f32 1e-05, %v1430_v19  ;;  %v3858_v57 = vmul.f32 0.001953125, %v1473_v60  ;;  %v1453_v11 = vmul.f32 0.001953125, %v1451_v36 }
 0x258   : > { %v1477_v38 = vpop.xlane.xlu0 %1476 }
 0x259   : > { %3128 = vrsqrt.f32 %v1432_v53  ;;  %v1480_v54 = vmul.f32 %v3858_v57, %v3858_v57  ;;  %v1455_v34 = vsub.f32 %v1453_v11, %v1454_v31  ;;  %v1479_v20 = vmul.f32 0.001953125, %v1477_v38 }
 0x25a   : > { %vm1439_vm15 = vweird.f32 %v1432_v53 }
 0x25b   : > { %v1456_v12 = vmax.f32 %v1455_v34, 0.0  ;;  %v1481_v15 = vsub.f32 %v1479_v20, %v1480_v54 }
 0x25d   : > { %v1458_v21 = vadd.f32 1e-05, %v1456_v12  ;;  %v1482_v62 = vmax.f32 %v1481_v15, 0.0 }
 0x25e   : > { %v1499_v43 = vpop.xlane.xlu2 %1498  ;;  %v1503_v30 = vpop.xlane.xlu1 %1502 }
 0x25f   : > { %v3129_v45 = vpop.eup %3128  ;;  %v3864_v37 = vmul.f32 0.001953125, %v1499_v43  ;;  %3130 = vrsqrt.f32 %v1458_v21  ;;  %v1484_v27 = vadd.f32 1e-05, %v1482_v62  ;;  %v1505_v35 = vmul.f32 0.001953125, %v1503_v30 }
 0x260   : > { %v1434_v42 = vmul.f32 %v3129_v45, %v1432_v53  ;;  %vm1440_vm13 = vweird.f32 %v3129_v45  ;;  %vm1465_vm3 = vweird.f32 %v1458_v21 }
 0x261   : > { %v1506_v46 = vmul.f32 %v3864_v37, %v3864_v37  ;;  %3132 = vrsqrt.f32 %v1484_v27  ;;  %vm1441_vm0 = vmor %vm1439_vm15, %vm1440_vm13  ;;  %vm1491_vm8 = vweird.f32 %v1484_v27 }
 0x262   : > { %v1435_v16 = vmul.f32 %v3129_v45, %v1434_v42 }
 0x263   : > { %v1507_v59 = vsub.f32 %v1505_v35, %v1506_v46 }
 0x264   : > { %v1436_v17 = vmul.f32 0.5, %v1435_v16 }
 0x265   : > { %v3131_v18 = vpop.eup %3130  ;;  %v1508_v1 = vmax.f32 %v1507_v59, 0.0 }
 0x266   : > { %v1460_v26 = vmul.f32 %v3131_v18, %v1458_v21  ;;  %v1437_v38 = vsub.f32 1.5, %v1436_v17  ;;  %vm1466_vm14 = vweird.f32 %v3131_v18 }
 0x267   : > { %v3133_v3 = vpop.eup %3132  ;;  %v1510_v60 = vadd.f32 1e-05, %v1508_v1  ;;  %vm1467_vm4 = vmor %vm1465_vm3, %vm1466_vm14 }
 0x268   : > { %v1461_v19 = vmul.f32 %v3131_v18, %v1460_v26  ;;  %v1486_v36 = vmul.f32 %v3133_v3, %v1484_v27  ;;  %v1438_v12 = vmul.f32 %v3129_v45, %v1437_v38  ;;  %vm1492_vm7 = vweird.f32 %v3133_v3  ;;  %v1366_v27 = vld [vmem:[%s4472_s5] sm:$0x1] }
 0x269   : > { %3134 = vrsqrt.f32 %v1510_v60  ;;  %vm1493_vm10 = vmor %vm1491_vm8, %vm1492_vm7  ;;  %vm1517_vm13 = vweird.f32 %v1510_v60 }
 0x26a   : > { %v1462_v11 = vmul.f32 0.5, %v1461_v19  ;;  %v1487_v31 = vmul.f32 %v3133_v3, %v1486_v36  ;;  %v1442_v39 = vsel %vm1441_vm0, %v3129_v45, %v1438_v12  ;;  %v1457_v45 = vsel %vm3811_vm5, %v3856_v9, %v1431_v2  ;;  %v3125_v36 = vld [vmem:[%s4473_s6] ss:$0 sm:$0xff] }
 0x26b   : > { %v1443_v35 = vsel %vm469_vm6, %v1442_v39, 0.0  ;;  %v1483_v25 = vsel %vm3827_vm9, %v3858_v57, %v1457_v45 }
 0x26c   : > { %v1463_v54 = vsub.f32 1.5, %v1462_v11  ;;  %v1488_v34 = vmul.f32 0.5, %v1487_v31 }
 0x26e   : > { %v1489_v15 = vsub.f32 1.5, %v1488_v34  ;;  %v1464_v62 = vmul.f32 %v3131_v18, %v1463_v54 }
 0x26f   : > { %v3135_v20 = vpop.eup %3134 }
 0x270   : > { %v1512_v43 = vmul.f32 %v3135_v20, %v1510_v60  ;;  %v1490_v63 = vmul.f32 %v3133_v3, %v1489_v15  ;;  %v1468_v42 = vsel %vm1467_vm4, %v3131_v18, %v1464_v62  ;;  %vm1518_vm11 = vweird.f32 %v3135_v20 }
 0x271   : > { %v1469_v53 = vsel %vm3811_vm5, %v1468_v42, %v1443_v35  ;;  %vm1519_vm14 = vmor %vm1517_vm13, %vm1518_vm11  ;;  %v1509_v18 = vsel %vm3842_vm12, %v3864_v37, %v1483_v25 }
 0x272   : > { %v1513_v30 = vmul.f32 %v3135_v20, %v1512_v43  ;;  %v1494_v21 = vsel %vm1493_vm10, %v3133_v3, %v1490_v63  ;;  %v1522_v3 = vsub.f32 %v3751_v10, %v1509_v18  ;;  %v1523_v57 = vsub.f32 %v3749_v32, %v1509_v18 }
 0x273   : > { %v1495_v59 = vsel %vm3827_vm9, %v1494_v21, %v1469_v53  ;;  %v1524_v17 = vsub.f32 %v3758_v29, %v1509_v18  ;;  %v1525_v19 = vsub.f32 %v3760_v0, %v1509_v18  ;;  %v1526_v37 = vsub.f32 %v3764_v5, %v1509_v18  ;;  %v1609_v5 = vld [vmem:[%s4475_s8] sm:$0x3] }
 0x274   : > { %v1514_v46 = vmul.f32 0.5, %v1513_v30  ;;  %v1527_v11 = vsub.f32 %v3770_v33, %v1509_v18  ;;  %v1528_v10 = vsub.f32 %v3777_v61, %v1509_v18  ;;  %v1529_v62 = vsub.f32 %v3799_v40, %v1509_v18  ;;  %2909 = vmatpush.msk.msrb.mxu2 %vm569_vm1, %v1609_v5 }
 0x275   : > { %vm1610_vm1 = vcmask 15360  }
 0x276   : > { %v1515_v14 = vsub.f32 1.5, %v1514_v46 }
 0x278   : > { %v1516_v16 = vmul.f32 %v3135_v20, %v1515_v14 }
 0x27a   : > { %v1520_v26 = vsel %vm1519_vm14, %v3135_v20, %v1516_v16 }
 0x27b   : > { %v1521_v9 = vsel %vm3842_vm12, %v1520_v26, %v1495_v59 }
 0x27c   : > { %v1530_v1 = vmul.f32 %v1521_v9, %v1366_v27 }
 0x27e   : > { %v1531_v60 = vperm.slane %v1530_v1, 0 }
 0x280   : > { %v1532_v31 = vmul.f32 %v1531_v60, %v1522_v3  ;;  %v1533_v38 = vmul.f32 %v1531_v60, %v1523_v57  ;;  %v1534_v54 = vmul.f32 %v1531_v60, %v1524_v17  ;;  %v1535_v34 = vmul.f32 %v1531_v60, %v1525_v19 }
 0x281   : > { %v1536_v32 = vmul.f32 %v1531_v60, %v1526_v37  ;;  %v1537_v20 = vmul.f32 %v1531_v60, %v1527_v11  ;;  %v1538_v43 = vmul.f32 %v1531_v60, %v1528_v10  ;;  %v1539_v61 = vmul.f32 %v1531_v60, %v1529_v62 }
 0x282   : > { %v1543_v29 = vadd.f32 %v3125_v36, %v1532_v31  ;;  %v1544_v12 = vadd.f32 %v3125_v36, %v1533_v38  ;;  %v1545_v0 = vadd.f32 %v3125_v36, %v1534_v54  ;;  %v1546_v15 = vadd.f32 %v3125_v36, %v1535_v34 }
 0x283   : > { %v1547_v33 = vadd.f32 %v3125_v36, %v1536_v32  ;;  %v1548_v42 = vadd.f32 %v3125_v36, %v1537_v20  ;;  %v1549_v14 = vadd.f32 %v3125_v36, %v1538_v43  ;;  %v1550_v16 = vadd.f32 %v3125_v36, %v1539_v61  ;;  %v3058_v32 = vld [vmem:[%s4476_s9 + $0x8] sm:$0xff]  ;;  %v3064_v43 = vld [vmem:[%s4476_s9 + $0x38] sm:$0xff]  ;;  %v3061_v61 = vld [vmem:[%s4476_s9 + $0x20] sm:$0xff] }
 0x284   : > { %v3917_v30 = vmax.f32 %v1543_v29, 0.0  ;;  %v3919_v39 = vmax.f32 %v1544_v12, 0.0  ;;  %v3921_v63 = vmax.f32 %v1545_v0, 0.0  ;;  %v3924_v46 = vmax.f32 %v1546_v15, 0.0  ;;  %1727 = vmatpush.bf16.msra.mxu3 %v3058_v32  ;;  %v3057_v12 = vld [vmem:[%s4476_s9] sm:$0xff]  ;;  %v3060_v0 = vld [vmem:[%s4476_s9 + $0x18] sm:$0xff]  ;;  %2009 = vmatpush.bf16.msrb.mxu0 %v3064_v43 }
 0x285   : > { %v3930_v53 = vmax.f32 %v1547_v33, 0.0  ;;  %v3934_v25 = vmax.f32 %v1548_v42, 0.0  ;;  %v3938_v18 = vmax.f32 %v1549_v14, 0.0  ;;  %v3942_v1 = vmax.f32 %v1550_v16, 0.0  ;;  %v3062_v15 = vld [vmem:[%s4476_s9 + $0x28] sm:$0xff]  ;;  %1805 = vmatpush.bf16.msra.mxu1 %v3060_v0  ;;  %v3059_v33 = vld [vmem:[%s4476_s9 + $0x10] sm:$0xff] }
 0x286   : > { %4500 = vst [vmem:[#allocation10_spill] sm:$0xff] %v3921_v63  ;;  %v1559_v40 = vsel %vm445_vm2, %v3917_v30, 0.0  ;;  %v1560_v2 = vsel %vm445_vm2, %v3919_v39, 0.0  ;;  %v1562_v21 = vsel %vm445_vm2, %v3921_v63, 0.0  ;;  %v1564_v27 = vsel %vm445_vm2, %v3924_v46, 0.0  ;;  %1907 = vmatpush.bf16.msra.mxu2 %v3062_v15  ;;  %v3063_v42 = vld [vmem:[%s4476_s9 + $0x30] sm:$0xff] }
 0x287   : > { %4501 = vst [vmem:[#allocation11_spill] sm:$0xff] %v3924_v46  ;;  %v1561_v35 = vadd.f32 %v1560_v2, %v1559_v40  ;;  %v1566_v26 = vsel %vm445_vm2, %v3930_v53, 0.0  ;;  %v1568_v3 = vsel %vm445_vm2, %v3934_v25, 0.0  ;;  %v1570_v17 = vsel %vm445_vm2, %v3938_v18, 0.0  ;;  %v3066_v14 = vld [vmem:[%s4476_s9 + $0x48] sm:$0xff] }
 0x288   : > { %4502 = vst [vmem:[#allocation12_spill] sm:$0xff] %v3930_v53  ;;  %v1572_v60 = vsel %vm445_vm2, %v3942_v1, 0.0  ;;  %1728 = vmatpush.bf16.msra.mxu3 %v3057_v12  ;;  %2010 = vmatpush.bf16.msrb.mxu0 %v3063_v42  ;;  %v1758_v32 = vld [vmem:[#allocation3 + $0x8] sm:$0xff] }
 0x289   : > { %v1563_v45 = vadd.f32 %v1562_v21, %v1561_v35  ;;  %4503 = vst [vmem:[#allocation13_spill] sm:$0xff] %v3934_v25  ;;  %1806 = vmatpush.bf16.msra.mxu1 %v3059_v33 }
 0x28a   : > { %4504 = vst [vmem:[#allocation14_spill] sm:$0xff] %v3938_v18  ;;  %1908 = vmatpush.bf16.msra.mxu2 %v3061_v61 }
 0x28b   : > { %v1565_v59 = vadd.f32 %v1564_v27, %v1563_v45  ;;  %4505 = vst [vmem:[#allocation15_spill] sm:$0xff] %v3942_v1 }
 0x28c   : > { %2103 = vmatpush.bf16.msrb.mxu3 %v3066_v14 }
 0x28d   : > { %v1567_v9 = vadd.f32 %v1566_v26, %v1565_v59 }
 0x28f   : > { %v1569_v57 = vadd.f32 %v1568_v3, %v1567_v9 }
 0x291   : > { %v1571_v19 = vadd.f32 %v1570_v17, %v1569_v57 }
 0x293   : > { %v1573_v36 = vadd.f32 %v1572_v60, %v1571_v19 }
 0x295   : > { %v1574_v37 = vrot.slane %v1573_v36, 4 }
 0x297   : > { %v1575_v11 = vadd.f32 %v1574_v37, %v1573_v36 }
 0x299   : > { %v1576_v31 = vrot.slane %v1575_v11, 2 }
 0x29b   : > { %v1577_v38 = vadd.f32 %v1576_v31, %v1575_v11 }
 0x29d   : > { %v1578_v54 = vrot.slane %v1577_v38, 1 }
 0x29f   : > { %v1579_v34 = vadd.f32 %v1578_v54, %v1577_v38 }
 0x2a1   : > { %v1580_v10 = vmul.f32 0.015625, %v1579_v34 }
 0x2a3   : > { %2908 = vmatmul.msk.f32.vlgmr.msrb.gmra.mxu1 %vm445_vm2, %v1580_v10  ;;  %v1673_v10 = vld [vmem:[#allocation3 + $0x7] sm:$0xff] }
 0x320   : > { %v1605_v20 = vpop.f32.mrf.mxu1 }
 0x321   : > { %v1608_v29 = vmax.f32 %v1605_v20, 0.0  ;;  %v1681_v20 = vmul.f32 %v1673_v10, %v3449_v49 }
 0x323   : > { %2910 = vmatmul.msk.f32.vlgmr.msrb.gmra.mxu2 %vm1610_vm1, %v1608_v29 }
 0x3a6   : > { %v1634_v62 = vpop.f32.mrf.mxu2 }
 0x3a7   : > { %v1637_v5 = vsub.f32 0.0, %v1634_v62 }
 0x3a9   : > { %v1638_v40 = vmul.f32 1.442695, %v1637_v5 }
 0x3ab   : > { %3136 = vpow2.f32 %v1638_v40 }
 0x3b1   : > { %v3137_v2 = vpop.eup %3136 }
 0x3b2   : > { %v1640_v35 = vadd.f32 1.0, %v3137_v2 }
 0x3b4   : > { %3138 = vrcp.f32 %v1640_v35  ;;  %v1652_v27 = vand.u32 2147483648, %v1640_v35  ;;  %v1650_v26 = vand.u32 2147483647, %v1640_v35  ;;  %vm1646_vm0 = vweird.f32 %v1640_v35 }
 0x3b6   : > { %v1653_v3 = vor.u32 1.1754944e-38, %v1652_v27  ;;  %vm1651_vm4 = vcmp.eq.f32.partialorder %v1650_v26, 8.507059e+37 }
 0x3ba   : > { %v3139_v21 = vpop.eup %3138 }
 0x3bb   : > { %v1642_v45 = vmul.f32 %v3139_v21, %v1640_v35  ;;  %vm1647_vm15 = vweird.f32 %v3139_v21 }
 0x3bc   : > { %vm1648_vm3 = vmor %vm1646_vm0, %vm1647_vm15 }
 0x3bd   : > { %v1643_v16 = vsub.f32 1.0, %v1642_v45  ;;  %v3068_v45 = vld [vmem:[%s4476_s9 + $0x58] sm:$0xff] }
 0x3be   : > { %2205 = vmatpush.bf16.msrb.mxu1 %v3068_v45  ;;  %v3069_v45 = vld [vmem:[%s4476_s9 + $0x60] sm:$0xff] }
 0x3bf   : > { %v1644_v59 = vmul.f32 %v3139_v21, %v1643_v16  ;;  %v3070_v16 = vld [vmem:[%s4476_s9 + $0x68] sm:$0xff] }
 0x3c0   : > { %2307 = vmatpush.bf16.msrb.mxu2 %v3070_v16  ;;  %v3071_v16 = vld [vmem:[%s4476_s9 + $0x70] sm:$0xff] }
 0x3c1   : > { %v1645_v9 = vadd.f32 %v3139_v21, %v1644_v59 }
 0x3c3   : > { %v1649_v57 = vsel %vm1648_vm3, %v3139_v21, %v1645_v9  ;;  %v3065_v21 = vld [vmem:[%s4476_s9 + $0x40] sm:$0xff] }
 0x3c4   : > { %v1654_v17 = vsel %vm1651_vm4, %v1653_v3, %v1649_v57  ;;  %2104 = vmatpush.bf16.msrb.mxu3 %v3065_v21  ;;  %v3067_v21 = vld [vmem:[%s4476_s9 + $0x50] sm:$0xff]  ;;  %2308 = vmatpush.bf16.msrb.mxu2 %v3069_v45 }
 0x3c5   : > { %v1656_v19 = vperm.slane %v1654_v17, 0  ;;  %2206 = vmatpush.bf16.msrb.mxu1 %v3067_v21 }
 0x3c7   : > { %v1657_v60 = vmul.f32 %v1656_v19, %v3917_v30  ;;  %v1658_v36 = vmul.f32 %v1656_v19, %v3919_v39  ;;  %v1659_v37 = vmul.f32 %v1656_v19, %v3921_v63  ;;  %v1660_v11 = vmul.f32 %v1656_v19, %v3924_v46 }
 0x3c8   : > { %v1661_v31 = vmul.f32 %v1656_v19, %v3930_v53  ;;  %v1662_v38 = vmul.f32 %v1656_v19, %v3934_v25  ;;  %v1663_v54 = vmul.f32 %v1656_v19, %v3938_v18  ;;  %v1664_v34 = vmul.f32 %v1656_v19, %v3942_v1 }
 0x3c9   : > { %1665 = vst.msk [vmem:[#allocation3 + $0x10] sm:$0xff] %vm445_vm2, %v1657_v60 }
 0x3ca   : > { %1666 = vst.msk [vmem:[#allocation3 + $0x18] sm:$0xff] %vm445_vm2, %v1658_v36 }
 0x3cb   : > { %1667 = vst.msk [vmem:[#allocation3 + $0x20] sm:$0xff] %vm445_vm2, %v1659_v37 }
 0x3cc   : > { %1668 = vst.msk [vmem:[#allocation3 + $0x28] sm:$0xff] %vm445_vm2, %v1660_v11 }
 0x3cd   : > { %1669 = vst.msk [vmem:[#allocation3 + $0x30] sm:$0xff] %vm445_vm2, %v1661_v31 }
 0x3ce   : > { %1670 = vst.msk [vmem:[#allocation3 + $0x38] sm:$0xff] %vm445_vm2, %v1662_v38 }
 0x3cf   : > { %1671 = vst.msk [vmem:[#allocation3 + $0x40] sm:$0xff] %vm445_vm2, %v1663_v54 }
 0x3d0   : > { %v3994_v29 = vld [vmem:[#allocation3 + $0x10] sm:$0xff]  ;;  %1672 = vst.msk [vmem:[#allocation3 + $0x48] sm:$0xff] %vm445_vm2, %v1664_v34 }
 0x3d1   : > { %v1674_v12 = vld [vmem:[#allocation3 + $0xf] sm:$0xff]  ;;  %v1766_v15 = vpack.c.bf16 %v3994_v29, %v1758_v32  ;;  %v4002_v33 = vld [vmem:[#allocation3 + $0x17] sm:$0xff] }
 0x3d2   : > { %v1852_v0 = vld [vmem:[#allocation3 + $0x9] sm:$0xff]  ;;  %v1682_v62 = vmul.f32 %v1674_v12, %v3461_v56  ;;  %v3999_v43 = vld [vmem:[#allocation3 + $0x11] sm:$0xff]  ;;  %v1962_v61 = vmul.f32 %v1674_v12, %v3449_v49  ;;  %v1963_v40 = vmul.f32 %v4002_v33, %v3461_v56  ;;  %v4022_v27 = vld [vmem:[#allocation3 + $0x1f] sm:$0xff]  ;;  %v1683_v17 = vmul.f32 %v4002_v33, %v3489_v8 }
 0x3d3   : > { %v1860_v5 = vmul.f32 %v1852_v0, %v3407_v28  ;;  %v1861_v42 = vmul.f32 %v3999_v43, %v3432_v41  ;;  %2935 = vmatmul.msk.bf16.vlgmr.msra.gmra.mxu1 %vm445_vm2, %v1766_v15  ;;  %v4024_v59 = vld [vmem:[#allocation3 + $0x19] sm:$0xff]  ;;  %v4026_v26 = vld [vmem:[#allocation3 + $0x21] sm:$0xff]  ;;  %v1684_v19 = vmul.f32 %v4022_v27, %v3487_v7  ;;  %v1964_v11 = vmul.f32 %v4022_v27, %v3489_v8 }
 0x3d4   : > { %v1689_v2 = vpack.c.bf16 %v1682_v62, %v1681_v20  ;;  %v1970_v14 = vpack.c.bf16 %v1963_v40, %v1962_v61  ;;  %v4028_v9 = vld [vmem:[#allocation3 + $0x27] sm:$0xff]  ;;  %v4030_v3 = vld [vmem:[#allocation3 + $0x18] sm:$0xff]  ;;  %v1862_v36 = vmul.f32 %v4024_v59, %v3485_v6  ;;  %v1863_v37 = vmul.f32 %v4026_v26, %v3513_v23 }
 0x3d5   : > { %v1868_v35 = vpack.c.bf16 %v1861_v42, %v1860_v5  ;;  %v4032_v57 = vld [vmem:[#allocation3 + $0x20] sm:$0xff]  ;;  %v4038_v60 = vld [vmem:[#allocation3 + $0x29] sm:$0xff]  ;;  %v1965_v31 = vmul.f32 %v4028_v9, %v3487_v7  ;;  %v4048_v38 = vld [vmem:[#allocation3 + $0x31] sm:$0xff]  ;;  %v4060_v32 = vmul.f32 %v4024_v59, %v3407_v28  ;;  %v4064_v20 = vmul.f32 %v4026_v26, %v3432_v41 }
 0x3d6   : > { %2919 = vmatmul.msk.bf16.vlgmr.msra.gmra.mxu3 %vm445_vm2, %v1689_v2  ;;  %2967 = vmatmul.msk.bf16.vlgmr.msrb.gmra.mxu0 %vm445_vm2, %v1970_v14  ;;  %v4050_v54 = vld [vmem:[#allocation3 + $0x39] sm:$0xff]  ;;  %v4056_v10 = vpack.c.bf16 %v4032_v57, %v4030_v3  ;;  %v4068_v12 = vmul.f32 %v4038_v60, %v3485_v6  ;;  %v1690_v0 = vpack.c.bf16 %v1684_v19, %v1683_v17  ;;  %v1678_v17 = vld [vmem:[#allocation3 + $0x2f] sm:$0xff] }
 0x3d7   : > { %2951 = vmatmul.msk.bf16.vlgmr.msra.gmra.mxu2 %vm445_vm2, %v1868_v35  ;;  %v4052_v34 = vld [vmem:[#allocation3 + $0x41] sm:$0xff]  ;;  %v4074_v15 = vmul.f32 %v4048_v38, %v3513_v23  ;;  %v4078_v62 = vmul.f32 %v4050_v54, %v3556_v58  ;;  %v1869_v61 = vpack.c.bf16 %v1863_v37, %v1862_v36  ;;  %v1971_v42 = vpack.c.bf16 %v1965_v31, %v1964_v11  ;;  %v3072_v14 = vld [vmem:[%s4476_s9 + $0x78] sm:$0xff]  ;;  %v4107_v37 = vld [vmem:[#allocation3 + $0x30] sm:$0xff] }
 0x3d8   : > { %v4082_v5 = vmul.f32 %v4052_v34, %v3554_v52  ;;  %2401 = vmatpush.bf16.msra.mxu0 %v3072_v14  ;;  %v4105_v19 = vld [vmem:[#allocation3 + $0x37] sm:$0xff]  ;;  %v1762_v36 = vld [vmem:[#allocation3 + $0x28] sm:$0xff]  ;;  %v1685_v11 = vmul.f32 %v4028_v9, %v3511_v22  ;;  %v1686_v31 = vmul.f32 %v1678_v17, %v3515_v24  ;;  %v1680_v40 = vld [vmem:[#allocation3 + $0x3f] sm:$0xff]  ;;  %v2158_v53 = vmul.f32 %v3999_v43, %v3407_v28 }
 0x3d9   : > { %v1967_v14 = vmul.f32 %v4105_v19, %v3515_v24  ;;  %v1768_v21 = vpack.c.bf16 %v4107_v37, %v1762_v36  ;;  %v3074_v2 = vld [vmem:[%s4476_s9 + $0x88] sm:$0xff]  ;;  %v1764_v18 = vld [vmem:[#allocation3 + $0x38] sm:$0xff]  ;;  %v4127_v25 = vld [vmem:[#allocation3 + $0x40] sm:$0xff]  ;;  %v2159_v46 = vmul.f32 %v4024_v59, %v3432_v41  ;;  %v2260_v63 = vmul.f32 %v4002_v33, %v3449_v49 }
 0x3da   : > { %v1691_v45 = vpack.c.bf16 %v1686_v31, %v1685_v11  ;;  %2503 = vmatpush.bf16.msra.mxu3 %v3074_v2  ;;  %v1961_v1 = vld [vmem:[#allocation3 + $0x47] sm:$0xff]  ;;  %v1687_v11 = vmul.f32 %v4105_v19, %v3447_v48  ;;  %v1688_v31 = vmul.f32 %v1680_v40, %v3459_v55  ;;  %v2160_v41 = vmul.f32 %v4026_v26, %v3485_v6 }
 0x3db   : > { %v1969_v2 = vmul.f32 %v1961_v1, %v3459_v55  ;;  %v3073_v28 = vld [vmem:[%s4476_s9 + $0x80] sm:$0xff]  ;;  %v2161_v49 = vmul.f32 %v4038_v60, %v3513_v23  ;;  %v2162_v6 = vmul.f32 %v4048_v38, %v3556_v58  ;;  %v2265_v23 = vmul.f32 %v1680_v40, %v3515_v24  ;;  %v2259_v24 = vld [vmem:[#allocation3 + $0x4f] sm:$0xff] }
 0x3dc   : > { %2402 = vmatpush.bf16.msra.mxu0 %v3071_v16  ;;  %v2066_v33 = vpack.c.bf16 %v1764_v18, %v4107_v37  ;;  %v2063_v59 = vld [vmem:[#allocation3 + $0x48] sm:$0xff]  ;;  %v2266_v26 = vmul.f32 %v1961_v1, %v3447_v48 }
 0x3de   : > { %2504 = vmatpush.bf16.msra.mxu3 %v3073_v28 }
 0x3e3   : > { %2936 = vmatmul.msk.bf16.gmra.mxu1 %vm445_vm2, %v4056_v10 }
 0x3e6   : > { %2920 = vmatmul.msk.bf16.gmra.mxu3 %vm445_vm2, %v1690_v0  ;;  %2968 = vmatmul.msk.bf16.gmra.mxu0 %vm445_vm2, %v1971_v42  ;;  %v1864_v0 = vmul.f32 %v4038_v60, %v3556_v58  ;;  %v1966_v42 = vmul.f32 %v1678_v17, %v3511_v22  ;;  %v4185_v58 = vld [vmem:[#allocation3 + $0x49] sm:$0xff] }
 0x3e7   : > { %2952 = vmatmul.msk.bf16.gmra.mxu2 %vm445_vm2, %v1869_v61  ;;  %v1865_v61 = vmul.f32 %v4048_v38, %v3554_v52 }
 0x3e8   : > { %v1972_v35 = vpack.c.bf16 %v1967_v14, %v1966_v42  ;;  %v1769_v42 = vpack.c.bf16 %v4127_v25, %v1764_v18  ;;  %v1692_v14 = vpack.c.bf16 %v1688_v31, %v1687_v11  ;;  %v2261_v11 = vmul.f32 %v4022_v27, %v3461_v56 }
 0x3e9   : > { %v1870_v16 = vpack.c.bf16 %v1865_v61, %v1864_v0  ;;  %v1866_v0 = vmul.f32 %v4050_v54, %v3597_v51  ;;  %v1968_v61 = vmul.f32 %v1680_v40, %v3447_v48  ;;  %v2166_v31 = vpack.c.bf16 %v2159_v46, %v2158_v53 }
 0x3ea   : > { %v2262_v56 = vmul.f32 %v4028_v9, %v3489_v8  ;;  %v2167_v46 = vpack.c.bf16 %v2161_v49, %v2160_v41  ;;  %v2065_v53 = vpack.c.bf16 %v1762_v36, %v4032_v57  ;;  %v2163_v8 = vmul.f32 %v4050_v54, %v3554_v52 }
 0x3eb   : > { %v2164_v52 = vmul.f32 %v4052_v34, %v3597_v51  ;;  %v2267_v18 = vmul.f32 %v2259_v24, %v3459_v55  ;;  %v2067_v57 = vpack.c.bf16 %v2063_v59, %v4127_v25  ;;  %v4506_v48 = vpack.c.bf16 %v4064_v20, %v4060_v32 }
 0x3ec   : > { %v2168_v43 = vpack.c.bf16 %v2163_v8, %v2162_v6  ;;  %v4507_v32 = vpack.c.bf16 %v4074_v15, %v4068_v12 }
 0x3ed   : > { %v2271_v60 = vpack.c.bf16 %v2267_v18, %v2266_v26 }
 0x3f3   : > { %2937 = vmatmul.msk.bf16.gmra.mxu1 %vm445_vm2, %v1768_v21 }
 0x3f6   : > { %2921 = vmatmul.msk.bf16.gmra.mxu3 %vm445_vm2, %v1691_v45  ;;  %2969 = vmatmul.msk.bf16.gmra.mxu0 %vm445_vm2, %v1972_v35  ;;  %v1867_v35 = vmul.f32 %v4052_v34, %v3594_v44 }
 0x3f7   : > { %2953 = vmatmul.msk.bf16.gmra.mxu2 %vm445_vm2, %v1870_v16  ;;  %v1973_v16 = vpack.c.bf16 %v1969_v2, %v1968_v61 }
 0x3f8   : > { %v1871_v45 = vpack.c.bf16 %v1867_v35, %v1866_v0  ;;  %v2064_v0 = vpack.c.bf16 %v4030_v3, %v3994_v29  ;;  %v2268_v35 = vpack.c.bf16 %v2261_v11, %v2260_v63  ;;  %v2263_v63 = vmul.f32 %v1678_v17, %v3487_v7  ;;  %v2361_v3 = vld [vmem:[#allocation3 + $0x50] sm:$0xff] }
 0x3f9   : > { %v2264_v7 = vmul.f32 %v4105_v19, %v3511_v22  ;;  %v2165_v22 = vmul.f32 %v4185_v58, %v3594_v44  ;;  %v2365_v38 = vpack.c.bf16 %v2361_v3, %v2063_v59 }
 0x3fa   : > { %v2269_v29 = vpack.c.bf16 %v2263_v63, %v2262_v56  ;;  %v4508_v56 = vpack.c.bf16 %v4082_v5, %v4078_v62  ;;  %v2455_v5 = vld [vmem:[#allocation3 + $0x51] sm:$0xff] }
 0x3fb   : > { %v2270_v27 = vpack.c.bf16 %v2265_v23, %v2264_v7  ;;  %v2169_v9 = vpack.c.bf16 %v2165_v22, %v2164_v52  ;;  %v2463_v18 = vmul.f32 %v2455_v5, %v3594_v44 }
 0x403   : > { %2938 = vmatmul.msk.bf16.gmra.mxu1 %vm445_vm2, %v1769_v42 }
 0x406   : > { %2922 = vmatmul.msk.bf16.gmra.mxu3 %vm445_vm2, %v1692_v14  ;;  %2970 = vmatmul.msk.bf16.gmra.mxu0 %vm445_vm2, %v1973_v16 }
 0x407   : > { %2954 = vmatmul.msk.bf16.gmra.mxu2 %vm445_vm2, %v1871_v45 }
 0x413   : > { %2999 = vmatmul.msk.bf16.vlgmr.msrb.gmra.mxu1 %vm445_vm2, %v2166_v31 }
 0x416   : > { %2983 = vmatmul.msk.bf16.vlgmr.msrb.gmra.mxu3 %vm445_vm2, %v2064_v0  ;;  %3031 = vmatmul.msk.bf16.vlgmr.msra.gmra.mxu0 %vm445_vm2, %v4056_v10 }
 0x417   : > { %3015 = vmatmul.msk.bf16.vlgmr.msrb.gmra.mxu2 %vm445_vm2, %v2268_v35 }
 0x423   : > { %3000 = vmatmul.msk.bf16.gmra.mxu1 %vm445_vm2, %v2167_v46 }
 0x426   : > { %2984 = vmatmul.msk.bf16.gmra.mxu3 %vm445_vm2, %v2065_v53  ;;  %3032 = vmatmul.msk.bf16.gmra.mxu0 %vm445_vm2, %v1768_v21 }
 0x427   : > { %3016 = vmatmul.msk.bf16.gmra.mxu2 %vm445_vm2, %v2269_v29 }
 0x433   : > { %3001 = vmatmul.msk.bf16.gmra.mxu1 %vm445_vm2, %v2168_v43 }
 0x436   : > { %2985 = vmatmul.msk.bf16.gmra.mxu3 %vm445_vm2, %v2066_v33  ;;  %3033 = vmatmul.msk.bf16.gmra.mxu0 %vm445_vm2, %v1769_v42 }
 0x437   : > { %3017 = vmatmul.msk.bf16.gmra.mxu2 %vm445_vm2, %v2270_v27  ;;  %v2462_v27 = vmul.f32 %v4185_v58, %v3597_v51 }
 0x443   : > { %3002 = vmatmul.msk.bf16.gmra.mxu1 %vm445_vm2, %v2169_v9 }
 0x446   : > { %2986 = vmatmul.msk.bf16.gmra.mxu3 %vm445_vm2, %v2067_v57  ;;  %3034 = vmatmul.msk.bf16.gmra.mxu0 %vm445_vm2, %v2365_v38  ;;  %v2467_v57 = vpack.c.bf16 %v2463_v18, %v2462_v27 }
 0x447   : > { %3018 = vmatmul.msk.bf16.gmra.mxu2 %vm445_vm2, %v2271_v60 }
 0x450   : > { %v1808_v54 = vpop.f32.mrf.mxu1 }
 0x453   : > { %v2012_v55 = vpop.f32.mrf.mxu0 }
 0x456   : > { %3047 = vmatmul.msk.bf16.vlgmr.msra.gmra.mxu3 %vm445_vm2, %v4506_v48 }
 0x458   : > { %v1810_v34 = vpop.f32.mrf.mxu1 }
 0x459   : > { %v1730_v1 = vpop.f32.mrf.mxu3 }
 0x45a   : > { %1750 = vst.msk [vmem:[#allocation4] sm:$0xff] %vm445_vm2, %v1730_v1  ;;  %v1910_v25 = vpop.f32.mrf.mxu2 }
 0x45b   : > { %v2014_v36 = vpop.f32.mrf.mxu0 }
 0x460   : > { %v1813_v17 = vpop.f32.mrf.mxu1 }
 0x461   : > { %v1828_v10 = vld [vmem:[#allocation4] sm:$0xff]  ;;  %v1732_v40 = vpop.f32.mrf.mxu3 }
 0x462   : > { %v1836_v19 = vadd.f32 %v1828_v10, %v1808_v54  ;;  %1751 = vst.msk [vmem:[#allocation4 + $0x8] sm:$0xff] %vm445_vm2, %v1732_v40  ;;  %v1912_v37 = vpop.f32.mrf.mxu2 }
 0x463   : > { %v2017_v16 = vpop.f32.mrf.mxu0 }
 0x464   : > { %1844 = vst.msk [vmem:[#allocation4] sm:$0xff] %vm445_vm2, %v1836_v19 }
 0x466   : > { %3048 = vmatmul.msk.bf16.gmra.mxu3 %vm445_vm2, %v4507_v32 }
 0x468   : > { %v1815_v61 = vpop.f32.mrf.mxu1 }
 0x469   : > { %v1829_v20 = vld [vmem:[#allocation4 + $0x8] sm:$0xff]  ;;  %v1735_v21 = vpop.f32.mrf.mxu3 }
 0x46a   : > { %v1837_v2 = vadd.f32 %v1829_v20, %v1810_v34  ;;  %1752 = vst.msk [vmem:[#allocation4 + $0x10] sm:$0xff] %vm445_vm2, %v1735_v21  ;;  %v1915_v42 = vpop.f32.mrf.mxu2 }
 0x46b   : > { %v1930_v14 = vld [vmem:[#allocation4] sm:$0xff]  ;;  %v2019_v49 = vpop.f32.mrf.mxu0 }
 0x46c   : > { %v1938_v45 = vadd.f32 %v1930_v14, %v1910_v25  ;;  %1845 = vst.msk [vmem:[#allocation4 + $0x8] sm:$0xff] %vm445_vm2, %v1837_v2 }
 0x46e   : > { %1946 = vst.msk [vmem:[#allocation4] sm:$0xff] %vm445_vm2, %v1938_v45 }
 0x470   : > { %v1818_v0 = vpop.f32.mrf.mxu1 }
 0x471   : > { %v1830_v11 = vld [vmem:[#allocation4 + $0x10] sm:$0xff]  ;;  %v1737_v31 = vpop.f32.mrf.mxu3 }
 0x472   : > { %v1838_v12 = vadd.f32 %v1830_v11, %v1813_v17  ;;  %1753 = vst.msk [vmem:[#allocation4 + $0x18] sm:$0xff] %vm445_vm2, %v1737_v31  ;;  %v1917_v15 = vpop.f32.mrf.mxu2 }
 0x473   : > { %v1931_v35 = vld [vmem:[#allocation4 + $0x8] sm:$0xff]  ;;  %v2022_v33 = vpop.f32.mrf.mxu0 }
 0x474   : > { %v1939_v28 = vadd.f32 %v1931_v35, %v1912_v37  ;;  %1846 = vst.msk [vmem:[#allocation4 + $0x10] sm:$0xff] %vm445_vm2, %v1838_v12 }
 0x475   : > { %v2032_v41 = vld [vmem:[#allocation4] sm:$0xff] }
 0x476   : > { %1947 = vst.msk [vmem:[#allocation4 + $0x8] sm:$0xff] %vm445_vm2, %v1939_v28  ;;  %3049 = vmatmul.msk.bf16.gmra.mxu3 %vm445_vm2, %v4508_v56  ;;  %v2040_v63 = vadd.f32 %v2032_v41, %v2012_v55 }
 0x478   : > { %2048 = vst.msk [vmem:[#allocation4] sm:$0xff] %vm445_vm2, %v2040_v63  ;;  %v1820_v29 = vpop.f32.mrf.mxu1 }
 0x479   : > { %v1831_v46 = vld [vmem:[#allocation4 + $0x18] sm:$0xff]  ;;  %v1740_v53 = vpop.f32.mrf.mxu3 }
 0x47a   : > { %v1839_v6 = vadd.f32 %v1831_v46, %v1815_v61  ;;  %1754 = vst.msk [vmem:[#allocation4 + $0x20] sm:$0xff] %vm445_vm2, %v1740_v53  ;;  %v1920_v8 = vpop.f32.mrf.mxu2 }
 0x47b   : > { %v1932_v7 = vld [vmem:[#allocation4 + $0x10] sm:$0xff]  ;;  %v2024_v54 = vpop.f32.mrf.mxu0 }
 0x47c   : > { %v1940_v23 = vadd.f32 %v1932_v7, %v1915_v42  ;;  %1847 = vst.msk [vmem:[#allocation4 + $0x18] sm:$0xff] %vm445_vm2, %v1839_v6 }
 0x47d   : > { %v2033_v43 = vld [vmem:[#allocation4 + $0x8] sm:$0xff] }
 0x47e   : > { %1948 = vst.msk [vmem:[#allocation4 + $0x10] sm:$0xff] %vm445_vm2, %v1940_v23  ;;  %v2041_v62 = vadd.f32 %v2033_v43, %v2014_v36 }
 0x47f   : > { %v2126_v45 = vld [vmem:[#allocation4] sm:$0xff] }
 0x480   : > { %2049 = vst.msk [vmem:[#allocation4 + $0x8] sm:$0xff] %vm445_vm2, %v2041_v62  ;;  %v1823_v24 = vpop.f32.mrf.mxu1 }
 0x481   : > { %v1832_v52 = vld [vmem:[#allocation4 + $0x20] sm:$0xff]  ;;  %v1742_v22 = vpop.f32.mrf.mxu3 }
 0x482   : > { %v1840_v59 = vadd.f32 %v1832_v52, %v1818_v0  ;;  %1755 = vst.msk [vmem:[#allocation4 + $0x28] sm:$0xff] %vm445_vm2, %v1742_v22  ;;  %v1922_v26 = vpop.f32.mrf.mxu2 }
 0x483   : > { %v1933_v9 = vld [vmem:[#allocation4 + $0x18] sm:$0xff]  ;;  %v2027_v32 = vpop.f32.mrf.mxu0 }
 0x484   : > { %v1941_v3 = vadd.f32 %v1933_v9, %v1917_v15  ;;  %1848 = vst.msk [vmem:[#allocation4 + $0x20] sm:$0xff] %vm445_vm2, %v1840_v59 }
 0x485   : > { %v2034_v60 = vld [vmem:[#allocation4 + $0x10] sm:$0xff] }
 0x486   : > { %1949 = vst.msk [vmem:[#allocation4 + $0x18] sm:$0xff] %vm445_vm2, %v1941_v3  ;;  %3050 = vmatmul.msk.bf16.gmra.mxu3 %vm445_vm2, %v2467_v57  ;;  %v2042_v51 = vadd.f32 %v2034_v60, %v2017_v16 }
 0x487   : > { %v2127_v56 = vld [vmem:[#allocation4 + $0x8] sm:$0xff] }
 0x488   : > { %2050 = vst.msk [vmem:[#allocation4 + $0x10] sm:$0xff] %vm445_vm2, %v2042_v51  ;;  %v1825_v44 = vpop.f32.mrf.mxu1 }
 0x489   : > { %v1833_v58 = vld [vmem:[#allocation4 + $0x28] sm:$0xff]  ;;  %v1745_v38 = vpop.f32.mrf.mxu3 }
 0x48a   : > { %v1841_v48 = vadd.f32 %v1833_v58, %v1820_v29  ;;  %1756 = vst.msk [vmem:[#allocation4 + $0x30] sm:$0xff] %vm445_vm2, %v1745_v38  ;;  %v1925_v1 = vpop.f32.mrf.mxu2 }
 0x48b   : > { %v1934_v55 = vld [vmem:[#allocation4 + $0x20] sm:$0xff]  ;;  %v2029_v15 = vpop.f32.mrf.mxu0 }
 0x48c   : > { %v1942_v34 = vadd.f32 %v1934_v55, %v1920_v8  ;;  %1849 = vst.msk [vmem:[#allocation4 + $0x28] sm:$0xff] %vm445_vm2, %v1841_v48 }
 0x48d   : > { %v2035_v25 = vld [vmem:[#allocation4 + $0x18] sm:$0xff] }
 0x48e   : > { %1950 = vst.msk [vmem:[#allocation4 + $0x20] sm:$0xff] %vm445_vm2, %v1942_v34  ;;  %v2043_v10 = vadd.f32 %v2035_v25, %v2019_v49 }
 0x490   : > { %2051 = vst.msk [vmem:[#allocation4 + $0x18] sm:$0xff] %vm445_vm2, %v2043_v10  ;;  %v2208_v20 = vpop.f32.mrf.mxu1 }
 0x491   : > { %v1834_v40 = vld [vmem:[#allocation4 + $0x30] sm:$0xff]  ;;  %v1747_v17 = vpop.f32.mrf.mxu3 }
 0x492   : > { %v1842_v19 = vadd.f32 %v1834_v40, %v1823_v24  ;;  %1757 = vst.msk [vmem:[#allocation4 + $0x38] sm:$0xff] %vm445_vm2, %v1747_v17  ;;  %v1927_v21 = vpop.f32.mrf.mxu2 }
 0x493   : > { %v1935_v36 = vld [vmem:[#allocation4 + $0x28] sm:$0xff]  ;;  %v2404_v23 = vpop.f32.mrf.mxu0 }
 0x494   : > { %v1943_v37 = vadd.f32 %v1935_v36, %v1922_v26  ;;  %1850 = vst.msk [vmem:[#allocation4 + $0x30] sm:$0xff] %vm445_vm2, %v1842_v19 }
 0x495   : > { %v2036_v61 = vld [vmem:[#allocation4 + $0x20] sm:$0xff] }
 0x496   : > { %1951 = vst.msk [vmem:[#allocation4 + $0x28] sm:$0xff] %vm445_vm2, %v1943_v37  ;;  %v2044_v2 = vadd.f32 %v2036_v61, %v2022_v33  ;;  %v2128_v33 = vld [vmem:[#allocation4 + $0x10] sm:$0xff] }
 0x497   : > { %v2129_v3 = vld [vmem:[#allocation4 + $0x18] sm:$0xff] }
 0x498   : > { %2052 = vst.msk [vmem:[#allocation4 + $0x20] sm:$0xff] %vm445_vm2, %v2044_v2  ;;  %v2210_v35 = vpop.f32.mrf.mxu1 }
 0x499   : > { %v1835_v42 = vld [vmem:[#allocation4 + $0x38] sm:$0xff]  ;;  %v2106_v14 = vpop.f32.mrf.mxu3 }
 0x49a   : > { %v1843_v16 = vadd.f32 %v1835_v42, %v1825_v44  ;;  %v2134_v11 = vadd.f32 %v2126_v45, %v2106_v14  ;;  %v2310_v41 = vpop.f32.mrf.mxu2 }
 0x49b   : > { %v1936_v31 = vld [vmem:[#allocation4 + $0x30] sm:$0xff]  ;;  %v2406_v57 = vpop.f32.mrf.mxu0 }
 0x49c   : > { %v1944_v0 = vadd.f32 %v1936_v31, %v1925_v1  ;;  %1851 = vst.msk [vmem:[#allocation4 + $0x38] sm:$0xff] %vm445_vm2, %v1843_v16 }
 0x49d   : > { %2142 = vst.msk [vmem:[#allocation4] sm:$0xff] %vm445_vm2, %v2134_v11  ;;  %v2037_v12 = vld [vmem:[#allocation4 + $0x28] sm:$0xff] }
 0x49e   : > { %1952 = vst.msk [vmem:[#allocation4 + $0x30] sm:$0xff] %vm445_vm2, %v1944_v0  ;;  %v2045_v28 = vadd.f32 %v2037_v12, %v2024_v54 }
 0x49f   : > { %v2130_v34 = vld [vmem:[#allocation4 + $0x20] sm:$0xff] }
 0x4a0   : > { %2053 = vst.msk [vmem:[#allocation4 + $0x28] sm:$0xff] %vm445_vm2, %v2045_v28  ;;  %v2213_v43 = vpop.f32.mrf.mxu1 }
 0x4a1   : > { %v2108_v49 = vpop.f32.mrf.mxu3 }
 0x4a2   : > { %v2135_v63 = vadd.f32 %v2127_v56, %v2108_v49  ;;  %v2312_v62 = vpop.f32.mrf.mxu2 }
 0x4a3   : > { %v1937_v46 = vld [vmem:[#allocation4 + $0x38] sm:$0xff]  ;;  %v2409_v17 = vpop.f32.mrf.mxu0 }
 0x4a4   : > { %v1945_v53 = vadd.f32 %v1937_v46, %v1927_v21  ;;  %v2228_v29 = vld [vmem:[#allocation4] sm:$0xff]  ;;  %2143 = vst.msk [vmem:[#allocation4 + $0x8] sm:$0xff] %vm445_vm2, %v2135_v63 }
 0x4a5   : > { %v2236_v6 = vadd.f32 %v2228_v29, %v2208_v20  ;;  %v2038_v8 = vld [vmem:[#allocation4 + $0x30] sm:$0xff] }
 0x4a6   : > { %1953 = vst.msk [vmem:[#allocation4 + $0x38] sm:$0xff] %vm445_vm2, %v1945_v53  ;;  %v2046_v7 = vadd.f32 %v2038_v8, %v2027_v32 }
 0x4a7   : > { %2244 = vst.msk [vmem:[#allocation4] sm:$0xff] %vm445_vm2, %v2236_v6  ;;  %v2131_v42 = vld [vmem:[#allocation4 + $0x28] sm:$0xff] }
 0x4a8   : > { %2054 = vst.msk [vmem:[#allocation4 + $0x30] sm:$0xff] %vm445_vm2, %v2046_v7  ;;  %v2215_v60 = vpop.f32.mrf.mxu1 }
 0x4a9   : > { %v2111_v5 = vpop.f32.mrf.mxu3 }
 0x4aa   : > { %v2136_v27 = vadd.f32 %v2128_v33, %v2111_v5  ;;  %v2315_v38 = vpop.f32.mrf.mxu2 }
 0x4ab   : > { %v2229_v52 = vld [vmem:[#allocation4 + $0x8] sm:$0xff]  ;;  %v2411_v31 = vpop.f32.mrf.mxu0 }
 0x4ac   : > { %v2237_v22 = vadd.f32 %v2229_v52, %v2210_v35  ;;  %2144 = vst.msk [vmem:[#allocation4 + $0x10] sm:$0xff] %vm445_vm2, %v2136_v27 }
 0x4ad   : > { %v2039_v24 = vld [vmem:[#allocation4 + $0x38] sm:$0xff] }
 0x4ae   : > { %v2330_v59 = vld [vmem:[#allocation4] sm:$0xff]  ;;  %2245 = vst.msk [vmem:[#allocation4 + $0x8] sm:$0xff] %vm445_vm2, %v2237_v22  ;;  %v2047_v26 = vadd.f32 %v2039_v24, %v2029_v15 }
 0x4af   : > { %v2338_v18 = vadd.f32 %v2330_v59, %v2310_v41  ;;  %v2132_v49 = vld [vmem:[#allocation4 + $0x30] sm:$0xff] }
 0x4b0   : > { %2055 = vst.msk [vmem:[#allocation4 + $0x38] sm:$0xff] %vm445_vm2, %v2047_v26  ;;  %v2218_v19 = vpop.f32.mrf.mxu1 }
 0x4b1   : > { %2346 = vst.msk [vmem:[#allocation4] sm:$0xff] %vm445_vm2, %v2338_v18  ;;  %v2113_v9 = vpop.f32.mrf.mxu3 }
 0x4b2   : > { %v2137_v51 = vadd.f32 %v2129_v3, %v2113_v9  ;;  %v2317_v32 = vpop.f32.mrf.mxu2 }
 0x4b3   : > { %v2230_v58 = vld [vmem:[#allocation4 + $0x10] sm:$0xff]  ;;  %v2414_v8 = vpop.f32.mrf.mxu0 }
 0x4b4   : > { %v2238_v54 = vadd.f32 %v2230_v58, %v2213_v43  ;;  %2145 = vst.msk [vmem:[#allocation4 + $0x18] sm:$0xff] %vm445_vm2, %v2137_v51 }
 0x4b5   : > { %v2331_v48 = vld [vmem:[#allocation4 + $0x8] sm:$0xff] }
 0x4b6   : > { %v2339_v44 = vadd.f32 %v2331_v48, %v2312_v62  ;;  %2246 = vst.msk [vmem:[#allocation4 + $0x10] sm:$0xff] %vm445_vm2, %v2238_v54 }
 0x4b7   : > { %v2133_v5 = vld [vmem:[#allocation4 + $0x38] sm:$0xff] }
 0x4b8   : > { %2347 = vst.msk [vmem:[#allocation4 + $0x8] sm:$0xff] %vm445_vm2, %v2339_v44  ;;  %v2424_v55 = vld [vmem:[#allocation4] sm:$0xff]  ;;  %v2220_v12 = vpop.f32.mrf.mxu1 }
 0x4b9   : > { %v2116_v1 = vpop.f32.mrf.mxu3  ;;  %v2432_v25 = vadd.f32 %v2424_v55, %v2404_v23 }
 0x4ba   : > { %v2138_v10 = vadd.f32 %v2130_v34, %v2116_v1  ;;  %v2320_v15 = vpop.f32.mrf.mxu2 }
 0x4bb   : > { %v2231_v40 = vld [vmem:[#allocation4 + $0x18] sm:$0xff]  ;;  %2440 = vst.msk [vmem:[#allocation4] sm:$0xff] %vm445_vm2, %v2432_v25  ;;  %v2416_v3 = vpop.f32.mrf.mxu0 }
 0x4bc   : > { %v2239_v36 = vadd.f32 %v2231_v40, %v2215_v60  ;;  %2146 = vst.msk [vmem:[#allocation4 + $0x20] sm:$0xff] %vm445_vm2, %v2138_v10 }
 0x4bd   : > { %v2332_v37 = vld [vmem:[#allocation4 + $0x10] sm:$0xff] }
 0x4be   : > { %v2340_v20 = vadd.f32 %v2332_v37, %v2315_v38  ;;  %2247 = vst.msk [vmem:[#allocation4 + $0x18] sm:$0xff] %vm445_vm2, %v2239_v36 }
 0x4bf   : > { %v2425_v21 = vld [vmem:[#allocation4 + $0x8] sm:$0xff] }
 0x4c0   : > { %2348 = vst.msk [vmem:[#allocation4 + $0x10] sm:$0xff] %vm445_vm2, %v2340_v20  ;;  %v2433_v61 = vadd.f32 %v2425_v21, %v2406_v57  ;;  %v2223_v7 = vpop.f32.mrf.mxu1 }
 0x4c1   : > { %v2118_v2 = vpop.f32.mrf.mxu3 }
 0x4c2   : > { %v2139_v14 = vadd.f32 %v2131_v42, %v2118_v2  ;;  %2441 = vst.msk [vmem:[#allocation4 + $0x8] sm:$0xff] %vm445_vm2, %v2433_v61  ;;  %v2322_v43 = vpop.f32.mrf.mxu2  ;;  %v2526_v9 = vld [vmem:[#allocation4] sm:$0xff] }
 0x4c3   : > { %v2232_v45 = vld [vmem:[#allocation4 + $0x20] sm:$0xff]  ;;  %v2419_v10 = vpop.f32.mrf.mxu0 }
 0x4c4   : > { %v2240_v16 = vadd.f32 %v2232_v45, %v2218_v19  ;;  %2147 = vst.msk [vmem:[#allocation4 + $0x28] sm:$0xff] %vm445_vm2, %v2139_v14 }
 0x4c5   : > { %v2333_v11 = vld [vmem:[#allocation4 + $0x18] sm:$0xff] }
 0x4c6   : > { %v2341_v0 = vadd.f32 %v2333_v11, %v2317_v32  ;;  %2248 = vst.msk [vmem:[#allocation4 + $0x20] sm:$0xff] %vm445_vm2, %v2240_v16 }
 0x4c7   : > { %v2426_v35 = vld [vmem:[#allocation4 + $0x10] sm:$0xff] }
 0x4c8   : > { %2349 = vst.msk [vmem:[#allocation4 + $0x18] sm:$0xff] %vm445_vm2, %v2341_v0  ;;  %v2434_v28 = vadd.f32 %v2426_v35, %v2409_v17  ;;  %v2225_v60 = vpop.f32.mrf.mxu1 }
 0x4c9   : > { %v2121_v41 = vpop.f32.mrf.mxu3  ;;  %v2527_v34 = vld [vmem:[#allocation4 + $0x8] sm:$0xff] }
 0x4ca   : > { %v2140_v56 = vadd.f32 %v2132_v49, %v2121_v41  ;;  %2442 = vst.msk [vmem:[#allocation4 + $0x10] sm:$0xff] %vm445_vm2, %v2434_v28  ;;  %v2325_v51 = vpop.f32.mrf.mxu2  ;;  %v3126_v41 = vld [vmem:[%s4477_s10] ss:$0 sm:$0xff] }
 0x4cb   : > { %v2233_v63 = vld [vmem:[#allocation4 + $0x28] sm:$0xff]  ;;  %v2421_v61 = vpop.f32.mrf.mxu0 }
 0x4cc   : > { %v2241_v46 = vadd.f32 %v2233_v63, %v2220_v12  ;;  %2148 = vst.msk [vmem:[#allocation4 + $0x30] sm:$0xff] %vm445_vm2, %v2140_v56 }
 0x4cd   : > { %v2334_v53 = vld [vmem:[#allocation4 + $0x20] sm:$0xff] }
 0x4ce   : > { %v2342_v29 = vadd.f32 %v2334_v53, %v2320_v15  ;;  %2249 = vst.msk [vmem:[#allocation4 + $0x28] sm:$0xff] %vm445_vm2, %v2241_v46 }
 0x4cf   : > { %v2427_v6 = vld [vmem:[#allocation4 + $0x18] sm:$0xff] }
 0x4d0   : > { %2350 = vst.msk [vmem:[#allocation4 + $0x20] sm:$0xff] %vm445_vm2, %v2342_v29  ;;  %v2435_v23 = vadd.f32 %v2427_v6, %v2411_v31 }
 0x4d1   : > { %v2123_v62 = vpop.f32.mrf.mxu3  ;;  %v2528_v20 = vld [vmem:[#allocation4 + $0x10] sm:$0xff] }
 0x4d2   : > { %v2141_v33 = vadd.f32 %v2133_v5, %v2123_v62  ;;  %2443 = vst.msk [vmem:[#allocation4 + $0x18] sm:$0xff] %vm445_vm2, %v2435_v23  ;;  %v2327_v40 = vpop.f32.mrf.mxu2 }
 0x4d3   : > { %v2234_v27 = vld [vmem:[#allocation4 + $0x30] sm:$0xff] }
 0x4d4   : > { %v2242_v52 = vadd.f32 %v2234_v27, %v2223_v7  ;;  %2149 = vst.msk [vmem:[#allocation4 + $0x38] sm:$0xff] %vm445_vm2, %v2141_v33 }
 0x4d5   : > { %v2335_v22 = vld [vmem:[#allocation4 + $0x28] sm:$0xff] }
 0x4d6   : > { %v2343_v24 = vadd.f32 %v2335_v22, %v2322_v43  ;;  %2250 = vst.msk [vmem:[#allocation4 + $0x30] sm:$0xff] %vm445_vm2, %v2242_v52 }
 0x4d7   : > { %v2428_v59 = vld [vmem:[#allocation4 + $0x20] sm:$0xff] }
 0x4d8   : > { %2351 = vst.msk [vmem:[#allocation4 + $0x28] sm:$0xff] %vm445_vm2, %v2343_v24  ;;  %v2436_v26 = vadd.f32 %v2428_v59, %v2414_v8 }
 0x4d9   : > { %v2506_v18 = vpop.f32.mrf.mxu3  ;;  %v2529_v45 = vld [vmem:[#allocation4 + $0x18] sm:$0xff] }
 0x4da   : > { %v2534_v57 = vadd.f32 %v2526_v9, %v2506_v18  ;;  %2444 = vst.msk [vmem:[#allocation4 + $0x20] sm:$0xff] %vm445_vm2, %v2436_v26 }
 0x4db   : > { %v2235_v58 = vld [vmem:[#allocation4 + $0x38] sm:$0xff] }
 0x4dc   : > { %v2243_v38 = vadd.f32 %v2235_v58, %v2225_v60  ;;  %2542 = vst.msk [vmem:[#allocation4] sm:$0xff] %vm445_vm2, %v2534_v57 }
 0x4dd   : > { %v2336_v54 = vld [vmem:[#allocation4 + $0x30] sm:$0xff] }
 0x4de   : > { %v2344_v48 = vadd.f32 %v2336_v54, %v2325_v51  ;;  %2251 = vst.msk [vmem:[#allocation4 + $0x38] sm:$0xff] %vm445_vm2, %v2243_v38 }
 0x4df   : > { %v2429_v44 = vld [vmem:[#allocation4 + $0x28] sm:$0xff] }
 0x4e0   : > { %2352 = vst.msk [vmem:[#allocation4 + $0x30] sm:$0xff] %vm445_vm2, %v2344_v48  ;;  %v2437_v55 = vadd.f32 %v2429_v44, %v2416_v3 }
 0x4e1   : > { %v2508_v1 = vpop.f32.mrf.mxu3  ;;  %v2530_v31 = vld [vmem:[#allocation4 + $0x20] sm:$0xff] }
 0x4e2   : > { %v2535_v25 = vadd.f32 %v2527_v34, %v2508_v1  ;;  %2445 = vst.msk [vmem:[#allocation4 + $0x28] sm:$0xff] %vm445_vm2, %v2437_v55 }
 0x4e3   : > { %v2550_v49 = vld [vmem:[#allocation4] sm:$0xff] }
 0x4e4   : > { %2543 = vst.msk [vmem:[#allocation4 + $0x8] sm:$0xff] %vm445_vm2, %v2535_v25  ;;  %v4289_v8 = vadd.f32 %v3126_v41, %v2550_v49 }
 0x4e5   : > { %v2337_v17 = vld [vmem:[#allocation4 + $0x38] sm:$0xff] }
 0x4e6   : > { %v2345_v19 = vadd.f32 %v2337_v17, %v2327_v40  ;;  %v2593_v33 = vmul.f32 %v4289_v8, %v4289_v8  ;;  %v2572_v26 = vsel %vm445_vm2, %v4289_v8, 0.0 }
 0x4e7   : > { %v2430_v36 = vld [vmem:[#allocation4 + $0x30] sm:$0xff] }
 0x4e8   : > { %2353 = vst.msk [vmem:[#allocation4 + $0x38] sm:$0xff] %vm445_vm2, %v2345_v19  ;;  %v2438_v37 = vadd.f32 %v2430_v36, %v2419_v10  ;;  %v2601_v38 = vsel %vm445_vm2, %v2593_v33, 0.0 }
 0x4e9   : > { %v2511_v32 = vpop.f32.mrf.mxu3  ;;  %v2531_v15 = vld [vmem:[#allocation4 + $0x28] sm:$0xff] }
 0x4ea   : > { %v2536_v21 = vadd.f32 %v2528_v20, %v2511_v32  ;;  %2446 = vst.msk [vmem:[#allocation4 + $0x30] sm:$0xff] %vm445_vm2, %v2438_v37 }
 0x4eb   : > { %v2551_v28 = vld [vmem:[#allocation4 + $0x8] sm:$0xff] }
 0x4ec   : > { %2544 = vst.msk [vmem:[#allocation4 + $0x10] sm:$0xff] %vm445_vm2, %v2536_v21  ;;  %v4287_v53 = vadd.f32 %v3126_v41, %v2551_v28 }
 0x4ee   : > { %v2594_v43 = vmul.f32 %v4287_v53, %v4287_v53  ;;  %v2573_v52 = vsel %vm445_vm2, %v4287_v53, 0.0 }
 0x4ef   : > { %v2431_v2 = vld [vmem:[#allocation4 + $0x38] sm:$0xff]  ;;  %v2574_v58 = vadd.f32 %v2573_v52, %v2572_v26 }
 0x4f0   : > { %v2439_v42 = vadd.f32 %v2431_v2, %v2421_v61  ;;  %v2602_v18 = vsel %vm445_vm2, %v2594_v43, 0.0 }
 0x4f1   : > { %v2513_v14 = vpop.f32.mrf.mxu3  ;;  %v2532_v63 = vld [vmem:[#allocation4 + $0x30] sm:$0xff]  ;;  %v2603_v34 = vadd.f32 %v2602_v18, %v2601_v38 }
 0x4f2   : > { %v2537_v16 = vadd.f32 %v2529_v45, %v2513_v14  ;;  %2447 = vst.msk [vmem:[#allocation4 + $0x38] sm:$0xff] %vm445_vm2, %v2439_v42 }
 0x4f3   : > { %v2552_v46 = vld [vmem:[#allocation4 + $0x10] sm:$0xff] }
 0x4f4   : > { %2545 = vst.msk [vmem:[#allocation4 + $0x18] sm:$0xff] %vm445_vm2, %v2537_v16  ;;  %v4292_v7 = vadd.f32 %v3126_v41, %v2552_v46 }
 0x4f6   : > { %v2595_v22 = vmul.f32 %v4292_v7, %v4292_v7  ;;  %v2575_v57 = vsel %vm445_vm2, %v4292_v7, 0.0 }
 0x4f7   : > { %v2576_v1 = vadd.f32 %v2575_v57, %v2574_v58 }
 0x4f8   : > { %v2604_v55 = vsel %vm445_vm2, %v2595_v22, 0.0 }
 0x4f9   : > { %v2516_v11 = vpop.f32.mrf.mxu3  ;;  %v2533_v59 = vld [vmem:[#allocation4 + $0x38] sm:$0xff]  ;;  %v2605_v19 = vadd.f32 %v2604_v55, %v2603_v34 }
 0x4fa   : > { %v2538_v0 = vadd.f32 %v2530_v31, %v2516_v11 }
 0x4fb   : > { %v2553_v6 = vld [vmem:[#allocation4 + $0x18] sm:$0xff] }
 0x4fc   : > { %2546 = vst.msk [vmem:[#allocation4 + $0x20] sm:$0xff] %vm445_vm2, %v2538_v0  ;;  %v4296_v62 = vadd.f32 %v3126_v41, %v2553_v6 }
 0x4fe   : > { %v2596_v60 = vmul.f32 %v4296_v62, %v4296_v62  ;;  %v2577_v48 = vsel %vm445_vm2, %v4296_v62, 0.0 }
 0x4ff   : > { %v2578_v17 = vadd.f32 %v2577_v48, %v2576_v1 }
 0x500   : > { %v2606_v40 = vsel %vm445_vm2, %v2596_v60, 0.0 }
 0x501   : > { %v2518_v12 = vpop.f32.mrf.mxu3  ;;  %v2607_v21 = vadd.f32 %v2606_v40, %v2605_v19 }
 0x502   : > { %v2539_v35 = vadd.f32 %v2531_v15, %v2518_v12 }
 0x503   : > { %v2554_v23 = vld [vmem:[#allocation4 + $0x20] sm:$0xff] }
 0x504   : > { %2547 = vst.msk [vmem:[#allocation4 + $0x28] sm:$0xff] %vm445_vm2, %v2539_v35  ;;  %v4300_v27 = vadd.f32 %v3126_v41, %v2554_v23 }
 0x506   : > { %v2597_v44 = vmul.f32 %v4300_v27, %v4300_v27  ;;  %v2579_v25 = vsel %vm445_vm2, %v4300_v27, 0.0 }
 0x507   : > { %v2580_v20 = vadd.f32 %v2579_v25, %v2578_v17 }
 0x508   : > { %v2608_v32 = vsel %vm445_vm2, %v2597_v44, 0.0 }
 0x509   : > { %v2521_v56 = vpop.f32.mrf.mxu3  ;;  %v2609_v45 = vadd.f32 %v2608_v32, %v2607_v21 }
 0x50a   : > { %v2540_v29 = vadd.f32 %v2532_v63, %v2521_v56 }
 0x50b   : > { %v2555_v5 = vld [vmem:[#allocation4 + $0x28] sm:$0xff] }
 0x50c   : > { %2548 = vst.msk [vmem:[#allocation4 + $0x30] sm:$0xff] %vm445_vm2, %v2540_v29  ;;  %v4309_v3 = vadd.f32 %v3126_v41, %v2555_v5 }
 0x50e   : > { %v2598_v10 = vmul.f32 %v4309_v3, %v4309_v3  ;;  %v2581_v36 = vsel %vm445_vm2, %v4309_v3, 0.0 }
 0x50f   : > { %v2582_v14 = vadd.f32 %v2581_v36, %v2580_v20 }
 0x510   : > { %v2610_v2 = vsel %vm445_vm2, %v2598_v10, 0.0 }
 0x511   : > { %v2523_v24 = vpop.f32.mrf.mxu3  ;;  %v2611_v0 = vadd.f32 %v2610_v2, %v2609_v45 }
 0x512   : > { %v2541_v9 = vadd.f32 %v2533_v59, %v2523_v24 }
 0x513   : > { %v2556_v51 = vld [vmem:[#allocation4 + $0x30] sm:$0xff] }
 0x514   : > { %2549 = vst.msk [vmem:[#allocation4 + $0x38] sm:$0xff] %vm445_vm2, %v2541_v9  ;;  %v4317_v54 = vadd.f32 %v3126_v41, %v2556_v51 }
 0x516   : > { %v2599_v37 = vmul.f32 %v4317_v54, %v4317_v54  ;;  %v2583_v61 = vsel %vm445_vm2, %v4317_v54, 0.0 }
 0x517   : > { %v2584_v31 = vadd.f32 %v2583_v61, %v2582_v14 }
 0x518   : > { %v2612_v11 = vsel %vm445_vm2, %v2599_v37, 0.0 }
 0x519   : > { %v2613_v28 = vadd.f32 %v2612_v11, %v2611_v0 }
 0x51b   : > { %v2557_v42 = vld [vmem:[#allocation4 + $0x38] sm:$0xff] }
 0x51c   : > { %v4337_v16 = vadd.f32 %v3126_v41, %v2557_v42 }
 0x51e   : > { %v2585_v12 = vsel %vm445_vm2, %v4337_v16, 0.0  ;;  %v2600_v15 = vmul.f32 %v4337_v16, %v4337_v16 }
 0x51f   : > { %v2586_v35 = vadd.f32 %v2585_v12, %v2584_v31 }
 0x520   : > { %v2614_v49 = vsel %vm445_vm2, %v2600_v15, 0.0 }
 0x521   : > { %v2587_v56 = vrot.slane %v2586_v35, 4  ;;  %v2615_v63 = vadd.f32 %v2614_v49, %v2613_v28 }
 0x523   : > { %v2588_v46 = vadd.f32 %v2587_v56, %v2586_v35  ;;  %v2616_v29 = vrot.slane %v2615_v63, 4 }
 0x525   : > { %v2589_v41 = vrot.slane %v2588_v46, 2  ;;  %v2617_v6 = vadd.f32 %v2616_v29, %v2615_v63 }
 0x527   : > { %v2590_v23 = vadd.f32 %v2589_v41, %v2588_v46  ;;  %v2618_v43 = vrot.slane %v2617_v6, 2 }
 0x529   : > { %v2591_v5 = vrot.slane %v2590_v23, 1  ;;  %v2619_v33 = vadd.f32 %v2618_v43, %v2617_v6 }
 0x52b   : > { %v2592_v52 = vadd.f32 %v2591_v5, %v2590_v23  ;;  %v2620_v22 = vrot.slane %v2619_v33, 1 }
 0x52d   : > { %v2648_v24 = vsel %vm3811_vm5, %v2592_v52, 0.0  ;;  %v2622_v59 = vsel %vm469_vm6, %v2592_v52, 0.0  ;;  %v2621_v26 = vadd.f32 %v2620_v22, %v2619_v33  ;;  %v2674_v58 = vsel %vm3827_vm9, %v2592_v52, 0.0 }
 0x52e   : > { %v2649_v18 = vsel %vm445_vm2, %v2648_v24, 0.0  ;;  %v2623_v9 = vsel %vm445_vm2, %v2622_v59, 0.0  ;;  %v2700_v38 = vsel %vm3842_vm12, %v2592_v52, 0.0  ;;  %v2675_v44 = vsel %vm445_vm2, %v2674_v58, 0.0 }
 0x52f   : > { %2650 = vadd.xlane.f32.xlu0 %v2649_v18  ;;  %2624 = vadd.xlane.f32.xlu2 %v2623_v9  ;;  %v2626_v57 = vsel %vm469_vm6, %v2621_v26, 0.0  ;;  %v2652_v51 = vsel %vm3811_vm5, %v2621_v26, 0.0  ;;  %v2701_v55 = vsel %vm445_vm2, %v2700_v38, 0.0  ;;  %v2704_v1 = vsel %vm3842_vm12, %v2621_v26, 0.0 }
 0x530   : > { %v2627_v60 = vsel %vm445_vm2, %v2626_v57, 0.0  ;;  %v2653_v48 = vsel %vm445_vm2, %v2652_v51, 0.0  ;;  %v2678_v34 = vsel %vm3827_vm9, %v2621_v26, 0.0  ;;  %v2705_v25 = vsel %vm445_vm2, %v2704_v1, 0.0 }
 0x531   : > { %2628 = vadd.xlane.f32.xlu1 %v2627_v60  ;;  %v2679_v10 = vsel %vm445_vm2, %v2678_v34, 0.0 }
 0x537   : > { %2654 = vadd.xlane.f32.xlu0 %v2653_v48  ;;  %2676 = vadd.xlane.f32.xlu2 %v2675_v44 }
 0x539   : > { %2702 = vadd.xlane.f32.xlu1 %v2701_v55 }
 0x53f   : > { %2706 = vadd.xlane.f32.xlu0 %v2705_v25  ;;  %2680 = vadd.xlane.f32.xlu2 %v2679_v10 }
 0x5a2   : > { %v2651_v40 = vpop.xlane.xlu0 %2650  ;;  %v2625_v17 = vpop.xlane.xlu2 %2624 }
 0x5a3   : > { %v2630_v19 = vmul.f32 0.001953125, %v2625_v17  ;;  %v4369_v20 = vmul.f32 0.001953125, %v2651_v40 }
 0x5a4   : > { %v2629_v36 = vpop.xlane.xlu1 %2628 }
 0x5a5   : > { %v2632_v37 = vmul.f32 %v2630_v19, %v2630_v19  ;;  %v2631_v32 = vmul.f32 0.001953125, %v2629_v36  ;;  %v2658_v14 = vmul.f32 %v4369_v20, %v4369_v20  ;;  %v2635_v17 = vsel %vm469_vm6, %v2630_v19, 0.0 }
 0x5a7   : > { %v2633_v21 = vsub.f32 %v2631_v32, %v2632_v37 }
 0x5a9   : > { %v2634_v61 = vmax.f32 %v2633_v21, 0.0 }
 0x5aa   : > { %v2655_v2 = vpop.xlane.xlu0 %2654  ;;  %v2677_v42 = vpop.xlane.xlu2 %2676 }
 0x5ab   : > { %v2636_v45 = vadd.f32 1e-05, %v2634_v61  ;;  %v2657_v11 = vmul.f32 0.001953125, %v2655_v2  ;;  %v2682_v35 = vmul.f32 0.001953125, %v2677_v42  ;;  %v2661_v2 = vsel %vm3811_vm5, %v4369_v20, %v2635_v17  ;;  %v2570_v20 = vld [vmem:[%s4478_s11] sm:$0x1] }
 0x5ac   : > { %v2703_v31 = vpop.xlane.xlu1 %2702 }
 0x5ad   : > { %3140 = vrsqrt.f32 %v2636_v45  ;;  %v2659_v0 = vsub.f32 %v2657_v11, %v2658_v14  ;;  %v4373_v15 = vmul.f32 0.001953125, %v2703_v31  ;;  %v2684_v41 = vmul.f32 %v2682_v35, %v2682_v35 }
 0x5ae   : > { %vm2643_vm10 = vweird.f32 %v2636_v45  ;;  %v2687_v14 = vsel %vm3827_vm9, %v2682_v35, %v2661_v2 }
 0x5af   : > { %v2660_v12 = vmax.f32 %v2659_v0, 0.0  ;;  %v2710_v46 = vmul.f32 %v4373_v15, %v4373_v15  ;;  %v2713_v35 = vsel %vm3842_vm12, %v4373_v15, %v2687_v14  ;;  %v3127_v15 = vld [vmem:[%s4479_s12] ss:$0 sm:$0xff] }
 0x5b0   : > { %v2726_v4 = vsub.f32 %v4289_v8, %v2713_v35  ;;  %v2730_v47 = vsub.f32 %v4300_v27, %v2713_v35  ;;  %v2731_v13 = vsub.f32 %v4309_v3, %v2713_v35  ;;  %v2733_v8 = vsub.f32 %v4337_v16, %v2713_v35 }
 0x5b1   : > { %v2662_v28 = vadd.f32 1e-05, %v2660_v12 }
 0x5b2   : > { %v2707_v49 = vpop.xlane.xlu0 %2706  ;;  %v2681_v56 = vpop.xlane.xlu2 %2680 }
 0x5b3   : > { %v3141_v63 = vpop.eup %3140  ;;  %3142 = vrsqrt.f32 %v2662_v28  ;;  %v2709_v29 = vmul.f32 0.001953125, %v2707_v49  ;;  %v2683_v6 = vmul.f32 0.001953125, %v2681_v56  ;;  %vm2669_vm13 = vweird.f32 %v2662_v28 }
 0x5b4   : > { %v2638_v23 = vmul.f32 %v3141_v63, %v2636_v45  ;;  %vm2644_vm7 = vweird.f32 %v3141_v63  ;;  %v2727_v56 = vsub.f32 %v4287_v53, %v2713_v35 }
 0x5b5   : > { %v2711_v43 = vsub.f32 %v2709_v29, %v2710_v46  ;;  %v2685_v5 = vsub.f32 %v2683_v6, %v2684_v41  ;;  %vm4379_vm11 = vmor %vm2643_vm10, %vm2644_vm7  ;;  %v2729_v46 = vsub.f32 %v4296_v62, %v2713_v35  ;;  %v2732_v41 = vsub.f32 %v4317_v54, %v2713_v35 }
 0x5b6   : > { %v2639_v24 = vmul.f32 %v3141_v63, %v2638_v23 }
 0x5b7   : > { %v2712_v33 = vmax.f32 %v2711_v43, 0.0  ;;  %v2686_v52 = vmax.f32 %v2685_v5, 0.0 }
 0x5b8   : > { %v2640_v57 = vmul.f32 0.5, %v2639_v24 }
 0x5b9   : > { %v3143_v22 = vpop.eup %3142  ;;  %v2714_v59 = vadd.f32 1e-05, %v2712_v33  ;;  %v2688_v18 = vadd.f32 1e-05, %v2686_v52 }
 0x5ba   : > { %v2664_v26 = vmul.f32 %v3143_v22, %v2662_v28  ;;  %v2641_v58 = vsub.f32 1.5, %v2640_v57  ;;  %vm2670_vm8 = vweird.f32 %v3143_v22 }
 0x5bb   : > { %3144 = vrsqrt.f32 %v2714_v59  ;;  %vm2671_vm1 = vmor %vm2669_vm13, %vm2670_vm8  ;;  %vm2721_vm0 = vweird.f32 %v2714_v59  ;;  %vm2695_vm4 = vweird.f32 %v2688_v18 }
 0x5bc   : > { %v2665_v9 = vmul.f32 %v3143_v22, %v2664_v26  ;;  %3146 = vrsqrt.f32 %v2688_v18  ;;  %v2642_v34 = vmul.f32 %v3141_v63, %v2641_v58  ;;  %v4513_v58 = vld [vmem:[#allocation12_spill] sm:$0xff] }
 0x5be   : > { %v2666_v60 = vmul.f32 0.5, %v2665_v9  ;;  %v2646_v21 = vsel %vm4379_vm11, %v3141_v63, %v2642_v34  ;;  %v2728_v63 = vsub.f32 %v4292_v7, %v2713_v35  ;;  %v4511_v9 = vld [vmem:[#allocation10_spill] sm:$0xff] }
 0x5bf   : > { %v2647_v11 = vsel %vm469_vm6, %v2646_v21, 0.0 }
 0x5c0   : > { %v2667_v48 = vsub.f32 1.5, %v2666_v60  ;;  %v4512_v60 = vld [vmem:[#allocation11_spill] sm:$0xff] }
 0x5c1   : > { %v3145_v51 = vpop.eup %3144 }
 0x5c2   : > { %v3147_v38 = vpop.eup %3146  ;;  %v2716_v44 = vmul.f32 %v3145_v51, %v2714_v59  ;;  %v2668_v10 = vmul.f32 %v3143_v22, %v2667_v48  ;;  %vm2722_vm14 = vweird.f32 %v3145_v51  ;;  %v4514_v48 = vld [vmem:[#allocation13_spill] sm:$0xff] }
 0x5c3   : > { %v2690_v55 = vmul.f32 %v3147_v38, %v2688_v18  ;;  %vm2696_vm15 = vweird.f32 %v3147_v38  ;;  %vm2723_vm3 = vmor %vm2721_vm0, %vm2722_vm14 }
 0x5c4   : > { %v2717_v1 = vmul.f32 %v3145_v51, %v2716_v44  ;;  %v2672_v19 = vsel %vm2671_vm1, %v3143_v22, %v2668_v10  ;;  %vm2697_vm7 = vmor %vm2695_vm4, %vm2696_vm15 }
 0x5c5   : > { %v2691_v25 = vmul.f32 %v3147_v38, %v2690_v55  ;;  %v2673_v0 = vsel %vm3811_vm5, %v2672_v19, %v2647_v11  ;;  %v4515_v55 = vld [vmem:[#allocation14_spill] sm:$0xff] }
 0x5c6   : > { %v2718_v40 = vmul.f32 0.5, %v2717_v1 }
 0x5c7   : > { %v2692_v36 = vmul.f32 0.5, %v2691_v25 }
 0x5c8   : > { %v2719_v32 = vsub.f32 1.5, %v2718_v40 }
 0x5c9   : > { %v2693_v61 = vsub.f32 1.5, %v2692_v36 }
 0x5ca   : > { %v2720_v42 = vmul.f32 %v3145_v51, %v2719_v32 }
 0x5cb   : > { %v2694_v45 = vmul.f32 %v3147_v38, %v2693_v61 }
 0x5cc   : > { %v2724_v31 = vsel %vm2723_vm3, %v3145_v51, %v2720_v42 }
 0x5cd   : > { %v2698_v12 = vsel %vm2697_vm7, %v3147_v38, %v2694_v45 }
 0x5ce   : > { %v2699_v28 = vsel %vm3827_vm9, %v2698_v12, %v2673_v0 }
 0x5cf   : > { %v2725_v50 = vsel %vm3842_vm12, %v2724_v31, %v2699_v28 }
 0x5d0   : > { %v2734_v49 = vmul.f32 %v2725_v50, %v2570_v20 }
 0x5d2   : > { %v2735_v29 = vperm.slane %v2734_v49, 0 }
 0x5d4   : > { %v2736_v53 = vmul.f32 %v2735_v29, %v2726_v4  ;;  %v2737_v6 = vmul.f32 %v2735_v29, %v2727_v56  ;;  %v2738_v7 = vmul.f32 %v2735_v29, %v2728_v63  ;;  %v2739_v62 = vmul.f32 %v2735_v29, %v2729_v46 }
 0x5d5   : > { %v2740_v23 = vmul.f32 %v2735_v29, %v2730_v47  ;;  %v2741_v43 = vmul.f32 %v2735_v29, %v2731_v13  ;;  %v2742_v5 = vmul.f32 %v2735_v29, %v2732_v41  ;;  %v2743_v33 = vmul.f32 %v2735_v29, %v2733_v8 }
 0x5d6   : > { %v2747_v52 = vadd.f32 %v3127_v15, %v2736_v53  ;;  %v2748_v27 = vadd.f32 %v3127_v15, %v2737_v6  ;;  %v2749_v22 = vadd.f32 %v3127_v15, %v2738_v7  ;;  %v2750_v3 = vadd.f32 %v3127_v15, %v2739_v62 }
 0x5d7   : > { %v2751_v24 = vadd.f32 %v3127_v15, %v2740_v23  ;;  %v2752_v54 = vadd.f32 %v3127_v15, %v2741_v43  ;;  %v2753_v59 = vadd.f32 %v3127_v15, %v2742_v5  ;;  %v2754_v16 = vadd.f32 %v3127_v15, %v2743_v33 }
 0x5d8   : > { %v2755_v26 = vadd.f32 %v2747_v52, %v3917_v30  ;;  %v2756_v18 = vadd.f32 %v2748_v27, %v3919_v39  ;;  %v2757_v57 = vadd.f32 %v2749_v22, %v4511_v9  ;;  %v2758_v51 = vadd.f32 %v2750_v3, %v4512_v60  ;;  %v4516_v30 = vld [vmem:[#allocation15_spill] sm:$0xff] }
 0x5d9   : > { %v2759_v38 = vadd.f32 %v2751_v24, %v4513_v58  ;;  %v2760_v44 = vadd.f32 %v2752_v54, %v4514_v48  ;;  %v2761_v1 = vadd.f32 %v2753_v59, %v4515_v55  ;;  %v2762_v40 = vadd.f32 %v2754_v16, %v4516_v30 }
 0x5da   : > { %v2763_v34 = vmax.f32 %v2755_v26, 0.0  ;;  %v2764_v25 = vmax.f32 %v2756_v18, 0.0  ;;  %v2765_v10 = vmax.f32 %v2757_v57, 0.0  ;;  %v2766_v39 = vmax.f32 %v2758_v51, 0.0 }
 0x5db   : > { %v2767_v17 = vmax.f32 %v2759_v38, 0.0  ;;  %v2768_v36 = vmax.f32 %v2760_v44, 0.0  ;;  %v2769_v37 = vmax.f32 %v2761_v1, 0.0  ;;  %v2770_v32 = vmax.f32 %v2762_v40, 0.0 }
 0x5dc   : > { %2771 = vst.msk [vmem:[%s433_s20] sm:$0xff] %vm445_vm2, %v2763_v34 }
 0x5dd   : > { %2772 = vst.msk [vmem:[%s433_s20 + $0x8] sm:$0xff] %vm445_vm2, %v2764_v25 }
 0x5de   : > { %2773 = vst.msk [vmem:[%s433_s20 + $0x10] sm:$0xff] %vm445_vm2, %v2765_v10 }
 0x5df   : > { %2774 = vst.msk [vmem:[%s433_s20 + $0x18] sm:$0xff] %vm445_vm2, %v2766_v39 }
 0x5e0   : > { %2775 = vst.msk [vmem:[%s433_s20 + $0x20] sm:$0xff] %vm445_vm2, %v2767_v17 }
 0x5e1   : > { %2776 = vst.msk [vmem:[%s433_s20 + $0x28] sm:$0xff] %vm445_vm2, %v2768_v36 }
 0x5e2   : > { %2777 = vst.msk [vmem:[%s433_s20 + $0x30] sm:$0xff] %vm445_vm2, %v2769_v37 }
 0x5e3   : > { %2778 = vst.msk [vmem:[%s433_s20 + $0x38] sm:$0xff] %vm445_vm2, %v2770_v32 }
 0x5e4   : > { %3175 = shalt.err (!%p3172_p3)
}
 0x5e5   : > { %s3214_s27 = smov 128   ;;  %s3215_s20 = smov 8  }
 0x5e6   : > { %3078 = dma.vmem_to_hbm [thread:$0]  (%p3324_p5), %s2793_s21, 1024, %s2795_s22, %s2780_s23, %s3214_s27, %s3214_s27, %s3215_s20  }
 0x5e7 PF: > { %p3084_p4 = scmp.ge.s32.totalorder %s3210_s28, 2  ;;  %s2809_s30 = sand.u32 1, %s3198_s25  }
 0x5e8   : > { %s2810_s0 = scalar_lea.sflag [#allocation6], %s2809_s30 }
 0x5e9   : > { %p3081_p7 = pnand %p3084_p4, %p3328_p6 }
 0x5eb   : > { %p3082_p8 = pneg %p3081_p7 }
 0x5ed   : > { %3193 = dma.done.wait (%p3082_p8), %s2810_s0, 1024  }
 0x5ee   : > { %3195 = vsyncadd (%p3082_p8), %s2810_s0, 4294966272  ;;  %s4517_s24 = sld [smem:[#allocation8_spill]]  ;;  %p23_p9 = scmp.ge.s32.totalorder %s3311_s14, 4  }
 0x5ef   : > { %s4518_s27 = sld [smem:[#allocation9_spill]]  ;;  %s4519_s25 = smov %s3202_s26 }
 0x5f0   : > { %s4521_s28 = smov %s3311_s14  ;;  %25 = sbr.rel (!%p23_p9) target bundleno = 5 (0x5), region = 123 }
 0x5f4   : > { %s4520_s26 = smov %s4517_s24 }
 0x5f5   :  { %2816 = vsyncpa [#allocation6], 1 }
 0x5f6   :  { %2818 = vsyncpa [#allocation6 + $0x1], 1 }

</bundles_post_ra>
